<compile_context>
chip_gen: v6e
topology: v6e:2x2x1
jax: 0.10.0
libtpu: 0.0.40
codegen_flags: <defaults>
</compile_context>

<pallas_src>
import functools

import jax
import jax.numpy as jnp
from jax import lax
from jax.experimental import pallas as pl
from jax.experimental.pallas import tpu as pltpu

EPS = 1e-5          # nn.BatchNorm2d default eps
EXPANSION = 4


def _vmem_spec():
    # whole-array-resident VMEM block (single grid step; everything fits easily)
    return pl.BlockSpec(memory_space=pltpu.MemorySpace.VMEM)


def _bn_relu(x, gamma, beta):
    """Training-mode BatchNorm (batch stats, biased variance) fused with ReLU.

    x: (M, C) f32 with M = N*H*W (reduction over axis 0), gamma/beta: (1, C).
    """
    mean = jnp.mean(x, axis=0, keepdims=True)
    var = jnp.mean(jnp.square(x - mean), axis=0, keepdims=True)
    y = (x - mean) * lax.rsqrt(var + EPS) * gamma + beta
    return jnp.maximum(y, 0.0)


def _bottleneck_kernel(x_ref, g1_ref, b1_ref, w1_ref, g2_ref, b2_ref, w2_ref,
                       g3_ref, b3_ref, w3_ref, *rest,
                       n, h, w, cin, planes, cout, stride, has_shortcut):
    """Fused PreActBottleneck forward (single launch, NHWC, channels on lanes).

    Inputs (VMEM refs):
      x_ref  : (N*H*W, Cin) f32            input activations (flattened NHWC)
      g*/b*  : (1, C) f32                  BatchNorm affine params
      w1_ref : (Cin, planes) bf16          1x1 conv1
      w2_ref : (9*planes, planes) bf16     3x3 conv2 im2col weight, row = tap*planes + ci
      w3_ref : (planes, cout) bf16         1x1 conv3 (cout = 4*planes)
      ws_ref : (Cin, cout) bf16            1x1 projection shortcut (optional)
    Output:
      o_ref  : (N*Ho*Wo, cout) f32
    Scratch (VMEM f32): 1-px-padded conv2 staging (row-parity split for stride 2)
      and even-row staging of relu(bn1(x)) for the strided projection shortcut.
    """
    ho, wo = h // stride, w // stride
    m1 = n * ho * wo

    # ---- unpack optional input / output / scratch refs ----------------------
    idx = 0
    ws_ref = None
    if has_shortcut:
        ws_ref = rest[idx]; idx += 1
    o_ref = rest[idx]; idx += 1
    if stride == 2:
        a2e_ref = rest[idx]      # even input rows of bn2 act, left-padded by 1 col
        a2o_ref = rest[idx + 1]  # odd  input rows, padded by 1 row (top) + 1 col
        idx += 2
        a1e_ref = rest[idx] if has_shortcut else None   # even rows of relu(bn1(x))
    else:
        a2p_ref = rest[idx]      # fully 1-px padded bn2 act

    # ---- bn1 + relu ----------------------------------------------------------
    a1 = _bn_relu(x_ref[...], g1_ref[...], b1_ref[...])          # (m0, cin) f32
    a1_bf = a1.astype(jnp.bfloat16)                               # single cast, reused

    # stage the projection-shortcut input (even rows) before a1 dies
    if has_shortcut and stride == 2:
        a1e_ref[...] = a1.reshape(n, ho, 2, w, cin)[:, :, 0]

    # ---- conv1 (1x1) + bn2 + relu --------------------------------------------
    h1 = jnp.dot(a1_bf, w1_ref[...], preferred_element_type=jnp.float32)
    a2 = _bn_relu(h1, g2_ref[...], b2_ref[...])                   # (m0, planes) f32

    # ---- stage conv2 input; zero ONLY the 1-px padding border ----------------
    if stride == 2:
        # split by input-row parity so each tap read is contiguous in H and only
        # the W (sublane) axis needs a stride-2 load.
        a2_sp = a2.reshape(n, ho, 2, w, planes)
        a2e_ref[:, :, pl.ds(0, 1), :] = jnp.zeros((n, ho, 1, planes), jnp.float32)
        a2e_ref[:, :, pl.ds(1, w), :] = a2_sp[:, :, 0]            # rows 0,2,..,H-2
        a2o_ref[:, pl.ds(0, 1), :, :] = jnp.zeros((n, 1, w + 1, planes), jnp.float32)
        a2o_ref[:, :, pl.ds(0, 1), :] = jnp.zeros((n, ho + 1, 1, planes), jnp.float32)
        a2o_ref[:, pl.ds(1, ho), pl.ds(1, w), :] = a2_sp[:, :, 1]  # rows 1,3,..,H-1
    else:
        a2p = a2.reshape(n, h, w, planes)
        a2p_ref[:, pl.ds(0, 1), :, :] = jnp.zeros((n, 1, w + 2, planes), jnp.float32)
        a2p_ref[:, pl.ds(h + 1, 1), :, :] = jnp.zeros((n, 1, w + 2, planes), jnp.float32)
        a2p_ref[:, :, pl.ds(0, 1), :] = jnp.zeros((n, h + 2, 1, planes), jnp.float32)
        a2p_ref[:, :, pl.ds(w + 1, 1), :] = jnp.zeros((n, h + 2, 1, planes), jnp.float32)
        a2p_ref[:, pl.ds(1, h), pl.ds(1, w), :] = a2p

    # ---- conv2: 3x3 via im2col -> ONE K = 9*planes MXU matmul ----------------
    # output(oy, ox) = sum_t w2[t] . input(stride*oy + ky - 1, stride*ox + kx - 1)
    # buffer row = input row (+1 for pads where applicable), buffer col = input col + 1.
    taps = []
    for t in range(9):
        ky, kx = divmod(t, 3)
        if stride == 2:
            if ky == 1:                      # even input rows 2*oy
                patch = a2e_ref[:, :, pl.ds(kx, wo, 2), :]
            else:                            # odd input rows 2*oy - 1 + ky
                patch = a2o_ref[:, pl.ds(ky // 2, ho), pl.ds(kx, wo, 2), :]
        else:
            patch = a2p_ref[:, pl.ds(ky, ho), pl.ds(kx, wo), :]
        taps.append(patch.reshape(m1, planes).astype(jnp.bfloat16))
    patches = jnp.concatenate(taps, axis=-1)                     # (m1, 9*planes) bf16
    h2 = jnp.dot(patches, w2_ref[...], preferred_element_type=jnp.float32)

    # ---- bn3 + relu + conv3 (1x1) + residual ---------------------------------
    a3 = _bn_relu(h2, g3_ref[...], b3_ref[...]).astype(jnp.bfloat16)   # (m1, planes)
    if has_shortcut:
        if stride == 2:
            # strided re-read from the staging scratch keeps the live range short
            sc = a1e_ref[:, :, pl.ds(0, wo, 2), :].reshape(m1, cin).astype(jnp.bfloat16)
        else:
            sc = a1_bf          # stride-1 projection: reuse the conv1 operand cast
        # fuse conv3 + projection shortcut into one matmul along K; the MXU
        # accumulator performs the residual add.
        lhs = jnp.concatenate([a3, sc], axis=-1)                       # (m1, planes+cin)
        wcat = jnp.concatenate([w3_ref[...], ws_ref[...]], axis=0)     # (planes+cin, cout)
        out = jnp.dot(lhs, wcat, preferred_element_type=jnp.float32)
    else:
        # identity shortcut: re-read x_ref here instead of holding x live
        out = jnp.dot(a3, w3_ref[...], preferred_element_type=jnp.float32) + x_ref[...]
    o_ref[...] = out.astype(o_ref.dtype)


def preact_bottleneck_forward(params, x_nhwc, *, stride):
    """NHWC fast path: (N, H, W, Cin) f32 -> (N, Ho, Wo, 4*planes) f32.

    All wrapper-side reshapes are free metadata ops; no transposes, no extra
    HBM passes.  Use this entry point to chain blocks NHWC across a model.
    """
    n, h, w, cin = x_nhwc.shape
    planes = params["w1"].shape[1]
    cout = params["w3"].shape[1]
    has_shortcut = "ws" in params
    assert stride in (1, 2)
    assert has_shortcut == (stride != 1 or cin != cout)
    assert w % 8 == 0, "W must be a multiple of 8 (f32 sublane tile)"
    if stride == 2:
        assert h % 2 == 0 and w % 2 == 0

    ho, wo = h // stride, w // stride
    m0, m1 = n * h * w, n * ho * wo

    x2d = x_nhwc.reshape(m0, cin)                       # free reshape, lanes = channels
    w2_im2col = params["w2"].reshape(9 * planes, planes)  # free reshape, row = tap*planes+ci

    inputs = [x2d, params["g1"], params["b1"], params["w1"],
              params["g2"], params["b2"], w2_im2col,
              params["g3"], params["b3"], params["w3"]]
    if has_shortcut:
        inputs.append(params["ws"])

    if stride == 2:
        scratch = [pltpu.VMEM((n, ho, w + 1, planes), jnp.float32),       # even rows
                   pltpu.VMEM((n, ho + 1, w + 1, planes), jnp.float32)]   # odd rows
        if has_shortcut:
            scratch.append(pltpu.VMEM((n, ho, w, cin), jnp.float32))      # a1 even rows
    else:
        scratch = [pltpu.VMEM((n, h + 2, w + 2, planes), jnp.float32)]

    k3 = planes + (cin if has_shortcut else 0)
    flops = (2 * m0 * cin * planes + 2 * m1 * (9 * planes) * planes + 2 * m1 * k3 * cout)
    bytes_accessed = (4 * (m0 * cin + m1 * cout)
                      + 2 * (cin * planes + 9 * planes * planes + planes * cout
                             + (cin * cout if has_shortcut else 0))
                      + 4 * 2 * (cin + 2 * planes))
    cost = pl.CostEstimate(flops=int(flops),
                           transcendentals=int(cin + 2 * planes),
                           bytes_accessed=int(bytes_accessed))

    kernel = functools.partial(
        _bottleneck_kernel, n=n, h=h, w=w, cin=cin, planes=planes, cout=cout,
        stride=stride, has_shortcut=has_shortcut)

    out2d = pl.pallas_call(
        kernel,
        out_shape=jax.ShapeDtypeStruct((m1, cout), jnp.float32),
        in_specs=[_vmem_spec()] * len(inputs),
        out_specs=_vmem_spec(),
        scratch_shapes=scratch,
        cost_estimate=cost,
    )(*inputs)
    return out2d.reshape(n, ho, wo, cout)               # free reshape


def preact_bottleneck_forward_nchw(params, x_nchw, *, stride):
    """PyTorch-layout compatibility wrapper.

    Keeps the module's NCHW interface; intended for model boundaries only --
    inside a model, chain blocks with the NHWC entry point to avoid the two
    transpose HBM passes per block.
    """
    x = jnp.transpose(x_nchw, (0, 2, 3, 1))
    out = preact_bottleneck_forward(params, x, stride=stride)
    return jnp.transpose(out, (0, 3, 1, 2))


# ---------------------------------------------------------------------------
# Pure-JAX reference (f32, XLA convs) for a semantic check of the fused kernel
# ---------------------------------------------------------------------------

def _bn_relu_ref(x, g, b):
    m = jnp.mean(x, axis=(0, 1, 2), keepdims=True)
    v = jnp.mean(jnp.square(x - m), axis=(0, 1, 2), keepdims=True)
    y = (x - m) * lax.rsqrt(v + EPS) * g.reshape(1, 1, 1, -1) + b.reshape(1, 1, 1, -1)
    return jnp.maximum(y, 0.0)


def reference_forward(params, x_nhwc, *, stride):
    cin = x_nhwc.shape[-1]
    planes = params["w1"].shape[1]
    cout = params["w3"].shape[1]
    dn = ("NHWC", "HWIO", "NHWC")
    a1 = _bn_relu_ref(x_nhwc, params["g1"], params["b1"])
    if "ws" in params:
        ws = params["ws"].astype(jnp.float32).reshape(1, 1, cin, cout)
        sc = lax.conv_general_dilated(a1, ws, (stride, stride), "VALID",
                                      dimension_numbers=dn)
    else:
        sc = x_nhwc
    w1 = params["w1"].astype(jnp.float32).reshape(1, 1, cin, planes)
    h1 = lax.conv_general_dilated(a1, w1, (1, 1), "VALID", dimension_numbers=dn)
    a2 = _bn_relu_ref(h1, params["g2"], params["b2"])
    w2 = params["w2"].astype(jnp.float32).reshape(3, 3, planes, planes)   # HWIO
    h2 = lax.conv_general_dilated(a2, w2, (stride, stride), ((1, 1), (1, 1)),
                                  dimension_numbers=dn)
    a3 = _bn_relu_ref(h2, params["g3"], params["b3"])
    w3 = params["w3"].astype(jnp.float32).reshape(1, 1, planes, cout)
    out = lax.conv_general_dilated(a3, w3, (1, 1), "VALID", dimension_numbers=dn)
    return out + sc


# ---------------------------------------------------------------------------
# Deterministic synthetic parameters (matching the PyTorch module's shapes)
# ---------------------------------------------------------------------------

def make_params(key, in_planes, planes, stride, expansion=EXPANSION):
    cout = expansion * planes
    ks = jax.random.split(key, 10)

    def conv_w(k, shape, fan_in):
        w32 = jax.random.normal(k, shape, jnp.float32) * jnp.sqrt(2.0 / fan_in)
        return w32.astype(jnp.bfloat16)                # bf16 weights for the MXU

    def bn(kg, kb, c):
        g = 1.0 + 0.1 * jax.random.normal(kg, (1, c), jnp.float32)
        b = 0.1 * jax.random.normal(kb, (1, c), jnp.float32)
        return g, b

    p = {}
    p["g1"], p["b1"] = bn(ks[0], ks[1], in_planes)
    p["w1"] = conv_w(ks[2], (in_planes, planes), in_planes)             # 1x1
    p["g2"], p["b2"] = bn(ks[3], ks[4], planes)
    p["w2"] = conv_w(ks[5], (9, planes, planes), 9 * planes)            # 3x3 taps (t, ci, co)
    p["g3"], p["b3"] = bn(ks[6], ks[7], planes)
    p["w3"] = conv_w(ks[8], (planes, cout), planes)                     # 1x1
    if stride != 1 or in_planes != cout:
        p["ws"] = conv_w(ks[9], (in_planes, cout), in_planes)           # 1x1 projection
    return p


if __name__ == "__main__":
    root = jax.random.PRNGKey(0)
    kp1, kx1, kp2, kx2 = jax.random.split(root, 4)

    # Config A: down-sampling bottleneck with projection shortcut, via the
    # PyTorch-layout (NCHW) compatibility wrapper.
    #   in_planes=64, planes=32 (-> cout=128), stride=2, input (2, 64, 16, 16).
    params_a = make_params(kp1, in_planes=64, planes=32, stride=2)
    x_a = jax.random.normal(kx1, (2, 64, 16, 16), jnp.float32)
    out_a = preact_bottleneck_forward_nchw(params_a, x_a, stride=2)
    jax.block_until_ready(out_a)
    assert out_a.shape == (2, 128, 8, 8)
    assert bool(jnp.all(jnp.isfinite(out_a)))
    ref_a = jnp.transpose(
        reference_forward(params_a, jnp.transpose(x_a, (0, 2, 3, 1)), stride=2),
        (0, 3, 1, 2))
    assert bool(jnp.allclose(out_a, ref_a, atol=1e-1, rtol=1e-1)), \
        float(jnp.max(jnp.abs(out_a - ref_a)))

    # Config B: identity-shortcut bottleneck, NHWC fast path (no transposes).
    #   in_planes=128 == 4*planes, stride=1, input (2, 16, 16, 128).
    params_b = make_params(kp2, in_planes=128, planes=32, stride=1)
    x_b = jax.random.normal(kx2, (2, 16, 16, 128), jnp.float32)
    out_b = preact_bottleneck_forward(params_b, x_b, stride=1)
    jax.block_until_ready(out_b)
    assert out_b.shape == (2, 16, 16, 128)
    assert bool(jnp.all(jnp.isfinite(out_b)))
    ref_b = reference_forward(params_b, x_b, stride=1)
    assert bool(jnp.allclose(out_b, ref_b, atol=1e-1, rtol=1e-1)), \
        float(jnp.max(jnp.abs(out_b - ref_b)))

    print("KERNEL_OK")
</pallas_src>

<mosaic_0001>
module attributes {stable_mosaic.version = 11 : i64} {
  func.func @_bottleneck_kernel(%arg0: memref<512x64xf32, #tpu.memory_space<vmem>>, %arg1: memref<1x64xf32, #tpu.memory_space<vmem>>, %arg2: memref<1x64xf32, #tpu.memory_space<vmem>>, %arg3: memref<64x32xbf16, #tpu.memory_space<vmem>>, %arg4: memref<1x32xf32, #tpu.memory_space<vmem>>, %arg5: memref<1x32xf32, #tpu.memory_space<vmem>>, %arg6: memref<288x32xbf16, #tpu.memory_space<vmem>>, %arg7: memref<1x32xf32, #tpu.memory_space<vmem>>, %arg8: memref<1x32xf32, #tpu.memory_space<vmem>>, %arg9: memref<32x128xbf16, #tpu.memory_space<vmem>>, %arg10: memref<64x128xbf16, #tpu.memory_space<vmem>>, %arg11: memref<128x128xf32, #tpu.memory_space<vmem>>, %arg12: memref<2x8x17x32xf32, #tpu.memory_space<vmem>>, %arg13: memref<2x9x17x32xf32, #tpu.memory_space<vmem>>, %arg14: memref<2x8x16x64xf32, #tpu.memory_space<vmem>>) attributes {dimension_semantics = [], scalar_prefetch = 0 : i64, scratch_operands = 3 : i64, tpu.core_type = #tpu.core_type<tc>} {
    %c0 = arith.constant 0 : index
    %c0_0 = arith.constant 0 : index
    %0 = vector.load %arg0[%c0, %c0_0] : memref<512x64xf32, #tpu.memory_space<vmem>>, vector<512x64xf32>
    %c0_1 = arith.constant 0 : index
    %c0_2 = arith.constant 0 : index
    %1 = vector.load %arg1[%c0_1, %c0_2] : memref<1x64xf32, #tpu.memory_space<vmem>>, vector<1x64xf32>
    %c0_3 = arith.constant 0 : index
    %c0_4 = arith.constant 0 : index
    %2 = vector.load %arg2[%c0_3, %c0_4] : memref<1x64xf32, #tpu.memory_space<vmem>>, vector<1x64xf32>
    %cst = arith.constant dense<0.000000e+00> : vector<64xf32>
    %3 = vector.multi_reduction <add>, %0, %cst [0] : vector<512x64xf32> to vector<64xf32>
    %4 = vector.shape_cast %3 : vector<64xf32> to vector<1x64xf32>
    %cst_5 = arith.constant 5.120000e+02 : f32
    %5 = vector.broadcast %cst_5 : f32 to vector<1x64xf32>
    %6 = arith.divf %4, %5 : vector<1x64xf32>
    %7 = vector.broadcast %6 : vector<1x64xf32> to vector<512x64xf32>
    %8 = arith.subf %0, %7 : vector<512x64xf32>
    %9 = arith.mulf %8, %8 : vector<512x64xf32>
    %cst_6 = arith.constant dense<0.000000e+00> : vector<64xf32>
    %10 = vector.multi_reduction <add>, %9, %cst_6 [0] : vector<512x64xf32> to vector<64xf32>
    %11 = vector.shape_cast %10 : vector<64xf32> to vector<1x64xf32>
    %cst_7 = arith.constant 5.120000e+02 : f32
    %12 = vector.broadcast %cst_7 : f32 to vector<1x64xf32>
    %13 = arith.divf %11, %12 : vector<1x64xf32>
    %14 = vector.broadcast %6 : vector<1x64xf32> to vector<512x64xf32>
    %15 = arith.subf %0, %14 : vector<512x64xf32>
    %cst_8 = arith.constant 9.99999974E-6 : f32
    %16 = vector.broadcast %cst_8 : f32 to vector<1x64xf32>
    %17 = arith.addf %13, %16 : vector<1x64xf32>
    %18 = math.rsqrt %17 : vector<1x64xf32>
    %19 = vector.broadcast %18 : vector<1x64xf32> to vector<512x64xf32>
    %20 = arith.mulf %15, %19 : vector<512x64xf32>
    %21 = vector.broadcast %1 : vector<1x64xf32> to vector<512x64xf32>
    %22 = arith.mulf %20, %21 : vector<512x64xf32>
    %23 = vector.broadcast %2 : vector<1x64xf32> to vector<512x64xf32>
    %24 = arith.addf %22, %23 : vector<512x64xf32>
    %cst_9 = arith.constant 0.000000e+00 : f32
    %25 = vector.broadcast %cst_9 : f32 to vector<512x64xf32>
    %26 = arith.maximumf %24, %25 : vector<512x64xf32>
    %27 = arith.truncf %26 : vector<512x64xf32> to vector<512x64xbf16>
    %28 = vector.shape_cast %26 : vector<512x64xf32> to vector<2x8x2x16x64xf32>
    %29 = vector.extract_strided_slice %28 {offsets = [0, 0, 0, 0, 0], sizes = [2, 8, 1, 16, 64], strides = [1, 1, 1, 1, 1]} : vector<2x8x2x16x64xf32> to vector<2x8x1x16x64xf32>
    %30 = vector.shape_cast %29 : vector<2x8x1x16x64xf32> to vector<2x8x16x64xf32>
    %c0_10 = arith.constant 0 : index
    %c0_11 = arith.constant 0 : index
    %c0_12 = arith.constant 0 : index
    %c0_13 = arith.constant 0 : index
    %31 = vector.load %arg14[%c0_10, %c0_11, %c0_12, %c0_13] : memref<2x8x16x64xf32, #tpu.memory_space<vmem>>, vector<2x8x16x64xf32>
    tpu.vector_store %arg14[%c0_10, %c0_11, %c0_12, %c0_13], %30 {strides = array<i32>} : memref<2x8x16x64xf32, #tpu.memory_space<vmem>>, vector<2x8x16x64xf32>,
    %c0_14 = arith.constant 0 : index
    %c0_15 = arith.constant 0 : index
    %32 = vector.load %arg3[%c0_14, %c0_15] : memref<64x32xbf16, #tpu.memory_space<vmem>>, vector<64x32xbf16>
    %cst_16 = arith.constant dense<0.000000e+00> : vector<512x32xf32>
    %33 = tpu.matmul %27, %32, %cst_16 {dimension_numbers = #tpu.dot_dimension_numbers<[1], [0], [0], [1], [0, 0, 1, 1], [], []>} : vector<512x64xbf16>, vector<64x32xbf16>, vector<512x32xf32> -> vector<512x32xf32>
    %c0_17 = arith.constant 0 : index
    %c0_18 = arith.constant 0 : index
    %34 = vector.load %arg4[%c0_17, %c0_18] : memref<1x32xf32, #tpu.memory_space<vmem>>, vector<1x32xf32>
    %c0_19 = arith.constant 0 : index
    %c0_20 = arith.constant 0 : index
    %35 = vector.load %arg5[%c0_19, %c0_20] : memref<1x32xf32, #tpu.memory_space<vmem>>, vector<1x32xf32>
    %cst_21 = arith.constant dense<0.000000e+00> : vector<32xf32>
    %36 = vector.multi_reduction <add>, %33, %cst_21 [0] : vector<512x32xf32> to vector<32xf32>
    %37 = vector.shape_cast %36 : vector<32xf32> to vector<1x32xf32>
    %cst_22 = arith.constant 5.120000e+02 : f32
    %38 = vector.broadcast %cst_22 : f32 to vector<1x32xf32>
    %39 = arith.divf %37, %38 : vector<1x32xf32>
    %40 = vector.broadcast %39 : vector<1x32xf32> to vector<512x32xf32>
    %41 = arith.subf %33, %40 : vector<512x32xf32>
    %42 = arith.mulf %41, %41 : vector<512x32xf32>
    %cst_23 = arith.constant dense<0.000000e+00> : vector<32xf32>
    %43 = vector.multi_reduction <add>, %42, %cst_23 [0] : vector<512x32xf32> to vector<32xf32>
    %44 = vector.shape_cast %43 : vector<32xf32> to vector<1x32xf32>
    %cst_24 = arith.constant 5.120000e+02 : f32
    %45 = vector.broadcast %cst_24 : f32 to vector<1x32xf32>
    %46 = arith.divf %44, %45 : vector<1x32xf32>
    %47 = vector.broadcast %39 : vector<1x32xf32> to vector<512x32xf32>
    %48 = arith.subf %33, %47 : vector<512x32xf32>
    %cst_25 = arith.constant 9.99999974E-6 : f32
    %49 = vector.broadcast %cst_25 : f32 to vector<1x32xf32>
    %50 = arith.addf %46, %49 : vector<1x32xf32>
    %51 = math.rsqrt %50 : vector<1x32xf32>
    %52 = vector.broadcast %51 : vector<1x32xf32> to vector<512x32xf32>
    %53 = arith.mulf %48, %52 : vector<512x32xf32>
    %54 = vector.broadcast %34 : vector<1x32xf32> to vector<512x32xf32>
    %55 = arith.mulf %53, %54 : vector<512x32xf32>
    %56 = vector.broadcast %35 : vector<1x32xf32> to vector<512x32xf32>
    %57 = arith.addf %55, %56 : vector<512x32xf32>
    %cst_26 = arith.constant 0.000000e+00 : f32
    %58 = vector.broadcast %cst_26 : f32 to vector<512x32xf32>
    %59 = arith.maximumf %57, %58 : vector<512x32xf32>
    %60 = vector.shape_cast %59 : vector<512x32xf32> to vector<2x8x2x16x32xf32>
    %cst_27 = arith.constant 0.000000e+00 : f32
    %61 = vector.broadcast %cst_27 : f32 to vector<2x8x1x32xf32>
    %c0_28 = arith.constant 0 : index
    %c0_29 = arith.constant 0 : index
    %c0_30 = arith.constant 0 : index
    %c0_31 = arith.constant 0 : index
    %62 = vector.load %arg12[%c0_28, %c0_29, %c0_30, %c0_31] : memref<2x8x17x32xf32, #tpu.memory_space<vmem>>, vector<2x8x1x32xf32>
    tpu.vector_store %arg12[%c0_28, %c0_29, %c0_30, %c0_31], %61 {strides = array<i32>} : memref<2x8x17x32xf32, #tpu.memory_space<vmem>>, vector<2x8x1x32xf32>,
    %63 = vector.extract_strided_slice %60 {offsets = [0, 0, 0, 0, 0], sizes = [2, 8, 1, 16, 32], strides = [1, 1, 1, 1, 1]} : vector<2x8x2x16x32xf32> to vector<2x8x1x16x32xf32>
    %64 = vector.shape_cast %63 : vector<2x8x1x16x32xf32> to vector<2x8x16x32xf32>
    %c0_32 = arith.constant 0 : index
    %c0_33 = arith.constant 0 : index
    %c1 = arith.constant 1 : index
    %c0_34 = arith.constant 0 : index
    %65 = vector.load %arg12[%c0_32, %c0_33, %c1, %c0_34] : memref<2x8x17x32xf32, #tpu.memory_space<vmem>>, vector<2x8x16x32xf32>
    tpu.vector_store %arg12[%c0_32, %c0_33, %c1, %c0_34], %64 {strides = array<i32>} : memref<2x8x17x32xf32, #tpu.memory_space<vmem>>, vector<2x8x16x32xf32>,
    %cst_35 = arith.constant 0.000000e+00 : f32
    %66 = vector.broadcast %cst_35 : f32 to vector<2x1x17x32xf32>
    %c0_36 = arith.constant 0 : index
    %c0_37 = arith.constant 0 : index
    %c0_38 = arith.constant 0 : index
    %c0_39 = arith.constant 0 : index
    %67 = vector.load %arg13[%c0_36, %c0_37, %c0_38, %c0_39] : memref<2x9x17x32xf32, #tpu.memory_space<vmem>>, vector<2x1x17x32xf32>
    tpu.vector_store %arg13[%c0_36, %c0_37, %c0_38, %c0_39], %66 {strides = array<i32>} : memref<2x9x17x32xf32, #tpu.memory_space<vmem>>, vector<2x1x17x32xf32>,
    %cst_40 = arith.constant 0.000000e+00 : f32
    %68 = vector.broadcast %cst_40 : f32 to vector<2x9x1x32xf32>
    %c0_41 = arith.constant 0 : index
    %c0_42 = arith.constant 0 : index
    %c0_43 = arith.constant 0 : index
    %c0_44 = arith.constant 0 : index
    %69 = vector.load %arg13[%c0_41, %c0_42, %c0_43, %c0_44] : memref<2x9x17x32xf32, #tpu.memory_space<vmem>>, vector<2x9x1x32xf32>
    tpu.vector_store %arg13[%c0_41, %c0_42, %c0_43, %c0_44], %68 {strides = array<i32>} : memref<2x9x17x32xf32, #tpu.memory_space<vmem>>, vector<2x9x1x32xf32>,
    %70 = vector.extract_strided_slice %60 {offsets = [0, 0, 1, 0, 0], sizes = [2, 8, 1, 16, 32], strides = [1, 1, 1, 1, 1]} : vector<2x8x2x16x32xf32> to vector<2x8x1x16x32xf32>
    %71 = vector.shape_cast %70 : vector<2x8x1x16x32xf32> to vector<2x8x16x32xf32>
    %c0_45 = arith.constant 0 : index
    %c1_46 = arith.constant 1 : index
    %c1_47 = arith.constant 1 : index
    %c0_48 = arith.constant 0 : index
    %72 = vector.load %arg13[%c0_45, %c1_46, %c1_47, %c0_48] : memref<2x9x17x32xf32, #tpu.memory_space<vmem>>, vector<2x8x16x32xf32>
    tpu.vector_store %arg13[%c0_45, %c1_46, %c1_47, %c0_48], %71 {strides = array<i32>} : memref<2x9x17x32xf32, #tpu.memory_space<vmem>>, vector<2x8x16x32xf32>,
    %c0_49 = arith.constant 0 : index
    %c0_50 = arith.constant 0 : index
    %c0_51 = arith.constant 0 : index
    %c0_52 = arith.constant 0 : index
    %73 = tpu.strided_load %arg13[%c0_49, %c0_50, %c0_51, %c0_52] {strides = array<i32: 1, 1, 2, 1>} : memref<2x9x17x32xf32, #tpu.memory_space<vmem>>, vector<2x8x8x32xf32>
    %74 = vector.shape_cast %73 : vector<2x8x8x32xf32> to vector<128x32xf32>
    %75 = arith.truncf %74 : vector<128x32xf32> to vector<128x32xbf16>
    %c0_53 = arith.constant 0 : index
    %c0_54 = arith.constant 0 : index
    %c1_55 = arith.constant 1 : index
    %c0_56 = arith.constant 0 : index
    %76 = tpu.strided_load %arg13[%c0_53, %c0_54, %c1_55, %c0_56] {strides = array<i32: 1, 1, 2, 1>} : memref<2x9x17x32xf32, #tpu.memory_space<vmem>>, vector<2x8x8x32xf32>
    %77 = vector.shape_cast %76 : vector<2x8x8x32xf32> to vector<128x32xf32>
    %78 = arith.truncf %77 : vector<128x32xf32> to vector<128x32xbf16>
    %c0_57 = arith.constant 0 : index
    %c0_58 = arith.constant 0 : index
    %c2 = arith.constant 2 : index
    %c0_59 = arith.constant 0 : index
    %79 = tpu.strided_load %arg13[%c0_57, %c0_58, %c2, %c0_59] {strides = array<i32: 1, 1, 2, 1>} : memref<2x9x17x32xf32, #tpu.memory_space<vmem>>, vector<2x8x8x32xf32>
    %80 = vector.shape_cast %79 : vector<2x8x8x32xf32> to vector<128x32xf32>
    %81 = arith.truncf %80 : vector<128x32xf32> to vector<128x32xbf16>
    %c0_60 = arith.constant 0 : index
    %c0_61 = arith.constant 0 : index
    %c0_62 = arith.constant 0 : index
    %c0_63 = arith.constant 0 : index
    %82 = tpu.strided_load %arg12[%c0_60, %c0_61, %c0_62, %c0_63] {strides = array<i32: 1, 1, 2, 1>} : memref<2x8x17x32xf32, #tpu.memory_space<vmem>>, vector<2x8x8x32xf32>
    %83 = vector.shape_cast %82 : vector<2x8x8x32xf32> to vector<128x32xf32>
    %84 = arith.truncf %83 : vector<128x32xf32> to vector<128x32xbf16>
    %c0_64 = arith.constant 0 : index
    %c0_65 = arith.constant 0 : index
    %c1_66 = arith.constant 1 : index
    %c0_67 = arith.constant 0 : index
    %85 = tpu.strided_load %arg12[%c0_64, %c0_65, %c1_66, %c0_67] {strides = array<i32: 1, 1, 2, 1>} : memref<2x8x17x32xf32, #tpu.memory_space<vmem>>, vector<2x8x8x32xf32>
    %86 = vector.shape_cast %85 : vector<2x8x8x32xf32> to vector<128x32xf32>
    %87 = arith.truncf %86 : vector<128x32xf32> to vector<128x32xbf16>
    %c0_68 = arith.constant 0 : index
    %c0_69 = arith.constant 0 : index
    %c2_70 = arith.constant 2 : index
    %c0_71 = arith.constant 0 : index
    %88 = tpu.strided_load %arg12[%c0_68, %c0_69, %c2_70, %c0_71] {strides = array<i32: 1, 1, 2, 1>} : memref<2x8x17x32xf32, #tpu.memory_space<vmem>>, vector<2x8x8x32xf32>
    %89 = vector.shape_cast %88 : vector<2x8x8x32xf32> to vector<128x32xf32>
    %90 = arith.truncf %89 : vector<128x32xf32> to vector<128x32xbf16>
    %c0_72 = arith.constant 0 : index
    %c1_73 = arith.constant 1 : index
    %c0_74 = arith.constant 0 : index
    %c0_75 = arith.constant 0 : index
    %91 = tpu.strided_load %arg13[%c0_72, %c1_73, %c0_74, %c0_75] {strides = array<i32: 1, 1, 2, 1>} : memref<2x9x17x32xf32, #tpu.memory_space<vmem>>, vector<2x8x8x32xf32>
    %92 = vector.shape_cast %91 : vector<2x8x8x32xf32> to vector<128x32xf32>
    %93 = arith.truncf %92 : vector<128x32xf32> to vector<128x32xbf16>
    %c0_76 = arith.constant 0 : index
    %c1_77 = arith.constant 1 : index
    %c1_78 = arith.constant 1 : index
    %c0_79 = arith.constant 0 : index
    %94 = tpu.strided_load %arg13[%c0_76, %c1_77, %c1_78, %c0_79] {strides = array<i32: 1, 1, 2, 1>} : memref<2x9x17x32xf32, #tpu.memory_space<vmem>>, vector<2x8x8x32xf32>
    %95 = vector.shape_cast %94 : vector<2x8x8x32xf32> to vector<128x32xf32>
    %96 = arith.truncf %95 : vector<128x32xf32> to vector<128x32xbf16>
    %c0_80 = arith.constant 0 : index
    %c1_81 = arith.constant 1 : index
    %c2_82 = arith.constant 2 : index
    %c0_83 = arith.constant 0 : index
    %97 = tpu.strided_load %arg13[%c0_80, %c1_81, %c2_82, %c0_83] {strides = array<i32: 1, 1, 2, 1>} : memref<2x9x17x32xf32, #tpu.memory_space<vmem>>, vector<2x8x8x32xf32>
    %98 = vector.shape_cast %97 : vector<2x8x8x32xf32> to vector<128x32xf32>
    %99 = arith.truncf %98 : vector<128x32xf32> to vector<128x32xbf16>
    %100 = tpu.concatenate %75, %78, %81, %84, %87, %90, %93, %96, %99 in 1 : vector<128x32xbf16>, vector<128x32xbf16>, vector<128x32xbf16>, vector<128x32xbf16>, vector<128x32xbf16>, vector<128x32xbf16>, vector<128x32xbf16>, vector<128x32xbf16>, vector<128x32xbf16> -> vector<128x288xbf16>
    %c0_84 = arith.constant 0 : index
    %c0_85 = arith.constant 0 : index
    %101 = vector.load %arg6[%c0_84, %c0_85] : memref<288x32xbf16, #tpu.memory_space<vmem>>, vector<288x32xbf16>
    %cst_86 = arith.constant dense<0.000000e+00> : vector<128x32xf32>
    %102 = tpu.matmul %100, %101, %cst_86 {dimension_numbers = #tpu.dot_dimension_numbers<[1], [0], [0], [1], [0, 0, 1, 1], [], []>} : vector<128x288xbf16>, vector<288x32xbf16>, vector<128x32xf32> -> vector<128x32xf32>
    %c0_87 = arith.constant 0 : index
    %c0_88 = arith.constant 0 : index
    %103 = vector.load %arg7[%c0_87, %c0_88] : memref<1x32xf32, #tpu.memory_space<vmem>>, vector<1x32xf32>
    %c0_89 = arith.constant 0 : index
    %c0_90 = arith.constant 0 : index
    %104 = vector.load %arg8[%c0_89, %c0_90] : memref<1x32xf32, #tpu.memory_space<vmem>>, vector<1x32xf32>
    %cst_91 = arith.constant dense<0.000000e+00> : vector<32xf32>
    %105 = vector.multi_reduction <add>, %102, %cst_91 [0] : vector<128x32xf32> to vector<32xf32>
    %106 = vector.shape_cast %105 : vector<32xf32> to vector<1x32xf32>
    %cst_92 = arith.constant 1.280000e+02 : f32
    %107 = vector.broadcast %cst_92 : f32 to vector<1x32xf32>
    %108 = arith.divf %106, %107 : vector<1x32xf32>
    %109 = vector.broadcast %108 : vector<1x32xf32> to vector<128x32xf32>
    %110 = arith.subf %102, %109 : vector<128x32xf32>
    %111 = arith.mulf %110, %110 : vector<128x32xf32>
    %cst_93 = arith.constant dense<0.000000e+00> : vector<32xf32>
    %112 = vector.multi_reduction <add>, %111, %cst_93 [0] : vector<128x32xf32> to vector<32xf32>
    %113 = vector.shape_cast %112 : vector<32xf32> to vector<1x32xf32>
    %cst_94 = arith.constant 1.280000e+02 : f32
    %114 = vector.broadcast %cst_94 : f32 to vector<1x32xf32>
    %115 = arith.divf %113, %114 : vector<1x32xf32>
    %116 = vector.broadcast %108 : vector<1x32xf32> to vector<128x32xf32>
    %117 = arith.subf %102, %116 : vector<128x32xf32>
    %cst_95 = arith.constant 9.99999974E-6 : f32
    %118 = vector.broadcast %cst_95 : f32 to vector<1x32xf32>
    %119 = arith.addf %115, %118 : vector<1x32xf32>
    %120 = math.rsqrt %119 : vector<1x32xf32>
    %121 = vector.broadcast %120 : vector<1x32xf32> to vector<128x32xf32>
    %122 = arith.mulf %117, %121 : vector<128x32xf32>
    %123 = vector.broadcast %103 : vector<1x32xf32> to vector<128x32xf32>
    %124 = arith.mulf %122, %123 : vector<128x32xf32>
    %125 = vector.broadcast %104 : vector<1x32xf32> to vector<128x32xf32>
    %126 = arith.addf %124, %125 : vector<128x32xf32>
    %cst_96 = arith.constant 0.000000e+00 : f32
    %127 = vector.broadcast %cst_96 : f32 to vector<128x32xf32>
    %128 = arith.maximumf %126, %127 : vector<128x32xf32>
    %129 = arith.truncf %128 : vector<128x32xf32> to vector<128x32xbf16>
    %c0_97 = arith.constant 0 : index
    %c0_98 = arith.constant 0 : index
    %c0_99 = arith.constant 0 : index
    %c0_100 = arith.constant 0 : index
    %130 = tpu.strided_load %arg14[%c0_97, %c0_98, %c0_99, %c0_100] {strides = array<i32: 1, 1, 2, 1>} : memref<2x8x16x64xf32, #tpu.memory_space<vmem>>, vector<2x8x8x64xf32>
    %131 = vector.shape_cast %130 : vector<2x8x8x64xf32> to vector<128x64xf32>
    %132 = arith.truncf %131 : vector<128x64xf32> to vector<128x64xbf16>
    %133 = tpu.concatenate %129, %132 in 1 : vector<128x32xbf16>, vector<128x64xbf16> -> vector<128x96xbf16>
    %c0_101 = arith.constant 0 : index
    %c0_102 = arith.constant 0 : index
    %134 = vector.load %arg9[%c0_101, %c0_102] : memref<32x128xbf16, #tpu.memory_space<vmem>>, vector<32x128xbf16>
    %c0_103 = arith.constant 0 : index
    %c0_104 = arith.constant 0 : index
    %135 = vector.load %arg10[%c0_103, %c0_104] : memref<64x128xbf16, #tpu.memory_space<vmem>>, vector<64x128xbf16>
    %136 = tpu.concatenate %134, %135 in 0 : vector<32x128xbf16>, vector<64x128xbf16> -> vector<96x128xbf16>
    %cst_105 = arith.constant dense<0.000000e+00> : vector<128x128xf32>
    %137 = tpu.matmul %133, %136, %cst_105 {dimension_numbers = #tpu.dot_dimension_numbers<[1], [0], [0], [1], [0, 0, 1, 1], [], []>} : vector<128x96xbf16>, vector<96x128xbf16>, vector<128x128xf32> -> vector<128x128xf32>
    %c0_106 = arith.constant 0 : index
    %c0_107 = arith.constant 0 : index
    %138 = vector.load %arg11[%c0_106, %c0_107] : memref<128x128xf32, #tpu.memory_space<vmem>>, vector<128x128xf32>
    tpu.vector_store %arg11[%c0_106, %c0_107], %137 {strides = array<i32>} : memref<128x128xf32, #tpu.memory_space<vmem>>, vector<128x128xf32>,
    return
  }
}

</mosaic_0001>

<bundles_post_ra>
// kernel: tpu_custom_call.1
= control target key start
LH: loop header
LB: loop body
LE: loop exit
PB: predicated region body
PF: predicated region fallthrough
CT: control target
= control target key end

     0   :  { %vm106_vm0 = vcmask 523264   ;;  %s7410_s0 = inlined_call_operand.vmem [shape: f32[512,64], index: 0, kind: input, shape index: {}]   ;;  %s7411_s1 = inlined_call_operand.vmem [shape: f32[1,64], index: 1, kind: input, shape index: {}]   ;;  %s7412_s2 = inlined_call_operand.vmem [shape: f32[1,64], index: 2, kind: input, shape index: {}]   ;;  %s7413_s3 = inlined_call_operand.vmem [shape: bf16[64,32], index: 3, kind: input, shape index: {}]   ;;  %s7414_s4 = inlined_call_operand.vmem [shape: f32[1,32], index: 4, kind: input, shape index: {}]   ;;  %s7415_s5 = inlined_call_operand.vmem [shape: f32[1,32], index: 5, kind: input, shape index: {}]   ;;  %s7416_s6 = inlined_call_operand.vmem [shape: bf16[288,32], index: 6, kind: input, shape index: {}]   ;;  %s7417_s7 = inlined_call_operand.vmem [shape: f32[1,32], index: 7, kind: input, shape index: {}]   ;;  %s7418_s8 = inlined_call_operand.vmem [shape: f32[1,32], index: 8, kind: input, shape index: {}]   ;;  %s7419_s9 = inlined_call_operand.vmem [shape: bf16[32,128], index: 9, kind: input, shape index: {}]   ;;  %s7420_s10 = inlined_call_operand.vmem [shape: bf16[64,128], index: 10, kind: input, shape index: {}]   ;;  %s7421_s11 = inlined_call_operand.hbm [shape: f32[128,128], index: 11, kind: output, shape index: {}]  }
   0x1   :  { %v3895_v0 = vld [vmem:[%s7413_s3 + $0x18] sm:$0xff]   ;;  %v3896_v1 = vld [vmem:[%s7413_s3 + $0x10] sm:$0xff]   ;;  %v3897_v2 = vld [vmem:[%s7413_s3 + $0x8] sm:$0xff]  }
   0x2   :  { %3752 = vmatprep.subr.bf16.mxu0 %v3895_v0  ;;  %v4030_v3 = vld [vmem:[%s7410_s0] sm:$0xff]  ;;  %v4035_v4 = vld [vmem:[%s7410_s0 + $0x8] sm:$0xff]  ;;  %v4040_v5 = vld [vmem:[%s7410_s0 + $0x10] sm:$0xff] }
   0x3   :  { %3753 = vmatpush3.bf16.msra.mxu0 %v3895_v0  ;;  %v4045_v6 = vld [vmem:[%s7410_s0 + $0x18] sm:$0xff]  ;;  %v107_v7 = vsel %vm106_vm0, %v4030_v3, 0.0  ;;  %v108_v8 = vsel %vm106_vm0, %v4035_v4, 0.0  ;;  %v110_v9 = vsel %vm106_vm0, %v4040_v5, 0.0  ;;  %v4056_v10 = vld [vmem:[%s7410_s0 + $0x20] sm:$0xff]  ;;  %v4066_v14 = vld [vmem:[%s7410_s0 + $0x28] sm:$0xff] }
   0x4   :  { %3754 = vmatprep.subr.bf16.mxu0 %v3896_v1  ;;  %v109_v11 = vadd.f32 %v108_v8, %v107_v7  ;;  %v112_v12 = vsel %vm106_vm0, %v4045_v6, 0.0  ;;  %v3898_v13 = vld [vmem:[%s7413_s3] sm:$0xff]   ;;  %v114_v16 = vsel %vm106_vm0, %v4056_v10, 0.0  ;;  %v4073_v17 = vld [vmem:[%s7410_s0 + $0x30] sm:$0xff]  ;;  %v116_v19 = vsel %vm106_vm0, %v4066_v14, 0.0  ;;  %v4080_v20 = vld [vmem:[%s7410_s0 + $0x38] sm:$0xff] }
   0x5   :  { %v118_v22 = vsel %vm106_vm0, %v4073_v17, 0.0  ;;  %v4087_v23 = vld [vmem:[%s7410_s0 + $0x40] sm:$0xff]  ;;  %v120_v25 = vsel %vm106_vm0, %v4080_v20, 0.0  ;;  %v4094_v26 = vld [vmem:[%s7410_s0 + $0x48] sm:$0xff]  ;;  %v4101_v29 = vld [vmem:[%s7410_s0 + $0x50] sm:$0xff] }
   0x6   :  { %v111_v15 = vadd.f32 %v110_v9, %v109_v11  ;;  %v122_v28 = vsel %vm106_vm0, %v4087_v23, 0.0  ;;  %v124_v31 = vsel %vm106_vm0, %v4094_v26, 0.0  ;;  %v4108_v32 = vld [vmem:[%s7410_s0 + $0x58] sm:$0xff]  ;;  %v4113_v34 = vld [vmem:[%s7410_s0 + $0x60] sm:$0xff]  ;;  %v4118_v35 = vld [vmem:[%s7410_s0 + $0x68] sm:$0xff]  ;;  %v126_v37 = vsel %vm106_vm0, %v4101_v29, 0.0 }
   0x7   :  { %3755 = vmatpush3.bf16.msra.mxu0 %v3896_v1  ;;  %v4123_v36 = vld [vmem:[%s7410_s0 + $0x70] sm:$0xff]  ;;  %v4130_v38 = vld [vmem:[%s7410_s0 + $0x78] sm:$0xff]  ;;  %v4135_v39 = vld [vmem:[%s7410_s0 + $0x80] sm:$0xff]  ;;  %v128_v45 = vsel %vm106_vm0, %v4108_v32, 0.0  ;;  %v130_v47 = vsel %vm106_vm0, %v4113_v34, 0.0  ;;  %v132_v48 = vsel %vm106_vm0, %v4118_v35, 0.0 }
   0x8   :  { %3756 = vmatprep.subr.bf16.mxu0 %v3897_v2  ;;  %v113_v18 = vadd.f32 %v112_v12, %v111_v15  ;;  %v4140_v40 = vld [vmem:[%s7410_s0 + $0x88] sm:$0xff]  ;;  %v4145_v42 = vld [vmem:[%s7410_s0 + $0x90] sm:$0xff]  ;;  %v4150_v43 = vld [vmem:[%s7410_s0 + $0x98] sm:$0xff]  ;;  %v134_v49 = vsel %vm106_vm0, %v4123_v36, 0.0  ;;  %v136_v50 = vsel %vm106_vm0, %v4130_v38, 0.0  ;;  %v138_v51 = vsel %vm106_vm0, %v4135_v39, 0.0 }
   0x9   :  { %v4155_v44 = vld [vmem:[%s7410_s0 + $0xa0] sm:$0xff]  ;;  %v140_v52 = vsel %vm106_vm0, %v4140_v40, 0.0  ;;  %v142_v54 = vsel %vm106_vm0, %v4145_v42, 0.0  ;;  %v144_v55 = vsel %vm106_vm0, %v4150_v43, 0.0  ;;  %v4180_v62 = vld [vmem:[%s7410_s0 + $0xa8] sm:$0xff]  ;;  %v4185_v0 = vld [vmem:[%s7410_s0 + $0xb0] sm:$0xff] }
   0xa   :  { %v115_v21 = vadd.f32 %v114_v16, %v113_v18  ;;  %v146_v56 = vsel %vm106_vm0, %v4155_v44, 0.0 }
   0xb   :  { %3757 = vmatpush3.bf16.msra.mxu0 %v3897_v2 }
   0xc   :  { %3758 = vmatprep.subr.bf16.mxu0 %v3898_v13  ;;  %v117_v24 = vadd.f32 %v116_v19, %v115_v21 }
   0xe   :  { %v119_v27 = vadd.f32 %v118_v22, %v117_v24 }
   0xf   :  { %3759 = vmatpush3.bf16.msra.mxu0 %v3898_v13 }
  0x10   :  { %v121_v30 = vadd.f32 %v120_v25, %v119_v27 }
  0x12   :  { %v123_v33 = vadd.f32 %v122_v28, %v121_v30 }
  0x14   :  { %v125_v41 = vadd.f32 %v124_v31, %v123_v33 }
  0x16   :  { %v127_v46 = vadd.f32 %v126_v37, %v125_v41 }
  0x18   :  { %v129_v53 = vadd.f32 %v128_v45, %v127_v46 }
  0x1a   :  { %v131_v57 = vadd.f32 %v130_v47, %v129_v53 }
  0x1c   :  { %v133_v58 = vadd.f32 %v132_v48, %v131_v57 }
  0x1e   :  { %v135_v59 = vadd.f32 %v134_v49, %v133_v58 }
  0x20   :  { %v137_v60 = vadd.f32 %v136_v50, %v135_v59 }
  0x22   :  { %v139_v61 = vadd.f32 %v138_v51, %v137_v60 }
  0x24   :  { %v141_v63 = vadd.f32 %v140_v52, %v139_v61 }
  0x26   :  { %v143_v1 = vadd.f32 %v142_v54, %v141_v63 }
  0x28   :  { %v145_v2 = vadd.f32 %v144_v55, %v143_v1 }
  0x29   :  { %16 = vsyncpa [#allocation6], 0  ;;  %v148_v7 = vsel %vm106_vm0, %v4180_v62, 0.0  ;;  %v4192_v8 = vld [vmem:[%s7410_s0 + $0xb8] sm:$0xff]  ;;  %v150_v11 = vsel %vm106_vm0, %v4185_v0, 0.0  ;;  %v4199_v12 = vld [vmem:[%s7410_s0 + $0xc0] sm:$0xff] }
  0x2a   :  { %v147_v9 = vadd.f32 %v146_v56, %v145_v2  ;;  %v152_v15 = vsel %vm106_vm0, %v4192_v8, 0.0  ;;  %v4206_v16 = vld [vmem:[%s7410_s0 + $0xc8] sm:$0xff]  ;;  %v154_v19 = vsel %vm106_vm0, %v4199_v12, 0.0  ;;  %v4213_v21 = vld [vmem:[%s7410_s0 + $0xd0] sm:$0xff]  ;;  %v4220_v25 = vld [vmem:[%s7410_s0 + $0xd8] sm:$0xff]  ;;  %vm1257_vm1 = vcmask 261120  }
  0x2b   :  { %v156_v24 = vsel %vm106_vm0, %v4206_v16, 0.0  ;;  %v158_v28 = vsel %vm106_vm0, %v4213_v21, 0.0  ;;  %v4227_v30 = vld [vmem:[%s7410_s0 + $0xe0] sm:$0xff]  ;;  %v160_v33 = vsel %vm106_vm0, %v4220_v25, 0.0  ;;  %v4234_v37 = vld [vmem:[%s7410_s0 + $0xe8] sm:$0xff]  ;;  %v4241_v46 = vld [vmem:[%s7410_s0 + $0xf0] sm:$0xff] }
  0x2c   :  { %v149_v13 = vadd.f32 %v148_v7, %v147_v9  ;;  %v162_v45 = vsel %vm106_vm0, %v4227_v30, 0.0  ;;  %v164_v48 = vsel %vm106_vm0, %v4234_v37, 0.0  ;;  %v4248_v49 = vld [vmem:[%s7410_s0 + $0xf8] sm:$0xff]  ;;  %v166_v51 = vsel %vm106_vm0, %v4241_v46, 0.0  ;;  %v4255_v52 = vld [vmem:[%s7410_s0 + $0x100] sm:$0xff]  ;;  %v4262_v55 = vld [vmem:[%s7410_s0 + $0x108] sm:$0xff] }
  0x2d   :  { %v168_v54 = vsel %vm106_vm0, %v4248_v49, 0.0  ;;  %v170_v57 = vsel %vm106_vm0, %v4255_v52, 0.0  ;;  %v4269_v58 = vld [vmem:[%s7410_s0 + $0x110] sm:$0xff]  ;;  %v172_v60 = vsel %vm106_vm0, %v4262_v55, 0.0  ;;  %v4276_v61 = vld [vmem:[%s7410_s0 + $0x118] sm:$0xff]  ;;  %v4283_v2 = vld [vmem:[%s7410_s0 + $0x120] sm:$0xff] }
  0x2e   :  { %v151_v18 = vadd.f32 %v150_v11, %v149_v13  ;;  %v174_v1 = vsel %vm106_vm0, %v4269_v58, 0.0  ;;  %v176_v9 = vsel %vm106_vm0, %v4276_v61, 0.0  ;;  %v4290_v11 = vld [vmem:[%s7410_s0 + $0x128] sm:$0xff]  ;;  %vm1924_vm2 = vcmask 253952   ;;  %s3952_s30 = smov 64   ;;  %s3953_s20 = smov 32  }
  0x2f   :  { %s3954_s25 = smov 96   ;;  %vm2571_vm3 = vcmask 785408  }
  0x30   :  { %v153_v22 = vadd.f32 %v152_v15, %v151_v18  ;;  %v178_v15 = vsel %vm106_vm0, %v4283_v2, 0.0  ;;  %v4297_v18 = vld [vmem:[%s7410_s0 + $0x130] sm:$0xff] }
  0x32   :  { %v155_v27 = vadd.f32 %v154_v19, %v153_v22  ;;  %v180_v22 = vsel %vm106_vm0, %v4290_v11, 0.0 }
  0x34   :  { %v157_v31 = vadd.f32 %v156_v24, %v155_v27  ;;  %v4304_v24 = vld [vmem:[%s7410_s0 + $0x138] sm:$0xff] }
  0x36   :  { %v159_v41 = vadd.f32 %v158_v28, %v157_v31  ;;  %v182_v28 = vsel %vm106_vm0, %v4297_v18, 0.0  ;;  %v4311_v31 = vld [vmem:[%s7410_s0 + $0x140] sm:$0xff] }
  0x38   :  { %v161_v47 = vadd.f32 %v160_v33, %v159_v41  ;;  %v184_v41 = vsel %vm106_vm0, %v4304_v24, 0.0 }
  0x3a   :  { %v163_v50 = vadd.f32 %v162_v45, %v161_v47  ;;  %v4318_v45 = vld [vmem:[%s7410_s0 + $0x148] sm:$0xff] }
  0x3c   :  { %v165_v53 = vadd.f32 %v164_v48, %v163_v50  ;;  %v186_v48 = vsel %vm106_vm0, %v4311_v31, 0.0  ;;  %v4325_v50 = vld [vmem:[%s7410_s0 + $0x150] sm:$0xff] }
  0x3e   :  { %v167_v56 = vadd.f32 %v166_v51, %v165_v53  ;;  %v188_v53 = vsel %vm106_vm0, %v4318_v45, 0.0 }
  0x40   :  { %v169_v59 = vadd.f32 %v168_v54, %v167_v56  ;;  %v4332_v54 = vld [vmem:[%s7410_s0 + $0x158] sm:$0xff] }
  0x42   :  { %v171_v63 = vadd.f32 %v170_v57, %v169_v59  ;;  %v190_v57 = vsel %vm106_vm0, %v4325_v50, 0.0  ;;  %v4339_v59 = vld [vmem:[%s7410_s0 + $0x160] sm:$0xff] }
  0x44   :  { %v173_v7 = vadd.f32 %v172_v60, %v171_v63  ;;  %v192_v63 = vsel %vm106_vm0, %v4332_v54, 0.0 }
  0x46   :  { %v175_v13 = vadd.f32 %v174_v1, %v173_v7  ;;  %v4346_v1 = vld [vmem:[%s7410_s0 + $0x168] sm:$0xff] }
  0x48   :  { %v177_v19 = vadd.f32 %v176_v9, %v175_v13  ;;  %v194_v9 = vsel %vm106_vm0, %v4339_v59, 0.0  ;;  %v4353_v13 = vld [vmem:[%s7410_s0 + $0x170] sm:$0xff] }
  0x4a   :  { %v179_v27 = vadd.f32 %v178_v15, %v177_v19  ;;  %v196_v19 = vsel %vm106_vm0, %v4346_v1, 0.0 }
  0x4c   :  { %v181_v33 = vadd.f32 %v180_v22, %v179_v27  ;;  %v4360_v22 = vld [vmem:[%s7410_s0 + $0x178] sm:$0xff] }
  0x4e   :  { %v183_v47 = vadd.f32 %v182_v28, %v181_v33  ;;  %v198_v28 = vsel %vm106_vm0, %v4353_v13, 0.0  ;;  %v4367_v33 = vld [vmem:[%s7410_s0 + $0x180] sm:$0xff] }
  0x50   :  { %v185_v51 = vadd.f32 %v184_v41, %v183_v47  ;;  %v200_v47 = vsel %vm106_vm0, %v4360_v22, 0.0 }
  0x52   :  { %v187_v56 = vadd.f32 %v186_v48, %v185_v51  ;;  %v4374_v48 = vld [vmem:[%s7410_s0 + $0x188] sm:$0xff] }
  0x53   :  { %7492 = vst [vmem:[#allocation8_spill] sm:$0xff] %v4374_v48 }
  0x54   :  { %v189_v60 = vadd.f32 %v188_v53, %v187_v56  ;;  %v202_v53 = vsel %vm106_vm0, %v4367_v33, 0.0  ;;  %v4381_v56 = vld [vmem:[%s7410_s0 + $0x190] sm:$0xff] }
  0x55   :  { %7493 = vst [vmem:[#allocation9_spill] sm:$0xff] %v4381_v56 }
  0x56   :  { %v191_v7 = vadd.f32 %v190_v57, %v189_v60  ;;  %v204_v60 = vsel %vm106_vm0, %v4374_v48, 0.0 }
  0x58   :  { %v193_v15 = vadd.f32 %v192_v63, %v191_v7  ;;  %v4388_v63 = vld [vmem:[%s7410_s0 + $0x198] sm:$0xff] }
  0x59   :  { %7494 = vst [vmem:[#allocation10_spill] sm:$0xff] %v4388_v63 }
  0x5a   :  { %v195_v27 = vadd.f32 %v194_v9, %v193_v15  ;;  %v206_v9 = vsel %vm106_vm0, %v4381_v56, 0.0  ;;  %v4395_v15 = vld [vmem:[%s7410_s0 + $0x1a0] sm:$0xff] }
  0x5b   :  { %7495 = vst [vmem:[#allocation11_spill] sm:$0xff] %v4395_v15 }
  0x5c   :  { %v197_v41 = vadd.f32 %v196_v19, %v195_v27  ;;  %v208_v27 = vsel %vm106_vm0, %v4388_v63, 0.0 }
  0x5e   :  { %v199_v51 = vadd.f32 %v198_v28, %v197_v41  ;;  %v4402_v28 = vld [vmem:[%s7410_s0 + $0x1a8] sm:$0xff] }
  0x5f   :  { %7496 = vst [vmem:[#allocation12_spill] sm:$0xff] %v4402_v28 }
  0x60   :  { %v201_v57 = vadd.f32 %v200_v47, %v199_v51  ;;  %v210_v47 = vsel %vm106_vm0, %v4395_v15, 0.0  ;;  %v4409_v51 = vld [vmem:[%s7410_s0 + $0x1b0] sm:$0xff] }
  0x61   :  { %7497 = vst [vmem:[#allocation13_spill] sm:$0xff] %v4409_v51 }
  0x62   :  { %v203_v7 = vadd.f32 %v202_v53, %v201_v57  ;;  %v212_v57 = vsel %vm106_vm0, %v4402_v28, 0.0 }
  0x64   :  { %v205_v19 = vadd.f32 %v204_v60, %v203_v7  ;;  %v4416_v60 = vld [vmem:[%s7410_s0 + $0x1b8] sm:$0xff] }
  0x65   :  { %7498 = vst [vmem:[#allocation14_spill] sm:$0xff] %v4416_v60 }
  0x66   :  { %v207_v41 = vadd.f32 %v206_v9, %v205_v19  ;;  %v214_v9 = vsel %vm106_vm0, %v4409_v51, 0.0  ;;  %v4423_v19 = vld [vmem:[%s7410_s0 + $0x1c0] sm:$0xff] }
  0x67   :  { %7499 = vst [vmem:[#allocation15_spill] sm:$0xff] %v4423_v19 }
  0x68   :  { %v209_v53 = vadd.f32 %v208_v27, %v207_v41  ;;  %v216_v27 = vsel %vm106_vm0, %v4416_v60, 0.0  ;;  %v4430_v41 = vld [vmem:[%s7410_s0 + $0x1c8] sm:$0xff] }
  0x69   :  { %7500 = vst [vmem:[#allocation16_spill] sm:$0xff] %v4430_v41 }
  0x6a   :  { %v211_v7 = vadd.f32 %v210_v47, %v209_v53  ;;  %v218_v47 = vsel %vm106_vm0, %v4423_v19, 0.0  ;;  %v4437_v53 = vld [vmem:[%s7410_s0 + $0x1d0] sm:$0xff] }
  0x6b   :  { %7501 = vst [vmem:[#allocation17_spill] sm:$0xff] %v4437_v53 }
  0x6c   :  { %v213_v15 = vadd.f32 %v212_v57, %v211_v7  ;;  %v220_v57 = vsel %vm106_vm0, %v4430_v41, 0.0  ;;  %v4444_v7 = vld [vmem:[%s7410_s0 + $0x1d8] sm:$0xff] }
  0x6d   :  { %7502 = vst [vmem:[#allocation18_spill] sm:$0xff] %v4444_v7  ;;  %v224_v19 = vsel %vm106_vm0, %v4444_v7, 0.0 }
  0x6e   :  { %v215_v28 = vadd.f32 %v214_v9, %v213_v15  ;;  %v222_v15 = vsel %vm106_vm0, %v4437_v53, 0.0 }
  0x70   :  { %v217_v51 = vadd.f32 %v216_v27, %v215_v28  ;;  %v4453_v28 = vld [vmem:[%s7410_s0 + $0x1e0] sm:$0xff] }
  0x71   :  { %7503 = vst [vmem:[#allocation19_spill] sm:$0xff] %v4453_v28  ;;  %v226_v63 = vsel %vm106_vm0, %v4453_v28, 0.0 }
  0x72   :  { %v219_v60 = vadd.f32 %v218_v47, %v217_v51  ;;  %v4460_v51 = vld [vmem:[%s7410_s0 + $0x1e8] sm:$0xff] }
  0x73   :  { %7504 = vst [vmem:[#allocation20_spill] sm:$0xff] %v4460_v51 }
  0x74   :  { %v221_v9 = vadd.f32 %v220_v57, %v219_v60  ;;  %v228_v60 = vsel %vm106_vm0, %v4460_v51, 0.0  ;;  %v4467_v57 = vld [vmem:[%s7410_s0 + $0x1f0] sm:$0xff] }
  0x75   :  { %7505 = vst [vmem:[#allocation21_spill] sm:$0xff] %v4467_v57 }
  0x76   :  { %v223_v27 = vadd.f32 %v222_v15, %v221_v9  ;;  %v4474_v15 = vld [vmem:[%s7410_s0 + $0x1f8] sm:$0xff] }
  0x78   :  { %v225_v41 = vadd.f32 %v224_v19, %v223_v27  ;;  %v230_v19 = vsel %vm106_vm0, %v4467_v57, 0.0 }
  0x7a   :  { %v227_v47 = vadd.f32 %v226_v63, %v225_v41  ;;  %v232_v63 = vsel %vm106_vm0, %v4474_v15, 0.0 }
  0x7c   :  { %v229_v7 = vadd.f32 %v228_v60, %v227_v47 }
  0x7e   :  { %v231_v9 = vadd.f32 %v230_v19, %v229_v7 }
  0x80   :  { %v233_v41 = vadd.f32 %v232_v63, %v231_v9 }
  0x82   :  { %v234_v27 = vrot.slane %v233_v41, 4 }
  0x84   :  { %v235_v51 = vadd.f32 %v234_v27, %v233_v41 }
  0x86   :  { %v236_v28 = vrot.slane %v235_v51, 2 }
  0x88   :  { %v237_v53 = vadd.f32 %v236_v28, %v235_v51 }
  0x8a   :  { %v238_v56 = vrot.slane %v237_v53, 1 }
  0x8c   :  { %v239_v48 = vadd.f32 %v238_v56, %v237_v53 }
  0x8e   :  { %v4478_v47 = vmul.f32 0.001953125, %v239_v48 }
  0x90   :  { %v4482_v60 = vsub.f32 %v4030_v3, %v4478_v47  ;;  %v4486_v57 = vsub.f32 %v4035_v4, %v4478_v47  ;;  %v4490_v7 = vsub.f32 %v4040_v5, %v4478_v47  ;;  %v4494_v19 = vsub.f32 %v4045_v6, %v4478_v47 }
  0x91   :  { %v4498_v48 = vsub.f32 %v4056_v10, %v4478_v47  ;;  %v4508_v5 = vsub.f32 %v4066_v14, %v4478_v47  ;;  %v4514_v10 = vsub.f32 %v4073_v17, %v4478_v47  ;;  %v4523_v14 = vsub.f32 %v4080_v20, %v4478_v47 }
  0x92   :  { %v306_v3 = vmul.f32 %v4482_v60, %v4482_v60  ;;  %v307_v56 = vmul.f32 %v4486_v57, %v4486_v57  ;;  %v308_v4 = vmul.f32 %v4490_v7, %v4490_v7  ;;  %v309_v6 = vmul.f32 %v4494_v19, %v4494_v19 }
  0x93   :  { %7506 = vst [vmem:[#allocation22_spill] sm:$0xff] %v4498_v48  ;;  %v310_v53 = vmul.f32 %v4498_v48, %v4498_v48  ;;  %v311_v41 = vmul.f32 %v4508_v5, %v4508_v5  ;;  %v4530_v48 = vsub.f32 %v4087_v23, %v4478_v47  ;;  %v4537_v20 = vsub.f32 %v4094_v26, %v4478_v47 }
  0x94   :  { %v370_v28 = vsel %vm106_vm0, %v306_v3, 0.0  ;;  %v371_v51 = vsel %vm106_vm0, %v307_v56, 0.0  ;;  %v373_v9 = vsel %vm106_vm0, %v308_v4, 0.0  ;;  %v375_v17 = vsel %vm106_vm0, %v309_v6, 0.0 }
  0x95   :  { %v372_v63 = vadd.f32 %v371_v51, %v370_v28  ;;  %v312_v3 = vmul.f32 %v4514_v10, %v4514_v10  ;;  %v377_v56 = vsel %vm106_vm0, %v310_v53, 0.0  ;;  %v313_v28 = vmul.f32 %v4523_v14, %v4523_v14 }
  0x96   :  { %v379_v6 = vsel %vm106_vm0, %v311_v41, 0.0  ;;  %v4544_v23 = vsub.f32 %v4101_v29, %v4478_v47  ;;  %v4551_v26 = vsub.f32 %v4108_v32, %v4478_v47  ;;  %v4558_v29 = vsub.f32 %v4113_v34, %v4478_v47 }
  0x97   :  { %v374_v27 = vadd.f32 %v373_v9, %v372_v63  ;;  %v314_v9 = vmul.f32 %v4530_v48, %v4530_v48  ;;  %v381_v53 = vsel %vm106_vm0, %v312_v3, 0.0  ;;  %v383_v41 = vsel %vm106_vm0, %v313_v28, 0.0 }
  0x98   :  { %v4565_v32 = vsub.f32 %v4118_v35, %v4478_v47  ;;  %v4572_v34 = vsub.f32 %v4123_v36, %v4478_v47  ;;  %v4579_v35 = vsub.f32 %v4130_v38, %v4478_v47  ;;  %v4586_v36 = vsub.f32 %v4135_v39, %v4478_v47 }
  0x99   :  { %v376_v4 = vadd.f32 %v375_v17, %v374_v27  ;;  %v315_v17 = vmul.f32 %v4537_v20, %v4537_v20  ;;  %v385_v3 = vsel %vm106_vm0, %v314_v9, 0.0  ;;  %v4593_v38 = vsub.f32 %v4140_v40, %v4478_v47 }
  0x9a   :  { %v4600_v39 = vsub.f32 %v4145_v42, %v4478_v47  ;;  %v4607_v40 = vsub.f32 %v4150_v43, %v4478_v47  ;;  %v4614_v42 = vsub.f32 %v4155_v44, %v4478_v47  ;;  %v4621_v43 = vsub.f32 %v4180_v62, %v4478_v47 }
  0x9b   :  { %v378_v51 = vadd.f32 %v377_v56, %v376_v4  ;;  %v316_v56 = vmul.f32 %v4544_v23, %v4544_v23  ;;  %v387_v28 = vsel %vm106_vm0, %v315_v17, 0.0  ;;  %v4628_v44 = vsub.f32 %v4185_v0, %v4478_v47 }
  0x9c   :  { %v4635_v62 = vsub.f32 %v4192_v8, %v4478_v47  ;;  %v4642_v0 = vsub.f32 %v4199_v12, %v4478_v47  ;;  %v4649_v8 = vsub.f32 %v4206_v16, %v4478_v47  ;;  %v4656_v12 = vsub.f32 %v4213_v21, %v4478_v47 }
  0x9d   :  { %v380_v63 = vadd.f32 %v379_v6, %v378_v51  ;;  %v317_v6 = vmul.f32 %v4551_v26, %v4551_v26  ;;  %v389_v9 = vsel %vm106_vm0, %v316_v56, 0.0  ;;  %v4663_v16 = vsub.f32 %v4220_v25, %v4478_v47 }
  0x9e   :  { %v4670_v21 = vsub.f32 %v4227_v30, %v4478_v47  ;;  %v4677_v25 = vsub.f32 %v4234_v37, %v4478_v47  ;;  %v4684_v30 = vsub.f32 %v4241_v46, %v4478_v47  ;;  %v4691_v37 = vsub.f32 %v4248_v49, %v4478_v47 }
  0x9f   :  { %v382_v27 = vadd.f32 %v381_v53, %v380_v63  ;;  %v318_v53 = vmul.f32 %v4558_v29, %v4558_v29  ;;  %v391_v17 = vsel %vm106_vm0, %v317_v6, 0.0  ;;  %v4698_v46 = vsub.f32 %v4255_v52, %v4478_v47 }
  0xa0   :  { %v4705_v49 = vsub.f32 %v4262_v55, %v4478_v47  ;;  %v4712_v52 = vsub.f32 %v4269_v58, %v4478_v47  ;;  %v4719_v55 = vsub.f32 %v4276_v61, %v4478_v47  ;;  %v4726_v58 = vsub.f32 %v4283_v2, %v4478_v47 }
  0xa1   :  { %v384_v4 = vadd.f32 %v383_v41, %v382_v27  ;;  %v319_v41 = vmul.f32 %v4565_v32, %v4565_v32  ;;  %v393_v56 = vsel %vm106_vm0, %v318_v53, 0.0  ;;  %v4733_v61 = vsub.f32 %v4290_v11, %v4478_v47 }
  0xa2   :  { %v4740_v2 = vsub.f32 %v4297_v18, %v4478_v47  ;;  %v4747_v11 = vsub.f32 %v4304_v24, %v4478_v47  ;;  %v4754_v18 = vsub.f32 %v4311_v31, %v4478_v47  ;;  %v4761_v24 = vsub.f32 %v4318_v45, %v4478_v47 }
  0xa3   :  { %v386_v51 = vadd.f32 %v385_v3, %v384_v4  ;;  %v320_v3 = vmul.f32 %v4572_v34, %v4572_v34  ;;  %v395_v6 = vsel %vm106_vm0, %v319_v41, 0.0  ;;  %v4768_v31 = vsub.f32 %v4325_v50, %v4478_v47 }
  0xa4   :  { %7507 = vst [vmem:[#allocation23_spill] sm:$0xff] %v4740_v2  ;;  %7508 = vst [vmem:[#allocation24_spill] sm:$0xff] %v4747_v11  ;;  %v4775_v45 = vsub.f32 %v4332_v54, %v4478_v47  ;;  %v4782_v50 = vsub.f32 %v4339_v59, %v4478_v47  ;;  %v4789_v54 = vsub.f32 %v4346_v1, %v4478_v47 }
  0xa5   :  { %v388_v63 = vadd.f32 %v387_v28, %v386_v51  ;;  %v321_v28 = vmul.f32 %v4579_v35, %v4579_v35  ;;  %v397_v53 = vsel %vm106_vm0, %v320_v3, 0.0  ;;  %7509 = vst [vmem:[#allocation25_spill] sm:$0xff] %v4768_v31  ;;  %v4796_v59 = vsub.f32 %v4353_v13, %v4478_v47 }
  0xa6   :  { %7510 = vst [vmem:[#allocation26_spill] sm:$0xff] %v4775_v45  ;;  %v4803_v1 = vsub.f32 %v4360_v22, %v4478_v47  ;;  %v4810_v13 = vsub.f32 %v4367_v33, %v4478_v47 }
  0xa7   :  { %v390_v27 = vadd.f32 %v389_v9, %v388_v63  ;;  %v322_v9 = vmul.f32 %v4586_v36, %v4586_v36  ;;  %v399_v41 = vsel %vm106_vm0, %v321_v28, 0.0  ;;  %7511 = vst [vmem:[#allocation27_spill] sm:$0xff] %v4796_v59 }
  0xa8   :  { %7512 = vst [vmem:[#allocation28_spill] sm:$0xff] %v4803_v1 }
  0xa9   :  { %v392_v4 = vadd.f32 %v391_v17, %v390_v27  ;;  %v323_v17 = vmul.f32 %v4593_v38, %v4593_v38  ;;  %v401_v3 = vsel %vm106_vm0, %v322_v9, 0.0 }
  0xab   :  { %v394_v51 = vadd.f32 %v393_v56, %v392_v4  ;;  %v324_v56 = vmul.f32 %v4600_v39, %v4600_v39  ;;  %v403_v28 = vsel %vm106_vm0, %v323_v17, 0.0 }
  0xad   :  { %v396_v63 = vadd.f32 %v395_v6, %v394_v51  ;;  %v325_v6 = vmul.f32 %v4607_v40, %v4607_v40  ;;  %v405_v9 = vsel %vm106_vm0, %v324_v56, 0.0 }
  0xaf   :  { %v398_v27 = vadd.f32 %v397_v53, %v396_v63  ;;  %v326_v53 = vmul.f32 %v4614_v42, %v4614_v42  ;;  %v407_v17 = vsel %vm106_vm0, %v325_v6, 0.0 }
  0xb1   :  { %v400_v4 = vadd.f32 %v399_v41, %v398_v27  ;;  %v327_v41 = vmul.f32 %v4621_v43, %v4621_v43  ;;  %v409_v56 = vsel %vm106_vm0, %v326_v53, 0.0 }
  0xb3   :  { %v402_v51 = vadd.f32 %v401_v3, %v400_v4  ;;  %v328_v3 = vmul.f32 %v4628_v44, %v4628_v44  ;;  %v411_v6 = vsel %vm106_vm0, %v327_v41, 0.0 }
  0xb5   :  { %v404_v63 = vadd.f32 %v403_v28, %v402_v51  ;;  %v329_v28 = vmul.f32 %v4635_v62, %v4635_v62  ;;  %v413_v53 = vsel %vm106_vm0, %v328_v3, 0.0 }
  0xb7   :  { %v406_v27 = vadd.f32 %v405_v9, %v404_v63  ;;  %v330_v9 = vmul.f32 %v4642_v0, %v4642_v0  ;;  %v415_v41 = vsel %vm106_vm0, %v329_v28, 0.0 }
  0xb9   :  { %v408_v4 = vadd.f32 %v407_v17, %v406_v27  ;;  %v331_v17 = vmul.f32 %v4649_v8, %v4649_v8  ;;  %v417_v3 = vsel %vm106_vm0, %v330_v9, 0.0 }
  0xbb   :  { %v410_v51 = vadd.f32 %v409_v56, %v408_v4  ;;  %v332_v56 = vmul.f32 %v4656_v12, %v4656_v12  ;;  %v419_v28 = vsel %vm106_vm0, %v331_v17, 0.0 }
  0xbd   :  { %v412_v63 = vadd.f32 %v411_v6, %v410_v51  ;;  %v333_v6 = vmul.f32 %v4663_v16, %v4663_v16  ;;  %v421_v9 = vsel %vm106_vm0, %v332_v56, 0.0 }
  0xbf   :  { %v414_v27 = vadd.f32 %v413_v53, %v412_v63  ;;  %v334_v53 = vmul.f32 %v4670_v21, %v4670_v21  ;;  %v423_v17 = vsel %vm106_vm0, %v333_v6, 0.0 }
  0xc1   :  { %v416_v4 = vadd.f32 %v415_v41, %v414_v27  ;;  %v335_v41 = vmul.f32 %v4677_v25, %v4677_v25  ;;  %v425_v56 = vsel %vm106_vm0, %v334_v53, 0.0 }
  0xc3   :  { %v418_v51 = vadd.f32 %v417_v3, %v416_v4  ;;  %v336_v3 = vmul.f32 %v4684_v30, %v4684_v30  ;;  %v427_v6 = vsel %vm106_vm0, %v335_v41, 0.0 }
  0xc5   :  { %v420_v63 = vadd.f32 %v419_v28, %v418_v51  ;;  %v337_v28 = vmul.f32 %v4691_v37, %v4691_v37  ;;  %v429_v53 = vsel %vm106_vm0, %v336_v3, 0.0 }
  0xc7   :  { %v422_v27 = vadd.f32 %v421_v9, %v420_v63  ;;  %v338_v9 = vmul.f32 %v4698_v46, %v4698_v46  ;;  %v431_v41 = vsel %vm106_vm0, %v337_v28, 0.0 }
  0xc9   :  { %v424_v4 = vadd.f32 %v423_v17, %v422_v27  ;;  %v339_v17 = vmul.f32 %v4705_v49, %v4705_v49  ;;  %v433_v3 = vsel %vm106_vm0, %v338_v9, 0.0 }
  0xcb   :  { %v426_v51 = vadd.f32 %v425_v56, %v424_v4  ;;  %v340_v56 = vmul.f32 %v4712_v52, %v4712_v52  ;;  %v435_v28 = vsel %vm106_vm0, %v339_v17, 0.0 }
  0xcd   :  { %v428_v63 = vadd.f32 %v427_v6, %v426_v51  ;;  %v341_v6 = vmul.f32 %v4719_v55, %v4719_v55  ;;  %v437_v9 = vsel %vm106_vm0, %v340_v56, 0.0 }
  0xcf   :  { %v430_v27 = vadd.f32 %v429_v53, %v428_v63  ;;  %v342_v53 = vmul.f32 %v4726_v58, %v4726_v58  ;;  %v439_v17 = vsel %vm106_vm0, %v341_v6, 0.0 }
  0xd1   :  { %v432_v4 = vadd.f32 %v431_v41, %v430_v27  ;;  %v343_v41 = vmul.f32 %v4733_v61, %v4733_v61  ;;  %v441_v56 = vsel %vm106_vm0, %v342_v53, 0.0 }
  0xd3   :  { %v434_v51 = vadd.f32 %v433_v3, %v432_v4  ;;  %v344_v3 = vmul.f32 %v4740_v2, %v4740_v2  ;;  %v443_v6 = vsel %vm106_vm0, %v343_v41, 0.0 }
  0xd5   :  { %v436_v63 = vadd.f32 %v435_v28, %v434_v51  ;;  %v345_v28 = vmul.f32 %v4747_v11, %v4747_v11  ;;  %v445_v53 = vsel %vm106_vm0, %v344_v3, 0.0 }
  0xd7   :  { %v438_v27 = vadd.f32 %v437_v9, %v436_v63  ;;  %v346_v9 = vmul.f32 %v4754_v18, %v4754_v18  ;;  %v447_v41 = vsel %vm106_vm0, %v345_v28, 0.0 }
  0xd9   :  { %v440_v4 = vadd.f32 %v439_v17, %v438_v27  ;;  %v347_v17 = vmul.f32 %v4761_v24, %v4761_v24  ;;  %v449_v3 = vsel %vm106_vm0, %v346_v9, 0.0 }
  0xdb   :  { %v442_v51 = vadd.f32 %v441_v56, %v440_v4  ;;  %v348_v56 = vmul.f32 %v4768_v31, %v4768_v31  ;;  %v451_v28 = vsel %vm106_vm0, %v347_v17, 0.0 }
  0xdd   :  { %v444_v63 = vadd.f32 %v443_v6, %v442_v51  ;;  %v349_v6 = vmul.f32 %v4775_v45, %v4775_v45  ;;  %v453_v9 = vsel %vm106_vm0, %v348_v56, 0.0 }
  0xdf   :  { %v446_v27 = vadd.f32 %v445_v53, %v444_v63  ;;  %v350_v53 = vmul.f32 %v4782_v50, %v4782_v50  ;;  %v455_v17 = vsel %vm106_vm0, %v349_v6, 0.0 }
  0xe1   :  { %v448_v4 = vadd.f32 %v447_v41, %v446_v27  ;;  %v351_v41 = vmul.f32 %v4789_v54, %v4789_v54  ;;  %v457_v56 = vsel %vm106_vm0, %v350_v53, 0.0 }
  0xe3   :  { %v450_v51 = vadd.f32 %v449_v3, %v448_v4  ;;  %v352_v3 = vmul.f32 %v4796_v59, %v4796_v59  ;;  %v459_v6 = vsel %vm106_vm0, %v351_v41, 0.0  ;;  %v354_v59 = vmul.f32 %v4810_v13, %v4810_v13 }
  0xe5   :  { %v452_v63 = vadd.f32 %v451_v28, %v450_v51  ;;  %v7513_v28 = vld [vmem:[#allocation8_spill] sm:$0xff]  ;;  %v353_v51 = vmul.f32 %v4803_v1, %v4803_v1  ;;  %v461_v53 = vsel %vm106_vm0, %v352_v3, 0.0  ;;  %v465_v3 = vsel %vm106_vm0, %v354_v59, 0.0 }
  0xe6   :  { %v4817_v22 = vsub.f32 %v7513_v28, %v4478_v47 }
  0xe7   :  { %v454_v27 = vadd.f32 %v453_v9, %v452_v63  ;;  %v7514_v63 = vld [vmem:[#allocation9_spill] sm:$0xff]  ;;  %v463_v41 = vsel %vm106_vm0, %v353_v51, 0.0 }
  0xe8   :  { %v4824_v33 = vsub.f32 %v7514_v63, %v4478_v47  ;;  %v355_v1 = vmul.f32 %v4817_v22, %v4817_v22 }
  0xe9   :  { %v456_v4 = vadd.f32 %v455_v17, %v454_v27  ;;  %v7516_v27 = vld [vmem:[#allocation10_spill] sm:$0xff] }
  0xea   :  { %7515 = vst [vmem:[#allocation8_spill] sm:$0xff] %v4824_v33  ;;  %v4831_v28 = vsub.f32 %v7516_v27, %v4478_v47  ;;  %v356_v45 = vmul.f32 %v4824_v33, %v4824_v33  ;;  %v467_v51 = vsel %vm106_vm0, %v355_v1, 0.0 }
  0xeb   :  { %v458_v9 = vadd.f32 %v457_v56, %v456_v4  ;;  %v7518_v4 = vld [vmem:[#allocation11_spill] sm:$0xff] }
  0xec   :  { %7517 = vst [vmem:[#allocation9_spill] sm:$0xff] %v4831_v28  ;;  %v4838_v63 = vsub.f32 %v7518_v4, %v4478_v47  ;;  %v357_v31 = vmul.f32 %v4831_v28, %v4831_v28  ;;  %v469_v59 = vsel %vm106_vm0, %v356_v45, 0.0 }
  0xed   :  { %v460_v17 = vadd.f32 %v459_v6, %v458_v9  ;;  %v7520_v9 = vld [vmem:[#allocation12_spill] sm:$0xff] }
  0xee   :  { %7519 = vst [vmem:[#allocation10_spill] sm:$0xff] %v4838_v63  ;;  %v4845_v27 = vsub.f32 %v7520_v9, %v4478_v47  ;;  %v358_v33 = vmul.f32 %v4838_v63, %v4838_v63  ;;  %v471_v1 = vsel %vm106_vm0, %v357_v31, 0.0 }
  0xef   :  { %v462_v56 = vadd.f32 %v461_v53, %v460_v17  ;;  %v7522_v17 = vld [vmem:[#allocation13_spill] sm:$0xff] }
  0xf0   :  { %7521 = vst [vmem:[#allocation11_spill] sm:$0xff] %v4845_v27  ;;  %v4852_v4 = vsub.f32 %v7522_v17, %v4478_v47  ;;  %v359_v28 = vmul.f32 %v4845_v27, %v4845_v27  ;;  %v473_v45 = vsel %vm106_vm0, %v358_v33, 0.0 }
  0xf1   :  { %v464_v6 = vadd.f32 %v463_v41, %v462_v56  ;;  %v7524_v56 = vld [vmem:[#allocation14_spill] sm:$0xff] }
  0xf2   :  { %7523 = vst [vmem:[#allocation12_spill] sm:$0xff] %v4852_v4  ;;  %v4859_v9 = vsub.f32 %v7524_v56, %v4478_v47  ;;  %v360_v11 = vmul.f32 %v4852_v4, %v4852_v4  ;;  %v475_v31 = vsel %vm106_vm0, %v359_v28, 0.0 }
  0xf3   :  { %v466_v53 = vadd.f32 %v465_v3, %v464_v6  ;;  %v7526_v6 = vld [vmem:[#allocation15_spill] sm:$0xff] }
  0xf4   :  { %7525 = vst [vmem:[#allocation13_spill] sm:$0xff] %v4859_v9  ;;  %v4866_v17 = vsub.f32 %v7526_v6, %v4478_v47  ;;  %v361_v2 = vmul.f32 %v4859_v9, %v4859_v9  ;;  %v477_v33 = vsel %vm106_vm0, %v360_v11, 0.0 }
  0xf5   :  { %v468_v41 = vadd.f32 %v467_v51, %v466_v53  ;;  %v7528_v53 = vld [vmem:[#allocation16_spill] sm:$0xff] }
  0xf6   :  { %7527 = vst [vmem:[#allocation14_spill] sm:$0xff] %v4866_v17  ;;  %v4873_v56 = vsub.f32 %v7528_v53, %v4478_v47  ;;  %v362_v4 = vmul.f32 %v4866_v17, %v4866_v17  ;;  %v479_v28 = vsel %vm106_vm0, %v361_v2, 0.0 }
  0xf7   :  { %v470_v3 = vadd.f32 %v469_v59, %v468_v41  ;;  %v7530_v41 = vld [vmem:[#allocation17_spill] sm:$0xff] }
  0xf8   :  { %7529 = vst [vmem:[#allocation15_spill] sm:$0xff] %v4873_v56  ;;  %v4880_v6 = vsub.f32 %v7530_v41, %v4478_v47  ;;  %v363_v9 = vmul.f32 %v4873_v56, %v4873_v56  ;;  %v481_v11 = vsel %vm106_vm0, %v362_v4, 0.0 }
  0xf9   :  { %v472_v51 = vadd.f32 %v471_v1, %v470_v3  ;;  %v7532_v3 = vld [vmem:[#allocation18_spill] sm:$0xff] }
  0xfa   :  { %7531 = vst [vmem:[#allocation16_spill] sm:$0xff] %v4880_v6  ;;  %v4887_v53 = vsub.f32 %v7532_v3, %v4478_v47  ;;  %v364_v17 = vmul.f32 %v4880_v6, %v4880_v6  ;;  %v483_v2 = vsel %vm106_vm0, %v363_v9, 0.0 }
  0xfb   :  { %v474_v59 = vadd.f32 %v473_v45, %v472_v51  ;;  %v7534_v51 = vld [vmem:[#allocation19_spill] sm:$0xff] }
  0xfc   :  { %7533 = vst [vmem:[#allocation17_spill] sm:$0xff] %v4887_v53  ;;  %v4894_v41 = vsub.f32 %v7534_v51, %v4478_v47  ;;  %v365_v56 = vmul.f32 %v4887_v53, %v4887_v53  ;;  %v485_v4 = vsel %vm106_vm0, %v364_v17, 0.0 }
  0xfd   :  { %v476_v1 = vadd.f32 %v475_v31, %v474_v59  ;;  %v7536_v59 = vld [vmem:[#allocation20_spill] sm:$0xff] }
  0xfe   :  { %7535 = vst [vmem:[#allocation18_spill] sm:$0xff] %v4894_v41  ;;  %v4901_v3 = vsub.f32 %v7536_v59, %v4478_v47  ;;  %v366_v6 = vmul.f32 %v4894_v41, %v4894_v41  ;;  %v487_v9 = vsel %vm106_vm0, %v365_v56, 0.0 }
  0xff   :  { %v478_v45 = vadd.f32 %v477_v33, %v476_v1  ;;  %v7538_v1 = vld [vmem:[#allocation21_spill] sm:$0xff] }
 0x100   :  { %7537 = vst [vmem:[#allocation19_spill] sm:$0xff] %v4901_v3  ;;  %v4908_v51 = vsub.f32 %v7538_v1, %v4478_v47  ;;  %v367_v59 = vmul.f32 %v4901_v3, %v4901_v3  ;;  %v489_v1 = vsel %vm106_vm0, %v366_v6, 0.0 }
 0x101   :  { %v480_v31 = vadd.f32 %v479_v28, %v478_v45  ;;  %v4915_v45 = vsub.f32 %v4474_v15, %v4478_v47 }
 0x102   :  { %7539 = vst [vmem:[#allocation20_spill] sm:$0xff] %v4908_v51 }
 0x103   :  { %v482_v33 = vadd.f32 %v481_v11, %v480_v31  ;;  %7540 = vst [vmem:[#allocation21_spill] sm:$0xff] %v4915_v45  ;;  %v368_v31 = vmul.f32 %v4908_v51, %v4908_v51  ;;  %v369_v17 = vmul.f32 %v4915_v45, %v4915_v45 }
 0x105   :  { %v484_v28 = vadd.f32 %v483_v2, %v482_v33  ;;  %v491_v2 = vsel %vm106_vm0, %v367_v59, 0.0  ;;  %v493_v15 = vsel %vm106_vm0, %v368_v31, 0.0  ;;  %v495_v3 = vsel %vm106_vm0, %v369_v17, 0.0 }
 0x107   :  { %v486_v11 = vadd.f32 %v485_v4, %v484_v28 }
 0x109   :  { %v488_v53 = vadd.f32 %v487_v9, %v486_v11 }
 0x10b   :  { %v490_v33 = vadd.f32 %v489_v1, %v488_v53  ;;  %v4933_v53 = vld [vmem:[%s7411_s1] ss:$0 sm:$0xff] }
 0x10d   :  { %v492_v47 = vadd.f32 %v491_v2, %v490_v33 }
 0x10f   :  { %v494_v41 = vadd.f32 %v493_v15, %v492_v47 }
 0x111   :  { %v496_v56 = vadd.f32 %v495_v3, %v494_v41  ;;  %v4946_v3 = vld [vmem:[%s7412_s2] ss:$0 sm:$0xff] }
 0x113   :  { %v497_v4 = vrot.slane %v496_v56, 4 }
 0x115   :  { %v498_v28 = vadd.f32 %v497_v4, %v496_v56 }
 0x117   :  { %v499_v27 = vrot.slane %v498_v28, 2 }
 0x119   :  { %v500_v51 = vadd.f32 %v499_v27, %v498_v28 }
 0x11b   :  { %v501_v63 = vrot.slane %v500_v51, 1 }
 0x11d   :  { %v502_v6 = vadd.f32 %v501_v63, %v500_v51  ;;  %v7541_v51 = vld [vmem:[#allocation22_spill] sm:$0xff] }
 0x11f   :  { %v503_v9 = vmul.f32 0.001953125, %v502_v6 }
 0x121   :  { %v504_v11 = vadd.f32 1e-05, %v503_v9 }
 0x123   :  { %3923 = vrsqrt.f32 %v504_v11 }
 0x130   :  { %v4928_v45 = vpop.eup %3923 }
 0x131   :  { %v506_v59 = vmul.f32 %v4928_v45, %v4482_v60  ;;  %v507_v41 = vmul.f32 %v4928_v45, %v4486_v57  ;;  %v508_v27 = vmul.f32 %v4928_v45, %v4490_v7  ;;  %v509_v63 = vmul.f32 %v4928_v45, %v4494_v19 }
 0x132   :  { %v510_v31 = vmul.f32 %v4928_v45, %v7541_v51  ;;  %v511_v60 = vmul.f32 %v4928_v45, %v4508_v5  ;;  %v512_v57 = vmul.f32 %v4928_v45, %v4514_v10  ;;  %v513_v7 = vmul.f32 %v4928_v45, %v4523_v14 }
 0x133   :  { %v576_v1 = vmul.f32 %v4933_v53, %v506_v59  ;;  %v577_v19 = vmul.f32 %v4933_v53, %v507_v41  ;;  %v578_v17 = vmul.f32 %v4933_v53, %v508_v27  ;;  %v579_v2 = vmul.f32 %v4933_v53, %v509_v63 }
 0x134   :  { %v580_v33 = vmul.f32 %v4933_v53, %v510_v31  ;;  %v581_v15 = vmul.f32 %v4933_v53, %v511_v60  ;;  %v582_v5 = vmul.f32 %v4933_v53, %v512_v57  ;;  %v583_v47 = vmul.f32 %v4933_v53, %v513_v7 }
 0x135   :  { %v646_v10 = vadd.f32 %v4946_v3, %v576_v1  ;;  %v647_v14 = vadd.f32 %v4946_v3, %v577_v19  ;;  %v648_v56 = vadd.f32 %v4946_v3, %v578_v17  ;;  %v649_v4 = vadd.f32 %v4946_v3, %v579_v2 }
 0x136   :  { %v650_v28 = vadd.f32 %v4946_v3, %v580_v33  ;;  %v651_v6 = vadd.f32 %v4946_v3, %v581_v15  ;;  %v652_v51 = vadd.f32 %v4946_v3, %v582_v5  ;;  %v653_v31 = vadd.f32 %v4946_v3, %v583_v47 }
 0x137   :  { %v710_v9 = vmax.f32 %v646_v10, 0.0  ;;  %v711_v11 = vmax.f32 %v647_v14, 0.0  ;;  %v712_v59 = vmax.f32 %v648_v56, 0.0  ;;  %v713_v41 = vmax.f32 %v649_v4, 0.0 }
 0x138   :  { %v714_v27 = vmax.f32 %v650_v28, 0.0  ;;  %v715_v63 = vmax.f32 %v651_v6, 0.0  ;;  %v514_v7 = vmul.f32 %v4928_v45, %v4530_v48  ;;  %v515_v1 = vmul.f32 %v4928_v45, %v4537_v20 }
 0x139   :  { %v774_v60 = vpack.c.bf16 %v711_v11, %v710_v9  ;;  %806 = vst.msk [vmem:[#allocation4] sm:$0xff] %vm106_vm0, %v710_v9  ;;  %807 = vst.msk [vmem:[#allocation4 + $0x8] sm:$0xff] %vm106_vm0, %v711_v11  ;;  %v775_v57 = vpack.c.bf16 %v713_v41, %v712_v59  ;;  %v516_v17 = vmul.f32 %v4928_v45, %v4544_v23  ;;  %v716_v5 = vmax.f32 %v652_v51, 0.0 }
 0x13a   :  { %v776_v19 = vpack.c.bf16 %v715_v63, %v714_v27  ;;  %808 = vst.msk [vmem:[#allocation4 + $0x10] sm:$0xff] %vm106_vm0, %v714_v27  ;;  %809 = vst.msk [vmem:[#allocation4 + $0x18] sm:$0xff] %vm106_vm0, %v715_v63  ;;  %v517_v2 = vmul.f32 %v4928_v45, %v4551_v26  ;;  %v584_v33 = vmul.f32 %v4933_v53, %v514_v7  ;;  %v717_v47 = vmax.f32 %v653_v31, 0.0 }
 0x13b   :  { %3760 = vmatprep.mubr.msk.bf16.mxu0 %vm106_vm0, %v774_v60  ;;  %v585_v48 = vmul.f32 %v4933_v53, %v515_v1  ;;  %v518_v20 = vmul.f32 %v4928_v45, %v4558_v29  ;;  %v519_v15 = vmul.f32 %v4928_v45, %v4565_v32  ;;  %v586_v23 = vmul.f32 %v4933_v53, %v516_v17 }
 0x13c   :  { %3761 = vmatmul.mubr.msk.bf16.vlgmr.msra.gmra.mxu0 %vm106_vm0, %v775_v57  ;;  %v587_v26 = vmul.f32 %v4933_v53, %v517_v2  ;;  %v654_v10 = vadd.f32 %v4946_v3, %v584_v33  ;;  %v520_v4 = vmul.f32 %v4928_v45, %v4572_v34  ;;  %v521_v28 = vmul.f32 %v4928_v45, %v4579_v35 }
 0x13d   :  { %3764 = vmatprep.mubr.msk.bf16.mxu0 %vm106_vm0, %v776_v19  ;;  %v655_v14 = vadd.f32 %v4946_v3, %v585_v48  ;;  %v588_v56 = vmul.f32 %v4933_v53, %v518_v20  ;;  %v589_v29 = vmul.f32 %v4933_v53, %v519_v15  ;;  %v656_v32 = vadd.f32 %v4946_v3, %v586_v23 }
 0x13e   :  { %v718_v6 = vmax.f32 %v654_v10, 0.0  ;;  %v777_v41 = vpack.c.bf16 %v717_v47, %v716_v5  ;;  %v657_v27 = vadd.f32 %v4946_v3, %v587_v26  ;;  %v522_v34 = vmul.f32 %v4928_v45, %v4586_v36 }
 0x13f   :  { %v719_v9 = vmax.f32 %v655_v14, 0.0  ;;  %v658_v11 = vadd.f32 %v4946_v3, %v588_v56  ;;  %v659_v59 = vadd.f32 %v4946_v3, %v589_v29  ;;  %v523_v35 = vmul.f32 %v4928_v45, %v4593_v38 }
 0x140   :  { %810 = vst.msk [vmem:[#allocation4 + $0x20] sm:$0xff] %vm106_vm0, %v718_v6  ;;  %v720_v60 = vmax.f32 %v656_v32, 0.0  ;;  %v590_v57 = vmul.f32 %v4933_v53, %v520_v4  ;;  %v591_v7 = vmul.f32 %v4933_v53, %v521_v28  ;;  %v592_v1 = vmul.f32 %v4933_v53, %v522_v34 }
 0x141   :  { %v778_v63 = vpack.c.bf16 %v719_v9, %v718_v6  ;;  %811 = vst.msk [vmem:[#allocation4 + $0x28] sm:$0xff] %vm106_vm0, %v719_v9  ;;  %v722_v51 = vmax.f32 %v658_v11, 0.0  ;;  %v723_v31 = vmax.f32 %v659_v59, 0.0  ;;  %v721_v19 = vmax.f32 %v657_v27, 0.0 }
 0x142   :  { %v593_v17 = vmul.f32 %v4933_v53, %v523_v35  ;;  %v526_v36 = vmul.f32 %v4928_v45, %v4614_v42  ;;  %v527_v38 = vmul.f32 %v4928_v45, %v4621_v43  ;;  %v662_v2 = vadd.f32 %v4946_v3, %v592_v1 }
 0x143   :  { %812 = vst.msk [vmem:[#allocation4 + $0x30] sm:$0xff] %vm106_vm0, %v722_v51  ;;  %813 = vst.msk [vmem:[#allocation4 + $0x38] sm:$0xff] %vm106_vm0, %v723_v31  ;;  %v524_v33 = vmul.f32 %v4928_v45, %v4600_v39  ;;  %v525_v20 = vmul.f32 %v4928_v45, %v4607_v40  ;;  %v660_v42 = vadd.f32 %v4946_v3, %v590_v57 }
 0x144   :  { %3765 = vmatmul.mubr.msk.bf16.gmra.mxu0 %vm106_vm0, %v777_v41  ;;  %v663_v48 = vadd.f32 %v4946_v3, %v593_v17  ;;  %v596_v15 = vmul.f32 %v4933_v53, %v526_v36  ;;  %v597_v5 = vmul.f32 %v4933_v53, %v527_v38  ;;  %v661_v43 = vadd.f32 %v4946_v3, %v591_v7 }
 0x145   :  { %3768 = vmatprep.mubr.msk.bf16.mxu0 %vm106_vm0, %v778_v63  ;;  %v726_v47 = vmax.f32 %v662_v2, 0.0  ;;  %v779_v23 = vpack.c.bf16 %v721_v19, %v720_v60  ;;  %v780_v14 = vpack.c.bf16 %v723_v31, %v722_v51  ;;  %v530_v40 = vmul.f32 %v4928_v45, %v4642_v0 }
 0x146   :  { %v727_v26 = vmax.f32 %v663_v48, 0.0  ;;  %v5036_v10 = vadd.f32 %v4946_v3, %v596_v15  ;;  %v5039_v39 = vadd.f32 %v4946_v3, %v597_v5  ;;  %v594_v56 = vmul.f32 %v4933_v53, %v524_v33 }
 0x147   :  { %814 = vst.msk [vmem:[#allocation4 + $0x40] sm:$0xff] %vm106_vm0, %v726_v47  ;;  %v595_v29 = vmul.f32 %v4933_v53, %v525_v20  ;;  %v531_v28 = vmul.f32 %v4928_v45, %v4649_v8  ;;  %v600_v6 = vmul.f32 %v4933_v53, %v530_v40  ;;  %v724_v9 = vmax.f32 %v660_v42, 0.0 }
 0x148   :  { %815 = vst.msk [vmem:[#allocation4 + $0x48] sm:$0xff] %vm106_vm0, %v727_v26  ;;  %v730_v32 = vmax.f32 %v5036_v10, 0.0  ;;  %v731_v4 = vmax.f32 %v5039_v39, 0.0  ;;  %v725_v11 = vmax.f32 %v661_v43, 0.0  ;;  %v528_v0 = vmul.f32 %v4928_v45, %v4628_v44 }
 0x149   :  { %v601_v59 = vmul.f32 %v4933_v53, %v531_v28  ;;  %v5060_v41 = vadd.f32 %v4946_v3, %v600_v6  ;;  %v534_v8 = vmul.f32 %v4928_v45, %v4670_v21  ;;  %v535_v27 = vmul.f32 %v4928_v45, %v4677_v25 }
 0x14a   :  { %816 = vst.msk [vmem:[#allocation4 + $0x50] sm:$0xff] %vm106_vm0, %v730_v32  ;;  %817 = vst.msk [vmem:[#allocation4 + $0x58] sm:$0xff] %vm106_vm0, %v731_v4  ;;  %v664_v63 = vadd.f32 %v4946_v3, %v594_v56  ;;  %v665_v51 = vadd.f32 %v4946_v3, %v595_v29  ;;  %v529_v44 = vmul.f32 %v4928_v45, %v4635_v62 }
 0x14b   :  { %v5071_v31 = vadd.f32 %v4946_v3, %v601_v59  ;;  %v734_v34 = vmax.f32 %v5060_v41, 0.0  ;;  %v604_v35 = vmul.f32 %v4933_v53, %v534_v8  ;;  %v605_v60 = vmul.f32 %v4933_v53, %v535_v27 }
 0x14c   :  { %3769 = vmatmul.mubr.msk.bf16.gmra.mxu0 %vm106_vm0, %v779_v23  ;;  %v781_v21 = vpack.c.bf16 %v725_v11, %v724_v9  ;;  %v782_v57 = vpack.c.bf16 %v727_v26, %v726_v47  ;;  %v598_v25 = vmul.f32 %v4933_v53, %v528_v0  ;;  %v538_v19 = vmul.f32 %v4928_v45, %v4698_v46 }
 0x14d   :  { %3772 = vmatprep.mubr.msk.bf16.mxu0 %vm106_vm0, %v780_v14  ;;  %v735_v7 = vmax.f32 %v5071_v31, 0.0  ;;  %818 = vst.msk [vmem:[#allocation4 + $0x60] sm:$0xff] %vm106_vm0, %v734_v34  ;;  %v5082_v62 = vadd.f32 %v4946_v3, %v604_v35  ;;  %v5085_v1 = vadd.f32 %v4946_v3, %v605_v60  ;;  %v728_v17 = vmax.f32 %v664_v63, 0.0 }
 0x14e   :  { %v599_v36 = vmul.f32 %v4933_v53, %v529_v44  ;;  %v729_v38 = vmax.f32 %v665_v51, 0.0  ;;  %v539_v48 = vmul.f32 %v4928_v45, %v4705_v49  ;;  %v608_v20 = vmul.f32 %v4933_v53, %v538_v19 }
 0x14f   :  { %819 = vst.msk [vmem:[#allocation4 + $0x68] sm:$0xff] %vm106_vm0, %v735_v7  ;;  %v738_v2 = vmax.f32 %v5082_v62, 0.0  ;;  %v739_v33 = vmax.f32 %v5085_v1, 0.0  ;;  %v668_v46 = vadd.f32 %v4946_v3, %v598_v25  ;;  %v542_v42 = vmul.f32 %v4928_v45, %v4726_v58 }
 0x150   :  { %v609_v15 = vmul.f32 %v4933_v53, %v539_v48  ;;  %v669_v49 = vadd.f32 %v4946_v3, %v599_v36  ;;  %v5108_v5 = vadd.f32 %v4946_v3, %v608_v20  ;;  %v543_v43 = vmul.f32 %v4928_v45, %v4733_v61 }
 0x151   :  { %820 = vst.msk [vmem:[#allocation4 + $0x70] sm:$0xff] %vm106_vm0, %v738_v2  ;;  %821 = vst.msk [vmem:[#allocation4 + $0x78] sm:$0xff] %vm106_vm0, %v739_v33  ;;  %v783_v47 = vpack.c.bf16 %v729_v38, %v728_v17  ;;  %v532_v23 = vmul.f32 %v4928_v45, %v4656_v12  ;;  %v533_v10 = vmul.f32 %v4928_v45, %v4663_v16  ;;  %v732_v56 = vmax.f32 %v668_v46, 0.0 }
 0x152   :  { %v5117_v26 = vadd.f32 %v4946_v3, %v609_v15  ;;  %v742_v39 = vmax.f32 %v5108_v5, 0.0  ;;  %v612_v14 = vmul.f32 %v4933_v53, %v542_v42  ;;  %v613_v40 = vmul.f32 %v4933_v53, %v543_v43 }
 0x153   :  { %v784_v58 = vpack.c.bf16 %v731_v4, %v730_v32  ;;  %v733_v29 = vmax.f32 %v669_v49, 0.0  ;;  %v546_v28 = vmul.f32 %v4928_v45, %v4754_v18  ;;  %v602_v6 = vmul.f32 %v4933_v53, %v532_v23 }
 0x154   :  { %3773 = vmatmul.mubr.msk.bf16.gmra.mxu0 %vm106_vm0, %v781_v21  ;;  %v743_v61 = vmax.f32 %v5117_v26, 0.0  ;;  %822 = vst.msk [vmem:[#allocation4 + $0x80] sm:$0xff] %vm106_vm0, %v742_v39  ;;  %v5129_v12 = vadd.f32 %v4946_v3, %v612_v14  ;;  %v5132_v16 = vadd.f32 %v4946_v3, %v613_v40  ;;  %v603_v32 = vmul.f32 %v4933_v53, %v533_v10  ;;  %v7543_v10 = vld [vmem:[#allocation11_spill] sm:$0xff] }
 0x155   :  { %3776 = vmatprep.mubr.msk.bf16.mxu0 %vm106_vm0, %v782_v57  ;;  %v547_v11 = vmul.f32 %v4928_v45, %v4761_v24  ;;  %v616_v18 = vmul.f32 %v4933_v53, %v546_v28  ;;  %v785_v0 = vpack.c.bf16 %v733_v29, %v732_v56  ;;  %v672_v8 = vadd.f32 %v4946_v3, %v602_v6  ;;  %v7544_v28 = vld [vmem:[#allocation14_spill] sm:$0xff] }
 0x156   :  { %823 = vst.msk [vmem:[#allocation4 + $0x88] sm:$0xff] %vm106_vm0, %v743_v61  ;;  %v746_v4 = vmax.f32 %v5129_v12, 0.0  ;;  %v747_v9 = vmax.f32 %v5132_v16, 0.0  ;;  %v536_v24 = vmul.f32 %v4928_v45, %v4684_v30  ;;  %v550_v63 = vmul.f32 %v4928_v45, %v4782_v50  ;;  %v7552_v12 = vld [vmem:[#allocation27_spill] sm:$0xff] }
 0x157   :  { %v617_v59 = vmul.f32 %v4933_v53, %v547_v11  ;;  %v5159_v27 = vadd.f32 %v4946_v3, %v616_v18  ;;  %v673_v51 = vadd.f32 %v4946_v3, %v603_v32  ;;  %v537_v44 = vmul.f32 %v4928_v45, %v4691_v37  ;;  %v7545_v18 = vld [vmem:[#allocation15_spill] sm:$0xff] }
 0x158   :  { %824 = vst.msk [vmem:[#allocation4 + $0x90] sm:$0xff] %vm106_vm0, %v746_v4  ;;  %825 = vst.msk [vmem:[#allocation4 + $0x98] sm:$0xff] %vm106_vm0, %v747_v9  ;;  %v551_v35 = vmul.f32 %v4928_v45, %v4789_v54  ;;  %v786_v30 = vpack.c.bf16 %v735_v7, %v734_v34  ;;  %v620_v21 = vmul.f32 %v4933_v53, %v550_v63  ;;  %v736_v41 = vmax.f32 %v672_v8, 0.0  ;;  %v7546_v63 = vld [vmem:[#allocation23_spill] sm:$0xff] }
 0x159   :  { %v5167_v31 = vadd.f32 %v4946_v3, %v617_v59  ;;  %v750_v60 = vmax.f32 %v5159_v27, 0.0  ;;  %v606_v25 = vmul.f32 %v4933_v53, %v536_v24  ;;  %v554_v54 = vmul.f32 %v4928_v45, %v4810_v13 }
 0x15a   :  { %v621_v57 = vmul.f32 %v4933_v53, %v551_v35  ;;  %v5182_v37 = vadd.f32 %v4946_v3, %v620_v21  ;;  %v737_v34 = vmax.f32 %v673_v51, 0.0  ;;  %v607_v7 = vmul.f32 %v4933_v53, %v537_v44 }
 0x15b   :  { %v751_v50 = vmax.f32 %v5167_v31, 0.0  ;;  %826 = vst.msk [vmem:[#allocation4 + $0xa0] sm:$0xff] %vm106_vm0, %v750_v60  ;;  %v555_v13 = vmul.f32 %v4928_v45, %v4817_v22  ;;  %v624_v36 = vmul.f32 %v4933_v53, %v554_v54  ;;  %v540_v48 = vmul.f32 %v4928_v45, %v4712_v52  ;;  %v7542_v52 = vld [vmem:[#allocation10_spill] sm:$0xff]  ;;  %v7555_v31 = vld [vmem:[#allocation9_spill] sm:$0xff] }
 0x15c   :  { %3777 = vmatmul.mubr.msk.bf16.gmra.mxu0 %vm106_vm0, %v783_v47  ;;  %v5192_v19 = vadd.f32 %v4946_v3, %v621_v57  ;;  %v754_v17 = vmax.f32 %v5182_v37, 0.0  ;;  %v541_v20 = vmul.f32 %v4928_v45, %v4719_v55  ;;  %v787_v22 = vpack.c.bf16 %v737_v34, %v736_v41  ;;  %v7548_v41 = vld [vmem:[#allocation18_spill] sm:$0xff] }
 0x15d   :  { %3780 = vmatprep.mubr.msk.bf16.mxu0 %vm106_vm0, %v784_v58  ;;  %827 = vst.msk [vmem:[#allocation4 + $0xa8] sm:$0xff] %vm106_vm0, %v751_v50  ;;  %v625_v46 = vmul.f32 %v4933_v53, %v555_v13  ;;  %v5209_v15 = vadd.f32 %v4946_v3, %v624_v36  ;;  %v676_v49 = vadd.f32 %v4946_v3, %v606_v25  ;;  %v7549_v36 = vld [vmem:[#allocation19_spill] sm:$0xff] }
 0x15e   :  { %v755_v38 = vmax.f32 %v5192_v19, 0.0  ;;  %828 = vst.msk [vmem:[#allocation4 + $0xb0] sm:$0xff] %vm106_vm0, %v754_v17  ;;  %v677_v42 = vadd.f32 %v4946_v3, %v607_v7  ;;  %v558_v55 = vmul.f32 %v4928_v45, %v7542_v52  ;;  %v788_v43 = vpack.c.bf16 %v739_v33, %v738_v2 }
 0x15f   :  { %v5223_v47 = vadd.f32 %v4946_v3, %v625_v46  ;;  %v758_v23 = vmax.f32 %v5209_v15, 0.0  ;;  %v559_v14 = vmul.f32 %v4928_v45, %v7543_v10  ;;  %v610_v58 = vmul.f32 %v4933_v53, %v540_v48 }
 0x160   :  { %829 = vst.msk [vmem:[#allocation4 + $0xb8] sm:$0xff] %vm106_vm0, %v755_v38  ;;  %v628_v40 = vmul.f32 %v4933_v53, %v558_v55  ;;  %v611_v56 = vmul.f32 %v4933_v53, %v541_v20  ;;  %v740_v1 = vmax.f32 %v676_v49, 0.0  ;;  %v741_v2 = vmax.f32 %v677_v42, 0.0 }
 0x161   :  { %v759_v29 = vmax.f32 %v5223_v47, 0.0  ;;  %830 = vst.msk [vmem:[#allocation4 + $0xc0] sm:$0xff] %vm106_vm0, %v758_v23  ;;  %v629_v62 = vmul.f32 %v4933_v53, %v559_v14  ;;  %v562_v6 = vmul.f32 %v4928_v45, %v7544_v28  ;;  %v680_v8 = vadd.f32 %v4946_v3, %v610_v58  ;;  %v7550_v14 = vld [vmem:[#allocation25_spill] sm:$0xff]  ;;  %v7551_v58 = vld [vmem:[#allocation26_spill] sm:$0xff] }
 0x162   :  { %v5238_v33 = vadd.f32 %v4946_v3, %v628_v40  ;;  %v681_v24 = vadd.f32 %v4946_v3, %v611_v56  ;;  %v544_v51 = vmul.f32 %v4928_v45, %v7546_v63  ;;  %v789_v35 = vpack.c.bf16 %v741_v2, %v740_v1  ;;  %v7559_v47 = vld [vmem:[#allocation17_spill] sm:$0xff] }
 0x163   :  { %831 = vst.msk [vmem:[#allocation4 + $0xc8] sm:$0xff] %vm106_vm0, %v759_v29  ;;  %v5247_v32 = vadd.f32 %v4946_v3, %v629_v62  ;;  %v632_v59 = vmul.f32 %v4933_v53, %v562_v6  ;;  %v790_v54 = vpack.c.bf16 %v743_v61, %v742_v39  ;;  %v566_v34 = vmul.f32 %v4928_v45, %v7548_v41  ;;  %v7554_v41 = vld [vmem:[#allocation8_spill] sm:$0xff] }
 0x164   :  { %3781 = vmatmul.mubr.msk.bf16.gmra.mxu0 %vm106_vm0, %v785_v0  ;;  %v762_v11 = vmax.f32 %v5238_v33, 0.0  ;;  %v563_v0 = vmul.f32 %v4928_v45, %v7545_v18  ;;  %v567_v48 = vmul.f32 %v4928_v45, %v7549_v36  ;;  %v744_v20 = vmax.f32 %v680_v8, 0.0 }
 0x165   :  { %3784 = vmatprep.mubr.msk.bf16.mxu0 %vm106_vm0, %v786_v30  ;;  %v763_v44 = vmax.f32 %v5247_v32, 0.0  ;;  %v7547_v30 = vld [vmem:[#allocation24_spill] sm:$0xff]  ;;  %v5265_v25 = vadd.f32 %v4946_v3, %v632_v59  ;;  %v745_v5 = vmax.f32 %v681_v24, 0.0  ;;  %v614_v26 = vmul.f32 %v4933_v53, %v544_v51  ;;  %v7561_v32 = vld [vmem:[#allocation21_spill] sm:$0xff] }
 0x166   :  { %v545_v21 = vmul.f32 %v4928_v45, %v7547_v30  ;;  %832 = vst.msk [vmem:[#allocation4 + $0xd0] sm:$0xff] %vm106_vm0, %v762_v11  ;;  %v633_v57 = vmul.f32 %v4933_v53, %v563_v0  ;;  %v636_v39 = vmul.f32 %v4933_v53, %v566_v34  ;;  %v548_v40 = vmul.f32 %v4928_v45, %v7550_v14  ;;  %v7553_v59 = vld [vmem:[#allocation28_spill] sm:$0xff] }
 0x167   :  { %833 = vst.msk [vmem:[#allocation4 + $0xd8] sm:$0xff] %vm106_vm0, %v763_v44  ;;  %v766_v13 = vmax.f32 %v5265_v25, 0.0  ;;  %v791_v52 = vpack.c.bf16 %v745_v5, %v744_v20  ;;  %v684_v55 = vadd.f32 %v4946_v3, %v614_v26  ;;  %v549_v56 = vmul.f32 %v4928_v45, %v7551_v58  ;;  %v7556_v5 = vld [vmem:[#allocation12_spill] sm:$0xff] }
 0x168   :  { %v5277_v7 = vadd.f32 %v4946_v3, %v633_v57  ;;  %v615_v61 = vmul.f32 %v4933_v53, %v545_v21  ;;  %v5293_v49 = vadd.f32 %v4946_v3, %v636_v39  ;;  %v792_v1 = vpack.c.bf16 %v747_v9, %v746_v4  ;;  %v7557_v39 = vld [vmem:[#allocation13_spill] sm:$0xff] }
 0x169   :  { %834 = vst.msk [vmem:[#allocation4 + $0xe0] sm:$0xff] %vm106_vm0, %v766_v13  ;;  %v748_v2 = vmax.f32 %v684_v55, 0.0  ;;  %v618_v6 = vmul.f32 %v4933_v53, %v548_v40  ;;  %v619_v18 = vmul.f32 %v4933_v53, %v549_v56  ;;  %v552_v16 = vmul.f32 %v4928_v45, %v7552_v12  ;;  %v7558_v56 = vld [vmem:[#allocation16_spill] sm:$0xff] }
 0x16a   :  { %v767_v46 = vmax.f32 %v5277_v7, 0.0  ;;  %v685_v10 = vadd.f32 %v4946_v3, %v615_v61  ;;  %v553_v8 = vmul.f32 %v4928_v45, %v7553_v59  ;;  %v794_v24 = vpack.c.bf16 %v751_v50, %v750_v60 }
 0x16b   :  { %v688_v9 = vadd.f32 %v4946_v3, %v618_v6  ;;  %v689_v0 = vadd.f32 %v4946_v3, %v619_v18  ;;  %v622_v63 = vmul.f32 %v4933_v53, %v552_v16  ;;  %v556_v27 = vmul.f32 %v4928_v45, %v7554_v41 }
 0x16c   :  { %3785 = vmatmul.mubr.msk.bf16.gmra.mxu0 %vm106_vm0, %v787_v22  ;;  %v637_v22 = vmul.f32 %v4933_v53, %v567_v48  ;;  %835 = vst.msk [vmem:[#allocation4 + $0xe8] sm:$0xff] %vm106_vm0, %v767_v46  ;;  %v749_v28 = vmax.f32 %v685_v10, 0.0  ;;  %v623_v30 = vmul.f32 %v4933_v53, %v553_v8  ;;  %v557_v60 = vmul.f32 %v4928_v45, %v7555_v31 }
 0x16d   :  { %3788 = vmatprep.mubr.msk.bf16.mxu0 %vm106_vm0, %v788_v43  ;;  %v770_v43 = vmax.f32 %v5293_v49, 0.0  ;;  %v752_v51 = vmax.f32 %v688_v9, 0.0  ;;  %v692_v21 = vadd.f32 %v4946_v3, %v622_v63  ;;  %v796_v50 = vpack.c.bf16 %v755_v38, %v754_v17 }
 0x16e   :  { %v5299_v42 = vadd.f32 %v4946_v3, %v637_v22  ;;  %v793_v4 = vpack.c.bf16 %v749_v28, %v748_v2  ;;  %v626_v48 = vmul.f32 %v4933_v53, %v556_v27  ;;  %v627_v20 = vmul.f32 %v4933_v53, %v557_v60 }
 0x16f   :  { %836 = vst.msk [vmem:[#allocation4 + $0xf0] sm:$0xff] %vm106_vm0, %v770_v43  ;;  %v756_v34 = vmax.f32 %v692_v21, 0.0  ;;  %v560_v26 = vmul.f32 %v4928_v45, %v7556_v5  ;;  %v561_v61 = vmul.f32 %v4928_v45, %v7557_v39  ;;  %v798_v38 = vpack.c.bf16 %v759_v29, %v758_v23 }
 0x170   :  { %v771_v62 = vmax.f32 %v5299_v42, 0.0  ;;  %v696_v19 = vadd.f32 %v4946_v3, %v626_v48  ;;  %v697_v17 = vadd.f32 %v4946_v3, %v627_v20  ;;  %v564_v15 = vmul.f32 %v4928_v45, %v7558_v56 }
 0x171   :  { %v630_v22 = vmul.f32 %v4933_v53, %v560_v26  ;;  %v565_v23 = vmul.f32 %v4928_v45, %v7559_v47  ;;  %v800_v29 = vpack.c.bf16 %v763_v44, %v762_v11  ;;  %v569_v11 = vmul.f32 %v4928_v45, %v7561_v32 }
 0x172   :  { %837 = vst.msk [vmem:[#allocation4 + $0xf8] sm:$0xff] %vm106_vm0, %v771_v62  ;;  %v760_v55 = vmax.f32 %v696_v19, 0.0  ;;  %v761_v10 = vmax.f32 %v697_v17, 0.0  ;;  %v634_v28 = vmul.f32 %v4933_v53, %v564_v15  ;;  %v802_v44 = vpack.c.bf16 %v767_v46, %v766_v13 }
 0x173   :  { %v700_v14 = vadd.f32 %v4946_v3, %v630_v22  ;;  %v635_v6 = vmul.f32 %v4933_v53, %v565_v23  ;;  %v639_v8 = vmul.f32 %v4933_v53, %v569_v11  ;;  %v804_v25 = vpack.c.bf16 %v771_v62, %v770_v43 }
 0x174   :  { %3789 = vmatmul.mubr.msk.bf16.gmra.mxu0 %vm106_vm0, %v789_v35  ;;  %v753_v35 = vmax.f32 %v689_v0, 0.0  ;;  %v799_v58 = vpack.c.bf16 %v761_v10, %v760_v55  ;;  %v704_v12 = vadd.f32 %v4946_v3, %v634_v28 }
 0x175   :  { %3792 = vmatprep.mubr.msk.bf16.mxu0 %vm106_vm0, %v790_v54  ;;  %v693_v54 = vadd.f32 %v4946_v3, %v623_v30  ;;  %v705_v16 = vadd.f32 %v4946_v3, %v635_v6 }
 0x176   :  { %v795_v57 = vpack.c.bf16 %v753_v35, %v752_v51  ;;  %v768_v9 = vmax.f32 %v704_v12, 0.0 }
 0x177   :  { %v757_v36 = vmax.f32 %v693_v54, 0.0  ;;  %v769_v0 = vmax.f32 %v705_v16, 0.0 }
 0x179   :  { %v797_v37 = vpack.c.bf16 %v757_v36, %v756_v34 }
 0x17c   :  { %3793 = vmatmul.mubr.msk.bf16.gmra.mxu0 %vm106_vm0, %v791_v52  ;;  %v631_v52 = vmul.f32 %v4933_v53, %v561_v61 }
 0x17d   :  { %3796 = vmatprep.mubr.msk.bf16.mxu0 %vm106_vm0, %v792_v1  ;;  %v764_v1 = vmax.f32 %v700_v14, 0.0 }
 0x17e   :  { %v701_v40 = vadd.f32 %v4946_v3, %v631_v52 }
 0x180   :  { %v765_v2 = vmax.f32 %v701_v40, 0.0 }
 0x182   :  { %v801_v18 = vpack.c.bf16 %v765_v2, %v764_v1 }
 0x184   :  { %3797 = vmatmul.mubr.msk.bf16.gmra.mxu0 %vm106_vm0, %v793_v4  ;;  %v7560_v4 = vld [vmem:[#allocation20_spill] sm:$0xff] }
 0x185   :  { %3800 = vmatprep.mubr.msk.bf16.mxu0 %vm106_vm0, %v794_v24  ;;  %v568_v33 = vmul.f32 %v4928_v45, %v7560_v4  ;;  %v803_v24 = vpack.c.bf16 %v769_v0, %v768_v9  ;;  %v709_v45 = vadd.f32 %v4946_v3, %v639_v8 }
 0x187   :  { %v638_v59 = vmul.f32 %v4933_v53, %v568_v33  ;;  %v773_v13 = vmax.f32 %v709_v45, 0.0 }
 0x189   :  { %v708_v63 = vadd.f32 %v4946_v3, %v638_v59 }
 0x18b   :  { %v772_v7 = vmax.f32 %v708_v63, 0.0 }
 0x18c   :  { %3801 = vmatmul.mubr.msk.bf16.gmra.mxu0 %vm106_vm0, %v795_v57 }
 0x18d   :  { %3804 = vmatprep.mubr.msk.bf16.mxu0 %vm106_vm0, %v796_v50  ;;  %v805_v46 = vpack.c.bf16 %v773_v13, %v772_v7 }
 0x194   :  { %3805 = vmatmul.mubr.msk.bf16.gmra.mxu0 %vm106_vm0, %v797_v37 }
 0x195   :  { %3808 = vmatprep.mubr.msk.bf16.mxu0 %vm106_vm0, %v798_v38 }
 0x19c   :  { %3809 = vmatmul.mubr.msk.bf16.gmra.mxu0 %vm106_vm0, %v799_v58 }
 0x19d   :  { %3812 = vmatprep.mubr.msk.bf16.mxu0 %vm106_vm0, %v800_v29 }
 0x1a4   :  { %3813 = vmatmul.mubr.msk.bf16.gmra.mxu0 %vm106_vm0, %v801_v18 }
 0x1a5   :  { %3816 = vmatprep.mubr.msk.bf16.mxu0 %vm106_vm0, %v802_v44 }
 0x1ac   :  { %3817 = vmatmul.mubr.msk.bf16.gmra.mxu0 %vm106_vm0, %v803_v24 }
 0x1ad   :  { %3820 = vmatprep.mubr.msk.bf16.mxu0 %vm106_vm0, %v804_v25 }
 0x1b4   :  { %3821 = vmatmul.mubr.msk.bf16.gmra.mxu0 %vm106_vm0, %v805_v46 }
 0x1fc   :  { %v5402_v53 = vpop.f32.mrf.mxu0 }
 0x1fd   :  { %v1261_v30 = vsel %vm1257_vm1, %v5402_v53, 0.0 }
 0x1fe   :  { %v5404_v51 = vpop.f32.mrf.mxu0 }
 0x1ff   :  { %v1258_v49 = vsel %vm1257_vm1, %v5404_v51, 0.0 }
 0x200   :  { %v5406_v35 = vpop.f32.mrf.mxu0 }
 0x201   :  { %v1263_v54 = vsel %vm1257_vm1, %v5406_v35, 0.0 }
 0x202   :  { %v5408_v3 = vpop.f32.mrf.mxu0 }
 0x203   :  { %v1259_v42 = vsel %vm1257_vm1, %v5408_v3, 0.0 }
 0x204   :  { %v1260_v43 = vadd.f32 %v1259_v42, %v1258_v49  ;;  %v5414_v62 = vpop.f32.mrf.mxu0 }
 0x205   :  { %v1269_v20 = vsel %vm1257_vm1, %v5414_v62, 0.0 }
 0x206   :  { %v1262_v21 = vadd.f32 %v1261_v30, %v1260_v43  ;;  %v5418_v57 = vpop.f32.mrf.mxu0 }
 0x207   :  { %v1265_v31 = vsel %vm1257_vm1, %v5418_v57, 0.0 }
 0x208   :  { %v1264_v41 = vadd.f32 %v1263_v54, %v1262_v21  ;;  %v5422_v27 = vpop.f32.mrf.mxu0 }
 0x209   :  { %v1271_v39 = vsel %vm1257_vm1, %v5422_v27, 0.0 }
 0x20a   :  { %v1266_v60 = vadd.f32 %v1265_v31, %v1264_v41  ;;  %v5426_v50 = vpop.f32.mrf.mxu0 }
 0x20b   :  { %v1267_v34 = vsel %vm1257_vm1, %v5426_v50, 0.0 }
 0x20c   :  { %v1268_v36 = vadd.f32 %v1267_v34, %v1266_v60  ;;  %v5430_v48 = vpop.f32.mrf.mxu0 }
 0x20d   :  { %v1277_v10 = vsel %vm1257_vm1, %v5430_v48, 0.0 }
 0x20e   :  { %v1270_v5 = vadd.f32 %v1269_v20, %v1268_v36  ;;  %v5434_v26 = vpop.f32.mrf.mxu0 }
 0x20f   :  { %v1273_v19 = vsel %vm1257_vm1, %v5434_v26, 0.0 }
 0x210   :  { %v1272_v61 = vadd.f32 %v1271_v39, %v1270_v5  ;;  %v5438_v37 = vpop.f32.mrf.mxu0 }
 0x211   :  { %v1279_v58 = vsel %vm1257_vm1, %v5438_v37, 0.0 }
 0x212   :  { %v1274_v17 = vadd.f32 %v1273_v19, %v1272_v61  ;;  %v5442_v38 = vpop.f32.mrf.mxu0 }
 0x213   :  { %v1275_v22 = vsel %vm1257_vm1, %v5442_v38, 0.0 }
 0x214   :  { %v1276_v52 = vadd.f32 %v1275_v22, %v1274_v17  ;;  %v5446_v55 = vpop.f32.mrf.mxu0 }
 0x215   :  { %v1285_v6 = vsel %vm1257_vm1, %v5446_v55, 0.0 }
 0x216   :  { %v1278_v14 = vadd.f32 %v1277_v10, %v1276_v52  ;;  %v5450_v40 = vpop.f32.mrf.mxu0 }
 0x217   :  { %v1281_v47 = vsel %vm1257_vm1, %v5450_v40, 0.0 }
 0x218   :  { %v1280_v56 = vadd.f32 %v1279_v58, %v1278_v14  ;;  %v5454_v15 = vpop.f32.mrf.mxu0 }
 0x219   :  { %v1287_v16 = vsel %vm1257_vm1, %v5454_v15, 0.0 }
 0x21a   :  { %v1282_v23 = vadd.f32 %v1281_v47, %v1280_v56  ;;  %v5458_v29 = vpop.f32.mrf.mxu0 }
 0x21b   :  { %v1283_v1 = vsel %vm1257_vm1, %v5458_v29, 0.0 }
 0x21c   :  { %v1284_v2 = vadd.f32 %v1283_v1, %v1282_v23  ;;  %v5462_v28 = vpop.f32.mrf.mxu0 }
 0x21d   :  { %v1293_v8 = vsel %vm1257_vm1, %v5462_v28, 0.0 }
 0x21e   :  { %v1286_v18 = vadd.f32 %v1285_v6, %v1284_v2  ;;  %v5466_v12 = vpop.f32.mrf.mxu0 }
 0x21f   :  { %v1289_v32 = vsel %vm1257_vm1, %v5466_v12, 0.0 }
 0x220   :  { %v1288_v4 = vadd.f32 %v1287_v16, %v1286_v18  ;;  %v5470_v33 = vpop.f32.mrf.mxu0 }
 0x221   :  { %v1295_v45 = vsel %vm1257_vm1, %v5470_v33, 0.0 }
 0x222   :  { %v1290_v11 = vadd.f32 %v1289_v32, %v1288_v4  ;;  %v5474_v44 = vpop.f32.mrf.mxu0 }
 0x223   :  { %v1291_v9 = vsel %vm1257_vm1, %v5474_v44, 0.0 }
 0x224   :  { %v1292_v0 = vadd.f32 %v1291_v9, %v1290_v11  ;;  %v5478_v59 = vpop.f32.mrf.mxu0 }
 0x225   :  { %v1301_v21 = vsel %vm1257_vm1, %v5478_v59, 0.0 }
 0x226   :  { %v1294_v24 = vadd.f32 %v1293_v8, %v1292_v0  ;;  %v5482_v63 = vpop.f32.mrf.mxu0 }
 0x227   :  { %v1297_v13 = vsel %vm1257_vm1, %v5482_v63, 0.0 }
 0x228   :  { %v1296_v25 = vadd.f32 %v1295_v45, %v1294_v24  ;;  %v5486_v7 = vpop.f32.mrf.mxu0 }
 0x229   :  { %v1303_v31 = vsel %vm1257_vm1, %v5486_v7, 0.0 }
 0x22a   :  { %v1298_v46 = vadd.f32 %v1297_v13, %v1296_v25  ;;  %v5490_v49 = vpop.f32.mrf.mxu0 }
 0x22b   :  { %v1299_v42 = vsel %vm1257_vm1, %v5490_v49, 0.0 }
 0x22c   :  { %v1300_v43 = vadd.f32 %v1299_v42, %v1298_v46  ;;  %v5494_v30 = vpop.f32.mrf.mxu0 }
 0x22d   :  { %v1309_v17 = vsel %vm1257_vm1, %v5494_v30, 0.0 }
 0x22e   :  { %v1302_v54 = vadd.f32 %v1301_v21, %v1300_v43  ;;  %v5498_v41 = vpop.f32.mrf.mxu0 }
 0x22f   :  { %v1305_v36 = vsel %vm1257_vm1, %v5498_v41, 0.0 }
 0x230   :  { %v1304_v60 = vadd.f32 %v1303_v31, %v1302_v54  ;;  %v5502_v34 = vpop.f32.mrf.mxu0 }
 0x231   :  { %v1311_v10 = vsel %vm1257_vm1, %v5502_v34, 0.0 }
 0x232   :  { %v1306_v20 = vadd.f32 %v1305_v36, %v1304_v60  ;;  %v5506_v5 = vpop.f32.mrf.mxu0 }
 0x233   :  { %v1307_v39 = vsel %vm1257_vm1, %v5506_v5, 0.0 }
 0x234   :  { %v1308_v61 = vadd.f32 %v1307_v39, %v1306_v20  ;;  %v5510_v19 = vpop.f32.mrf.mxu0 }
 0x235   :  { %v1317_v18 = vsel %vm1257_vm1, %v5510_v19, 0.0 }
 0x236   :  { %v1310_v22 = vadd.f32 %v1309_v17, %v1308_v61  ;;  %v5514_v52 = vpop.f32.mrf.mxu0 }
 0x237   :  { %v1313_v56 = vsel %vm1257_vm1, %v5514_v52, 0.0 }
 0x238   :  { %v1312_v14 = vadd.f32 %v1311_v10, %v1310_v22  ;;  %v5518_v58 = vpop.f32.mrf.mxu0 }
 0x239   :  { %7562 = vst [vmem:[#allocation22_spill] sm:$0xff] %v5518_v58  ;;  %v1319_v32 = vsel %vm1257_vm1, %v5518_v58, 0.0 }
 0x23a   :  { %v1314_v47 = vadd.f32 %v1313_v56, %v1312_v14  ;;  %v5522_v23 = vpop.f32.mrf.mxu0 }
 0x23b   :  { %v1315_v1 = vsel %vm1257_vm1, %v5522_v23, 0.0 }
 0x23c   :  { %v1316_v2 = vadd.f32 %v1315_v1, %v1314_v47  ;;  %v5526_v6 = vpop.f32.mrf.mxu0 }
 0x23d   :  { %7563 = vst [vmem:[#allocation10_spill] sm:$0xff] %v5526_v6  ;;  %v1325_v46 = vsel %vm1257_vm1, %v5526_v6, 0.0 }
 0x23e   :  { %v1318_v16 = vadd.f32 %v1317_v18, %v1316_v2  ;;  %v5530_v4 = vpop.f32.mrf.mxu0 }
 0x23f   :  { %7564 = vst [vmem:[#allocation11_spill] sm:$0xff] %v5530_v4  ;;  %v1321_v0 = vsel %vm1257_vm1, %v5530_v4, 0.0 }
 0x240   :  { %v1320_v11 = vadd.f32 %v1319_v32, %v1318_v16  ;;  %v5534_v9 = vpop.f32.mrf.mxu0 }
 0x241   :  { %7565 = vst [vmem:[#allocation14_spill] sm:$0xff] %v5534_v9  ;;  %v1327_v21 = vsel %vm1257_vm1, %v5534_v9, 0.0 }
 0x242   :  { %v1322_v8 = vadd.f32 %v1321_v0, %v1320_v11  ;;  %v5538_v24 = vpop.f32.mrf.mxu0 }
 0x243   :  { %7566 = vst [vmem:[#allocation15_spill] sm:$0xff] %v5538_v24  ;;  %v1323_v45 = vsel %vm1257_vm1, %v5538_v24, 0.0 }
 0x244   :  { %v1324_v25 = vadd.f32 %v1323_v45, %v1322_v8  ;;  %v5542_v13 = vpop.f32.mrf.mxu0 }
 0x245   :  { %7567 = vst [vmem:[#allocation23_spill] sm:$0xff] %v5542_v13  ;;  %v1333_v22 = vsel %vm1257_vm1, %v5542_v13, 0.0 }
 0x246   :  { %v1326_v42 = vadd.f32 %v1325_v46, %v1324_v25  ;;  %v5546_v43 = vpop.f32.mrf.mxu0 }
 0x247   :  { %7568 = vst [vmem:[#allocation24_spill] sm:$0xff] %v5546_v43  ;;  %v1329_v60 = vsel %vm1257_vm1, %v5546_v43, 0.0 }
 0x248   :  { %v1328_v54 = vadd.f32 %v1327_v21, %v1326_v42  ;;  %v5550_v31 = vpop.f32.mrf.mxu0 }
 0x249   :  { %7569 = vst [vmem:[#allocation18_spill] sm:$0xff] %v5550_v31  ;;  %v1335_v56 = vsel %vm1257_vm1, %v5550_v31, 0.0 }
 0x24a   :  { %v1330_v36 = vadd.f32 %v1329_v60, %v1328_v54  ;;  %v5554_v20 = vpop.f32.mrf.mxu0 }
 0x24b   :  { %7570 = vst [vmem:[#allocation19_spill] sm:$0xff] %v5554_v20  ;;  %v1331_v39 = vsel %vm1257_vm1, %v5554_v20, 0.0 }
 0x24c   :  { %v1332_v61 = vadd.f32 %v1331_v39, %v1330_v36  ;;  %v5558_v17 = vpop.f32.mrf.mxu0 }
 0x24d   :  { %7571 = vst [vmem:[#allocation25_spill] sm:$0xff] %v5558_v17  ;;  %v1341_v8 = vsel %vm1257_vm1, %v5558_v17, 0.0 }
 0x24e   :  { %v1334_v10 = vadd.f32 %v1333_v22, %v1332_v61  ;;  %v5562_v14 = vpop.f32.mrf.mxu0 }
 0x24f   :  { %7572 = vst [vmem:[#allocation26_spill] sm:$0xff] %v5562_v14  ;;  %v1337_v2 = vsel %vm1257_vm1, %v5562_v14, 0.0 }
 0x250   :  { %v1336_v47 = vadd.f32 %v1335_v56, %v1334_v10  ;;  %v5566_v1 = vpop.f32.mrf.mxu0 }
 0x251   :  { %7573 = vst [vmem:[#allocation27_spill] sm:$0xff] %v5566_v1  ;;  %v1343_v46 = vsel %vm1257_vm1, %v5566_v1, 0.0 }
 0x252   :  { %v1338_v18 = vadd.f32 %v1337_v2, %v1336_v47  ;;  %v5570_v16 = vpop.f32.mrf.mxu0 }
 0x253   :  { %7574 = vst [vmem:[#allocation28_spill] sm:$0xff] %v5570_v16  ;;  %v1339_v32 = vsel %vm1257_vm1, %v5570_v16, 0.0 }
 0x254   :  { %v1340_v11 = vadd.f32 %v1339_v32, %v1338_v18  ;;  %v5574_v0 = vpop.f32.mrf.mxu0 }
 0x255   :  { %7575 = vst [vmem:[#allocation8_spill] sm:$0xff] %v5574_v0  ;;  %v1349_v10 = vsel %vm1257_vm1, %v5574_v0, 0.0 }
 0x256   :  { %v1342_v45 = vadd.f32 %v1341_v8, %v1340_v11  ;;  %v5578_v25 = vpop.f32.mrf.mxu0 }
 0x257   :  { %7576 = vst [vmem:[#allocation9_spill] sm:$0xff] %v5578_v25  ;;  %v1345_v54 = vsel %vm1257_vm1, %v5578_v25, 0.0 }
 0x258   :  { %v1344_v42 = vadd.f32 %v1343_v46, %v1342_v45  ;;  %v5582_v21 = vpop.f32.mrf.mxu0 }
 0x259   :  { %7577 = vst [vmem:[#allocation12_spill] sm:$0xff] %v5582_v21  ;;  %v1351_v2 = vsel %vm1257_vm1, %v5582_v21, 0.0 }
 0x25a   :  { %v1346_v60 = vadd.f32 %v1345_v54, %v1344_v42  ;;  %v1179_v36 = vpop.f32.mrf.mxu0 }
 0x25b   :  { %v1347_v39 = vsel %vm1257_vm1, %v1179_v36, 0.0 }
 0x25c   :  { %v1348_v61 = vadd.f32 %v1347_v39, %v1346_v60  ;;  %v3810_v22 = vpop.f32.mrf.mxu0 }
 0x25d   :  { %v1357_v60 = vsel %vm1257_vm1, %v3810_v22, 0.0 }
 0x25e   :  { %v1350_v56 = vadd.f32 %v1349_v10, %v1348_v61  ;;  %v1192_v47 = vpop.f32.mrf.mxu0 }
 0x25f   :  { %v1353_v11 = vsel %vm1257_vm1, %v1192_v47, 0.0 }
 0x260   :  { %v1352_v18 = vadd.f32 %v1351_v2, %v1350_v56  ;;  %v3811_v32 = vpop.f32.mrf.mxu0 }
 0x261   :  { %v1359_v61 = vsel %vm1257_vm1, %v3811_v32, 0.0 }
 0x262   :  { %v1354_v8 = vadd.f32 %v1353_v11, %v1352_v18  ;;  %v1195_v45 = vpop.f32.mrf.mxu0 }
 0x263   :  { %v1355_v46 = vsel %vm1257_vm1, %v1195_v45, 0.0 }
 0x264   :  { %v1356_v42 = vadd.f32 %v1355_v46, %v1354_v8  ;;  %v3814_v54 = vpop.f32.mrf.mxu0 }
 0x265   :  { %v1365_v17 = vsel %vm1257_vm1, %v3814_v54, 0.0 }
 0x266   :  { %v1358_v39 = vadd.f32 %v1357_v60, %v1356_v42  ;;  %v1208_v25 = vpop.f32.mrf.mxu0 }
 0x267   :  { %v1361_v21 = vsel %vm1257_vm1, %v1208_v25, 0.0 }
 0x268   :  { %v1360_v10 = vadd.f32 %v1359_v61, %v1358_v39  ;;  %v3815_v0 = vpop.f32.mrf.mxu0 }
 0x269   :  { %v1367_v16 = vsel %vm1257_vm1, %v3815_v0, 0.0 }
 0x26a   :  { %v1362_v56 = vadd.f32 %v1361_v21, %v1360_v10  ;;  %v1211_v2 = vpop.f32.mrf.mxu0 }
 0x26b   :  { %v1363_v1 = vsel %vm1257_vm1, %v1211_v2, 0.0 }
 0x26c   :  { %v1364_v18 = vadd.f32 %v1363_v1, %v1362_v56  ;;  %v3818_v11 = vpop.f32.mrf.mxu0 }
 0x26d   :  { %v1373_v13 = vsel %vm1257_vm1, %v3818_v11, 0.0 }
 0x26e   :  { %v1366_v8 = vadd.f32 %v1365_v17, %v1364_v18  ;;  %v1224_v46 = vpop.f32.mrf.mxu0 }
 0x26f   :  { %v1369_v14 = vsel %vm1257_vm1, %v1224_v46, 0.0 }
 0x270   :  { %v1368_v42 = vadd.f32 %v1367_v16, %v1366_v8  ;;  %v3819_v60 = vpop.f32.mrf.mxu0 }
 0x271   :  { %v1375_v20 = vsel %vm1257_vm1, %v3819_v60, 0.0 }
 0x272   :  { %v1370_v39 = vadd.f32 %v1369_v14, %v1368_v42  ;;  %v1227_v61 = vpop.f32.mrf.mxu0 }
 0x273   :  { %v1371_v31 = vsel %vm1257_vm1, %v1227_v61, 0.0 }
 0x274   :  { %v1372_v21 = vadd.f32 %v1371_v31, %v1370_v39  ;;  %v3822_v10 = vpop.f32.mrf.mxu0 }
 0x275   :  { %v1381_v31 = vsel %vm1257_vm1, %v3822_v10, 0.0 }
 0x276   :  { %v1374_v1 = vadd.f32 %v1373_v13, %v1372_v21  ;;  %v1240_v56 = vpop.f32.mrf.mxu0 }
 0x277   :  { %v1377_v43 = vsel %vm1257_vm1, %v1240_v56, 0.0 }
 0x278   :  { %v1376_v17 = vadd.f32 %v1375_v20, %v1374_v1  ;;  %v3823_v18 = vpop.f32.mrf.mxu0 }
 0x279   :  { %v1383_v9 = vsel %vm1257_vm1, %v3823_v18, 0.0 }
 0x27a   :  { %v1378_v16 = vadd.f32 %v1377_v43, %v1376_v17  ;;  %v5604_v8 = vpop.f32.mrf.mxu0 }
 0x27b   :  { %v1379_v14 = vsel %vm1257_vm1, %v5604_v8, 0.0 }
 0x27c   :  { %v1380_v42 = vadd.f32 %v1379_v14, %v1378_v16 }
 0x27e   :  { %v1382_v39 = vadd.f32 %v1381_v31, %v1380_v42 }
 0x280   :  { %v1384_v13 = vadd.f32 %v1383_v9, %v1382_v39 }
 0x282   :  { %v1385_v21 = vrot.slane %v1384_v13, 4 }
 0x284   :  { %v1386_v6 = vadd.f32 %v1385_v21, %v1384_v13 }
 0x286   :  { %v1387_v24 = vrot.slane %v1386_v6, 2 }
 0x288   :  { %v1388_v20 = vadd.f32 %v1387_v24, %v1386_v6 }
 0x28a   :  { %v1389_v1 = vrot.slane %v1388_v20, 1 }
 0x28c   :  { %v1390_v4 = vadd.f32 %v1389_v1, %v1388_v20 }
 0x28e   :  { %v5610_v58 = vmul.f32 0.001953125, %v1390_v4 }
 0x290   :  { %v5613_v43 = vsub.f32 %v1179_v36, %v5610_v58  ;;  %v5616_v17 = vsub.f32 %v1192_v47, %v5610_v58  ;;  %v5619_v16 = vsub.f32 %v1195_v45, %v5610_v58  ;;  %v5622_v14 = vsub.f32 %v3810_v22, %v5610_v58 }
 0x291   :  { %v5625_v9 = vsub.f32 %v3811_v32, %v5610_v58  ;;  %v5628_v6 = vsub.f32 %v1208_v25, %v5610_v58  ;;  %v5631_v4 = vsub.f32 %v1211_v2, %v5610_v58  ;;  %v5634_v24 = vsub.f32 %v3814_v54, %v5610_v58 }
 0x292   :  { %7578 = vst [vmem:[#allocation13_spill] sm:$0xff] %v5613_v43  ;;  %v5637_v36 = vsub.f32 %v3815_v0, %v5610_v58  ;;  %v5640_v47 = vsub.f32 %v1224_v46, %v5610_v58  ;;  %v5643_v22 = vsub.f32 %v1227_v61, %v5610_v58  ;;  %v5646_v32 = vsub.f32 %v3818_v11, %v5610_v58 }
 0x293   :  { %v5649_v25 = vsub.f32 %v3819_v60, %v5610_v58  ;;  %v5652_v45 = vsub.f32 %v1240_v56, %v5610_v58  ;;  %v5655_v54 = vsub.f32 %v3822_v10, %v5610_v58  ;;  %v5658_v0 = vsub.f32 %v3823_v18, %v5610_v58 }
 0x294   :  { %v5662_v2 = vsub.f32 %v5404_v51, %v5610_v58  ;;  %v5666_v11 = vsub.f32 %v5408_v3, %v5610_v58  ;;  %v5670_v46 = vsub.f32 %v5402_v53, %v5610_v58  ;;  %v5674_v60 = vsub.f32 %v5406_v35, %v5610_v58 }
 0x295   :  { %7579 = vst [vmem:[#allocation16_spill] sm:$0xff] %v5649_v25  ;;  %7580 = vst [vmem:[#allocation17_spill] sm:$0xff] %v5652_v45  ;;  %v5682_v51 = vsub.f32 %v5418_v57, %v5610_v58  ;;  %v5688_v53 = vsub.f32 %v5426_v50, %v5610_v58  ;;  %v5696_v31 = vsub.f32 %v5414_v62, %v5610_v58 }
 0x296   :  { %7581 = vst [vmem:[#allocation20_spill] sm:$0xff] %v5655_v54  ;;  %v1456_v61 = vmul.f32 %v5662_v2, %v5662_v2  ;;  %v1457_v10 = vmul.f32 %v5666_v11, %v5666_v11  ;;  %v1458_v3 = vmul.f32 %v5670_v46, %v5670_v46  ;;  %v1459_v35 = vmul.f32 %v5674_v60, %v5674_v60 }
 0x297   :  { %v1460_v57 = vmul.f32 %v5682_v51, %v5682_v51  ;;  %v5703_v50 = vsub.f32 %v5422_v27, %v5610_v58  ;;  %v1461_v21 = vmul.f32 %v5688_v53, %v5688_v53  ;;  %v5710_v62 = vsub.f32 %v5434_v26, %v5610_v58 }
 0x298   :  { %v1520_v56 = vsel %vm1257_vm1, %v1456_v61, 0.0  ;;  %v1521_v18 = vsel %vm1257_vm1, %v1457_v10, 0.0  ;;  %v1523_v39 = vsel %vm1257_vm1, %v1458_v3, 0.0  ;;  %v1525_v20 = vsel %vm1257_vm1, %v1459_v35, 0.0 }
 0x299   :  { %v1522_v42 = vadd.f32 %v1521_v18, %v1520_v56  ;;  %v1462_v61 = vmul.f32 %v5696_v31, %v5696_v31  ;;  %v1527_v10 = vsel %vm1257_vm1, %v1460_v57, 0.0  ;;  %v5717_v27 = vsub.f32 %v5442_v38, %v5610_v58 }
 0x29a   :  { %v1463_v56 = vmul.f32 %v5703_v50, %v5703_v50  ;;  %v1529_v35 = vsel %vm1257_vm1, %v1461_v21, 0.0  ;;  %v5724_v26 = vsub.f32 %v5430_v48, %v5610_v58  ;;  %v5731_v38 = vsub.f32 %v5438_v37, %v5610_v58 }
 0x29b   :  { %v1524_v13 = vadd.f32 %v1523_v39, %v1522_v42  ;;  %v1464_v42 = vmul.f32 %v5710_v62, %v5710_v62  ;;  %v1531_v57 = vsel %vm1257_vm1, %v1462_v61, 0.0  ;;  %v5738_v48 = vsub.f32 %v5450_v40, %v5610_v58 }
 0x29c   :  { %v1533_v21 = vsel %vm1257_vm1, %v1463_v56, 0.0  ;;  %v5745_v37 = vsub.f32 %v5458_v29, %v5610_v58  ;;  %v5752_v40 = vsub.f32 %v5446_v55, %v5610_v58  ;;  %v5759_v29 = vsub.f32 %v5454_v15, %v5610_v58 }
 0x29d   :  { %v1526_v1 = vadd.f32 %v1525_v20, %v1524_v13  ;;  %v1465_v13 = vmul.f32 %v5717_v27, %v5717_v27  ;;  %v1535_v61 = vsel %vm1257_vm1, %v1464_v42, 0.0  ;;  %v5766_v55 = vsub.f32 %v5466_v12, %v5610_v58 }
 0x29e   :  { %v5773_v15 = vsub.f32 %v5474_v44, %v5610_v58  ;;  %v5780_v12 = vsub.f32 %v5462_v28, %v5610_v58  ;;  %v5787_v44 = vsub.f32 %v5470_v33, %v5610_v58  ;;  %v5794_v28 = vsub.f32 %v5482_v63, %v5610_v58 }
 0x29f   :  { %v1528_v3 = vadd.f32 %v1527_v10, %v1526_v1  ;;  %v1466_v1 = vmul.f32 %v5724_v26, %v5724_v26  ;;  %v1537_v56 = vsel %vm1257_vm1, %v1465_v13, 0.0  ;;  %v5801_v33 = vsub.f32 %v5490_v49, %v5610_v58 }
 0x2a0   :  { %v5808_v63 = vsub.f32 %v5478_v59, %v5610_v58  ;;  %v5815_v49 = vsub.f32 %v5486_v7, %v5610_v58  ;;  %v5822_v59 = vsub.f32 %v5498_v41, %v5610_v58  ;;  %v5829_v7 = vsub.f32 %v5506_v5, %v5610_v58 }
 0x2a1   :  { %v1530_v18 = vadd.f32 %v1529_v35, %v1528_v3  ;;  %v1467_v3 = vmul.f32 %v5731_v38, %v5731_v38  ;;  %v1539_v42 = vsel %vm1257_vm1, %v1466_v1, 0.0  ;;  %v5836_v41 = vsub.f32 %v5494_v30, %v5610_v58 }
 0x2a2   :  { %v5843_v5 = vsub.f32 %v5502_v34, %v5610_v58  ;;  %v5850_v30 = vsub.f32 %v5514_v52, %v5610_v58  ;;  %v5857_v34 = vsub.f32 %v5522_v23, %v5610_v58 }
 0x2a3   :  { %v1532_v39 = vadd.f32 %v1531_v57, %v1530_v18  ;;  %v1468_v18 = vmul.f32 %v5738_v48, %v5738_v48  ;;  %v1541_v13 = vsel %vm1257_vm1, %v1467_v3, 0.0 }
 0x2a4   :  { %7582 = vst [vmem:[#allocation21_spill] sm:$0xff] %v5857_v34 }
 0x2a5   :  { %v1534_v20 = vadd.f32 %v1533_v21, %v1532_v39  ;;  %v1469_v39 = vmul.f32 %v5745_v37, %v5745_v37  ;;  %v1543_v1 = vsel %vm1257_vm1, %v1468_v18, 0.0 }
 0x2a7   :  { %v1536_v10 = vadd.f32 %v1535_v61, %v1534_v20  ;;  %v1470_v20 = vmul.f32 %v5752_v40, %v5752_v40  ;;  %v1545_v3 = vsel %vm1257_vm1, %v1469_v39, 0.0 }
 0x2a9   :  { %v1538_v35 = vadd.f32 %v1537_v56, %v1536_v10  ;;  %v1471_v10 = vmul.f32 %v5759_v29, %v5759_v29  ;;  %v1547_v18 = vsel %vm1257_vm1, %v1470_v20, 0.0 }
 0x2ab   :  { %v1540_v57 = vadd.f32 %v1539_v42, %v1538_v35  ;;  %v1472_v35 = vmul.f32 %v5766_v55, %v5766_v55  ;;  %v1549_v39 = vsel %vm1257_vm1, %v1471_v10, 0.0 }
 0x2ad   :  { %v1542_v21 = vadd.f32 %v1541_v13, %v1540_v57  ;;  %v1473_v57 = vmul.f32 %v5773_v15, %v5773_v15  ;;  %v1551_v20 = vsel %vm1257_vm1, %v1472_v35, 0.0 }
 0x2af   :  { %v1544_v61 = vadd.f32 %v1543_v1, %v1542_v21  ;;  %v1474_v21 = vmul.f32 %v5780_v12, %v5780_v12  ;;  %v1553_v10 = vsel %vm1257_vm1, %v1473_v57, 0.0 }
 0x2b1   :  { %v1546_v56 = vadd.f32 %v1545_v3, %v1544_v61  ;;  %v1475_v61 = vmul.f32 %v5787_v44, %v5787_v44  ;;  %v1555_v35 = vsel %vm1257_vm1, %v1474_v21, 0.0 }
 0x2b3   :  { %v1548_v42 = vadd.f32 %v1547_v18, %v1546_v56  ;;  %v1476_v56 = vmul.f32 %v5794_v28, %v5794_v28  ;;  %v1557_v57 = vsel %vm1257_vm1, %v1475_v61, 0.0 }
 0x2b5   :  { %v1550_v13 = vadd.f32 %v1549_v39, %v1548_v42  ;;  %v1477_v42 = vmul.f32 %v5801_v33, %v5801_v33  ;;  %v1559_v21 = vsel %vm1257_vm1, %v1476_v56, 0.0 }
 0x2b7   :  { %v1552_v1 = vadd.f32 %v1551_v20, %v1550_v13  ;;  %v1478_v13 = vmul.f32 %v5808_v63, %v5808_v63  ;;  %v1561_v61 = vsel %vm1257_vm1, %v1477_v42, 0.0 }
 0x2b9   :  { %v1554_v3 = vadd.f32 %v1553_v10, %v1552_v1  ;;  %v1479_v1 = vmul.f32 %v5815_v49, %v5815_v49  ;;  %v1563_v56 = vsel %vm1257_vm1, %v1478_v13, 0.0 }
 0x2bb   :  { %v1556_v18 = vadd.f32 %v1555_v35, %v1554_v3  ;;  %v1480_v3 = vmul.f32 %v5822_v59, %v5822_v59  ;;  %v1565_v42 = vsel %vm1257_vm1, %v1479_v1, 0.0 }
 0x2bd   :  { %v1558_v39 = vadd.f32 %v1557_v57, %v1556_v18  ;;  %v1481_v18 = vmul.f32 %v5829_v7, %v5829_v7  ;;  %v1567_v13 = vsel %vm1257_vm1, %v1480_v3, 0.0 }
 0x2bf   :  { %v1560_v20 = vadd.f32 %v1559_v21, %v1558_v39  ;;  %v1482_v39 = vmul.f32 %v5836_v41, %v5836_v41  ;;  %v1569_v1 = vsel %vm1257_vm1, %v1481_v18, 0.0  ;;  %v1485_v18 = vmul.f32 %v5857_v34, %v5857_v34 }
 0x2c1   :  { %v1562_v10 = vadd.f32 %v1561_v61, %v1560_v20  ;;  %v1483_v20 = vmul.f32 %v5843_v5, %v5843_v5  ;;  %v5864_v61 = vsub.f32 %v5510_v19, %v5610_v58  ;;  %v1571_v3 = vsel %vm1257_vm1, %v1482_v39, 0.0  ;;  %v7584_v19 = vld [vmem:[#allocation22_spill] sm:$0xff]  ;;  %v7586_v39 = vld [vmem:[#allocation11_spill] sm:$0xff] }
 0x2c2   :  { %v5909_v23 = vsub.f32 %v7584_v19, %v5610_v58 }
 0x2c3   :  { %v1564_v35 = vadd.f32 %v1563_v56, %v1562_v10  ;;  %7583 = vst [vmem:[#allocation29_spill] sm:$0xff] %v5864_v61  ;;  %v1484_v10 = vmul.f32 %v5850_v30, %v5850_v30 }
 0x2c4   :  { %7585 = vst [vmem:[#allocation22_spill] sm:$0xff] %v5909_v23 }
 0x2c5   :  { %v1566_v57 = vadd.f32 %v1565_v42, %v1564_v35  ;;  %v3951_v35 = vmov 0.0   ;;  %v1573_v42 = vsel %vm1257_vm1, %v1483_v20, 0.0  ;;  %v1487_v20 = vmul.f32 %v5909_v23, %v5909_v23 }
 0x2c6   :  { %1982 = vst.msk [vmem:[#allocation3 + $0x48] sm:$0x1] %vm1924_vm2, %v3951_v35  ;;  %1983 = vst.msk [vmem:[#allocation3 + $0x60] sm:$0x1] %vm1924_vm2, %v3951_v35 }
 0x2c7   :  { %v1568_v21 = vadd.f32 %v1567_v13, %v1566_v57  ;;  %1925 = vst.msk [vmem:[#allocation2] sm:$0x1] %vm1924_vm2, %v3951_v35  ;;  %1926 = vst.msk [vmem:[#allocation2 + $0x18] sm:$0x1] %vm1924_vm2, %v3951_v35  ;;  %v5918_v13 = vsub.f32 %v7586_v39, %v5610_v58 }
 0x2c8   :  { %1927 = vst.msk [vmem:[#allocation2 + $0x30] sm:$0x1] %vm1924_vm2, %v3951_v35  ;;  %1928 = vst.msk [vmem:[#allocation2 + $0x48] sm:$0x1] %vm1924_vm2, %v3951_v35 }
 0x2c9   :  { %v1570_v52 = vadd.f32 %v1569_v1, %v1568_v21  ;;  %1929 = vst.msk [vmem:[#allocation2 + $0x60] sm:$0x1] %vm1924_vm2, %v3951_v35  ;;  %1930 = vst.msk [vmem:[#allocation2 + $0x78] sm:$0x1] %vm1924_vm2, %v3951_v35  ;;  %v1486_v21 = vmul.f32 %v5864_v61, %v5864_v61  ;;  %v1575_v1 = vsel %vm1257_vm1, %v1484_v10, 0.0  ;;  %v1488_v61 = vmul.f32 %v5918_v13, %v5918_v13 }
 0x2ca   :  { %1931 = vst.msk [vmem:[#allocation2 + $0x90] sm:$0x1] %vm1924_vm2, %v3951_v35  ;;  %1932 = vst.msk [vmem:[#allocation2 + $0xa8] sm:$0x1] %vm1924_vm2, %v3951_v35 }
 0x2cb   :  { %v1572_v56 = vadd.f32 %v1571_v3, %v1570_v52  ;;  %1933 = vst.msk [vmem:[#allocation2 + $0xc0] sm:$0x1] %vm1924_vm2, %v3951_v35  ;;  %1934 = vst.msk [vmem:[#allocation2 + $0xd8] sm:$0x1] %vm1924_vm2, %v3951_v35  ;;  %v7588_v3 = vld [vmem:[#allocation15_spill] sm:$0xff]  ;;  %v1579_v10 = vsel %vm1257_vm1, %v1486_v21, 0.0 }
 0x2cc   :  { %1935 = vst.msk [vmem:[#allocation2 + $0xf0] sm:$0x1] %vm1924_vm2, %v3951_v35  ;;  %1936 = vst.msk [vmem:[#allocation2 + $0x108] sm:$0x1] %vm1924_vm2, %v3951_v35  ;;  %v5925_v19 = vsub.f32 %v7588_v3, %v5610_v58  ;;  %v1583_v21 = vsel %vm1257_vm1, %v1488_v61, 0.0 }
 0x2cd   :  { %1937 = vst.msk [vmem:[#allocation2 + $0x120] sm:$0x1] %vm1924_vm2, %v3951_v35  ;;  %1938 = vst.msk [vmem:[#allocation2 + $0x138] sm:$0x1] %vm1924_vm2, %v3951_v35  ;;  %v1574_v57 = vadd.f32 %v1573_v42, %v1572_v56  ;;  %v7590_v42 = vld [vmem:[#allocation10_spill] sm:$0xff] }
 0x2ce   :  { %1939 = vst.msk [vmem:[#allocation2 + $0x150] sm:$0x1] %vm1924_vm2, %v3951_v35  ;;  %1940 = vst.msk [vmem:[#allocation2 + $0x168] sm:$0x1] %vm1924_vm2, %v3951_v35  ;;  %v5932_v39 = vsub.f32 %v7590_v42, %v5610_v58  ;;  %v1489_v23 = vmul.f32 %v5925_v19, %v5925_v19 }
 0x2cf   :  { %1973 = vst.msk [vmem:[#allocation3] sm:$0xff] %vm1257_vm1, %v3951_v35  ;;  %1974 = vst.msk [vmem:[#allocation3 + $0x8] sm:$0xff] %vm1257_vm1, %v3951_v35  ;;  %v1576_v52 = vadd.f32 %v1575_v1, %v1574_v57  ;;  %v7592_v1 = vld [vmem:[#allocation14_spill] sm:$0xff] }
 0x2d0   :  { %1975 = vst.msk [vmem:[#allocation3 + $0x10] sm:$0x1] %vm1924_vm2, %v3951_v35  ;;  %1978 = vst.msk [vmem:[#allocation3 + $0xe8] sm:$0x1] %vm1924_vm2, %v3951_v35  ;;  %v5939_v3 = vsub.f32 %v7592_v1, %v5610_v58 }
 0x2d1   :  { %1976 = vst.msk [vmem:[#allocation3 + $0xd8] sm:$0xff] %vm1257_vm1, %v3951_v35  ;;  %1977 = vst.msk [vmem:[#allocation3 + $0xe0] sm:$0xff] %vm1257_vm1, %v3951_v35 }
 0x2d2   :  { %1980 = vst.msk [vmem:[#allocation3 + $0x18] sm:$0x1] %vm1924_vm2, %v3951_v35  ;;  %1981 = vst.msk [vmem:[#allocation3 + $0x30] sm:$0x1] %vm1924_vm2, %v3951_v35 }
 0x2d3   :  { %1984 = vst.msk [vmem:[#allocation3 + $0x78] sm:$0x1] %vm1924_vm2, %v3951_v35  ;;  %1985 = vst.msk [vmem:[#allocation3 + $0x90] sm:$0x1] %vm1924_vm2, %v3951_v35 }
 0x2d4   :  { %1986 = vst.msk [vmem:[#allocation3 + $0xa8] sm:$0x1] %vm1924_vm2, %v3951_v35  ;;  %1987 = vst.msk [vmem:[#allocation3 + $0xc0] sm:$0x1] %vm1924_vm2, %v3951_v35 }
 0x2d5   :  { %1989 = vst.msk [vmem:[#allocation3 + $0xf0] sm:$0x1] %vm1924_vm2, %v3951_v35  ;;  %1990 = vst.msk [vmem:[#allocation3 + $0x108] sm:$0x1] %vm1924_vm2, %v3951_v35 }
 0x2d6   :  { %1991 = vst.msk [vmem:[#allocation3 + $0x120] sm:$0x1] %vm1924_vm2, %v3951_v35  ;;  %1992 = vst.msk [vmem:[#allocation3 + $0x138] sm:$0x1] %vm1924_vm2, %v3951_v35 }
 0x2d7   :  { %1993 = vst.msk [vmem:[#allocation3 + $0x150] sm:$0x1] %vm1924_vm2, %v3951_v35  ;;  %1994 = vst.msk [vmem:[#allocation3 + $0x168] sm:$0x1] %vm1924_vm2, %v3951_v35 }
 0x2d8   :  { %1995 = vst.msk [vmem:[#allocation3 + $0x180] sm:$0x1] %vm1924_vm2, %v3951_v35  ;;  %1996 = vst.msk [vmem:[#allocation3 + $0x198] sm:$0x1] %vm1924_vm2, %v3951_v35 }
 0x2d9   :  { %1979 = vst.msk [vmem:[#allocation3] sm:$0x1] %vm1924_vm2, %v3951_v35  ;;  %1988 = vst.msk [vmem:[#allocation3 + $0xd8] sm:$0x1] %vm1924_vm2, %v3951_v35  ;;  %v1577_v35 = vsel %vm1257_vm1, %v1485_v18, 0.0  ;;  %v1581_v18 = vsel %vm1257_vm1, %v1487_v20, 0.0 }
 0x2da   :  { %7587 = vst [vmem:[#allocation11_spill] sm:$0xff] %v5918_v13  ;;  %7589 = vst [vmem:[#allocation15_spill] sm:$0xff] %v5925_v19  ;;  %v1578_v56 = vadd.f32 %v1577_v35, %v1576_v52  ;;  %v7594_v35 = vld [vmem:[#allocation24_spill] sm:$0xff]  ;;  %v1490_v13 = vmul.f32 %v5932_v39, %v5932_v39  ;;  %v1491_v19 = vmul.f32 %v5939_v3, %v5939_v3  ;;  %v1585_v20 = vsel %vm1257_vm1, %v1489_v23, 0.0 }
 0x2db   :  { %7591 = vst [vmem:[#allocation10_spill] sm:$0xff] %v5932_v39  ;;  %7593 = vst [vmem:[#allocation14_spill] sm:$0xff] %v5939_v3  ;;  %v5946_v42 = vsub.f32 %v7594_v35, %v5610_v58 }
 0x2dc   :  { %v1580_v57 = vadd.f32 %v1579_v10, %v1578_v56  ;;  %v7596_v10 = vld [vmem:[#allocation19_spill] sm:$0xff]  ;;  %v1587_v61 = vsel %vm1257_vm1, %v1490_v13, 0.0  ;;  %v1589_v23 = vsel %vm1257_vm1, %v1491_v19, 0.0 }
 0x2dd   :  { %7595 = vst [vmem:[#allocation24_spill] sm:$0xff] %v5946_v42  ;;  %v5953_v1 = vsub.f32 %v7596_v10, %v5610_v58  ;;  %v1492_v39 = vmul.f32 %v5946_v42, %v5946_v42 }
 0x2de   :  { %v1582_v52 = vadd.f32 %v1581_v18, %v1580_v57  ;;  %v7598_v18 = vld [vmem:[#allocation23_spill] sm:$0xff] }
 0x2df   :  { %7597 = vst [vmem:[#allocation19_spill] sm:$0xff] %v5953_v1  ;;  %v5960_v35 = vsub.f32 %v7598_v18, %v5610_v58  ;;  %v1493_v3 = vmul.f32 %v5953_v1, %v5953_v1  ;;  %v1591_v13 = vsel %vm1257_vm1, %v1492_v39, 0.0 }
 0x2e0   :  { %v1584_v56 = vadd.f32 %v1583_v21, %v1582_v52  ;;  %v7600_v21 = vld [vmem:[#allocation18_spill] sm:$0xff] }
 0x2e1   :  { %7599 = vst [vmem:[#allocation23_spill] sm:$0xff] %v5960_v35  ;;  %v5967_v10 = vsub.f32 %v7600_v21, %v5610_v58  ;;  %v1494_v42 = vmul.f32 %v5960_v35, %v5960_v35  ;;  %v1593_v19 = vsel %vm1257_vm1, %v1493_v3, 0.0 }
 0x2e2   :  { %v1586_v57 = vadd.f32 %v1585_v20, %v1584_v56  ;;  %v7602_v20 = vld [vmem:[#allocation26_spill] sm:$0xff] }
 0x2e3   :  { %7601 = vst [vmem:[#allocation18_spill] sm:$0xff] %v5967_v10  ;;  %v5974_v18 = vsub.f32 %v7602_v20, %v5610_v58  ;;  %v1495_v1 = vmul.f32 %v5967_v10, %v5967_v10  ;;  %v1595_v39 = vsel %vm1257_vm1, %v1494_v42, 0.0 }
 0x2e4   :  { %v1588_v52 = vadd.f32 %v1587_v61, %v1586_v57  ;;  %v7604_v61 = vld [vmem:[#allocation28_spill] sm:$0xff] }
 0x2e5   :  { %7603 = vst [vmem:[#allocation26_spill] sm:$0xff] %v5974_v18  ;;  %v5981_v21 = vsub.f32 %v7604_v61, %v5610_v58  ;;  %v1496_v35 = vmul.f32 %v5974_v18, %v5974_v18  ;;  %v1597_v3 = vsel %vm1257_vm1, %v1495_v1, 0.0 }
 0x2e6   :  { %v1590_v56 = vadd.f32 %v1589_v23, %v1588_v52  ;;  %v7606_v23 = vld [vmem:[#allocation25_spill] sm:$0xff] }
 0x2e7   :  { %7605 = vst [vmem:[#allocation28_spill] sm:$0xff] %v5981_v21  ;;  %v5988_v20 = vsub.f32 %v7606_v23, %v5610_v58  ;;  %v1497_v10 = vmul.f32 %v5981_v21, %v5981_v21  ;;  %v1599_v42 = vsel %vm1257_vm1, %v1496_v35, 0.0  ;;  %v7611_v21 = vld [vmem:[#allocation8_spill] sm:$0xff] }
 0x2e8   :  { %v1592_v57 = vadd.f32 %v1591_v13, %v1590_v56  ;;  %v7608_v13 = vld [vmem:[#allocation27_spill] sm:$0xff]  ;;  %v6012_v1 = vsub.f32 %v7611_v21, %v5610_v58 }
 0x2e9   :  { %7607 = vst [vmem:[#allocation25_spill] sm:$0xff] %v5988_v20  ;;  %v5995_v61 = vsub.f32 %v7608_v13, %v5610_v58  ;;  %v1498_v18 = vmul.f32 %v5988_v20, %v5988_v20  ;;  %v1601_v13 = vsel %vm1257_vm1, %v1497_v10, 0.0  ;;  %v7612_v20 = vld [vmem:[#allocation12_spill] sm:$0xff] }
 0x2ea   :  { %v1594_v52 = vadd.f32 %v1593_v19, %v1592_v57  ;;  %v7609_v19 = vld [vmem:[#allocation9_spill] sm:$0xff]  ;;  %v6019_v35 = vsub.f32 %v7612_v20, %v5610_v58  ;;  %v1502_v21 = vmul.f32 %v6012_v1, %v6012_v1  ;;  %v1504_v20 = vmul.f32 %v5616_v17, %v5616_v17 }
 0x2eb   :  { %v6002_v23 = vsub.f32 %v7609_v19, %v5610_v58 }
 0x2ec   :  { %v1596_v56 = vadd.f32 %v1595_v39, %v1594_v52  ;;  %v1499_v39 = vmul.f32 %v5995_v61, %v5995_v61 }
 0x2ed   :  { %7610 = vst [vmem:[#allocation27_spill] sm:$0xff] %v6002_v23 }
 0x2ee   :  { %v1598_v57 = vadd.f32 %v1597_v3, %v1596_v56  ;;  %v1500_v56 = vmul.f32 %v6002_v23, %v6002_v23  ;;  %v1603_v3 = vsel %vm1257_vm1, %v1498_v18, 0.0  ;;  %v1605_v10 = vsel %vm1257_vm1, %v1499_v39, 0.0 }
 0x2ef   :  { %v1503_v18 = vmul.f32 %v6019_v35, %v6019_v35  ;;  %v1505_v39 = vmul.f32 %v5619_v16, %v5619_v16 }
 0x2f0   :  { %v1600_v52 = vadd.f32 %v1599_v42, %v1598_v57  ;;  %v1501_v57 = vmul.f32 %v5613_v43, %v5613_v43  ;;  %v1611_v43 = vsel %vm1257_vm1, %v1502_v21, 0.0 }
 0x2f2   :  { %v1602_v34 = vadd.f32 %v1601_v13, %v1600_v52  ;;  %v1607_v52 = vsel %vm1257_vm1, %v1500_v56, 0.0  ;;  %v1506_v56 = vmul.f32 %v5622_v14, %v5622_v14 }
 0x2f4   :  { %v1604_v19 = vadd.f32 %v1603_v3, %v1602_v34  ;;  %v1609_v34 = vsel %vm1257_vm1, %v1501_v57, 0.0  ;;  %v1507_v57 = vmul.f32 %v5625_v9, %v5625_v9  ;;  %v1619_v21 = vsel %vm1257_vm1, %v1506_v56, 0.0 }
 0x2f5   :  { %v1512_v56 = vmul.f32 %v5640_v47, %v5640_v47 }
 0x2f6   :  { %v1606_v42 = vadd.f32 %v1605_v10, %v1604_v19  ;;  %v1613_v19 = vsel %vm1257_vm1, %v1503_v18, 0.0  ;;  %v1621_v18 = vsel %vm1257_vm1, %v1507_v57, 0.0  ;;  %v1513_v57 = vmul.f32 %v5643_v22, %v5643_v22 }
 0x2f8   :  { %v1608_v13 = vadd.f32 %v1607_v52, %v1606_v42  ;;  %v1615_v42 = vsel %vm1257_vm1, %v1504_v20, 0.0  ;;  %v1510_v20 = vmul.f32 %v5634_v24, %v5634_v24 }
 0x2fa   :  { %v1610_v3 = vadd.f32 %v1609_v34, %v1608_v13  ;;  %v1617_v13 = vsel %vm1257_vm1, %v1505_v39, 0.0  ;;  %v1511_v39 = vmul.f32 %v5637_v36, %v5637_v36 }
 0x2fc   :  { %v1612_v23 = vadd.f32 %v1611_v43, %v1610_v3  ;;  %v1508_v43 = vmul.f32 %v5628_v6, %v5628_v6 }
 0x2fe   :  { %v1614_v10 = vadd.f32 %v1613_v19, %v1612_v23  ;;  %v1509_v23 = vmul.f32 %v5631_v4, %v5631_v4 }
 0x300   :  { %v1616_v52 = vadd.f32 %v1615_v42, %v1614_v10  ;;  %v1623_v10 = vsel %vm1257_vm1, %v1508_v43, 0.0  ;;  %v1514_v43 = vmul.f32 %v5646_v32, %v5646_v32 }
 0x302   :  { %v1618_v34 = vadd.f32 %v1617_v13, %v1616_v52  ;;  %v1625_v52 = vsel %vm1257_vm1, %v1509_v23, 0.0  ;;  %v1453_v23 = vsub.f32 %v5604_v8, %v5610_v58 }
 0x304   :  { %v1620_v3 = vadd.f32 %v1619_v21, %v1618_v34  ;;  %v1627_v34 = vsel %vm1257_vm1, %v1510_v20, 0.0  ;;  %v1633_v20 = vsel %vm1257_vm1, %v1513_v57, 0.0  ;;  %v1519_v57 = vmul.f32 %v5658_v0, %v5658_v0 }
 0x306   :  { %v1622_v19 = vadd.f32 %v1621_v18, %v1620_v3  ;;  %v1629_v3 = vsel %vm1257_vm1, %v1511_v39, 0.0  ;;  %v1635_v39 = vsel %vm1257_vm1, %v1514_v43, 0.0 }
 0x308   :  { %v1624_v42 = vadd.f32 %v1623_v10, %v1622_v19  ;;  %v1631_v19 = vsel %vm1257_vm1, %v1512_v56, 0.0 }
 0x30a   :  { %v1626_v13 = vadd.f32 %v1625_v52, %v1624_v42  ;;  %v1515_v42 = vmul.f32 %v5649_v25, %v5649_v25 }
 0x30c   :  { %v1628_v21 = vadd.f32 %v1627_v34, %v1626_v13  ;;  %v1516_v13 = vmul.f32 %v5652_v45, %v5652_v45 }
 0x30e   :  { %v1630_v18 = vadd.f32 %v1629_v3, %v1628_v21  ;;  %v1517_v21 = vmul.f32 %v1453_v23, %v1453_v23  ;;  %v1637_v3 = vsel %vm1257_vm1, %v1515_v42, 0.0  ;;  %v1639_v58 = vsel %vm1257_vm1, %v1516_v13, 0.0 }
 0x310   :  { %v1632_v10 = vadd.f32 %v1631_v19, %v1630_v18  ;;  %v1518_v18 = vmul.f32 %v5655_v54, %v5655_v54  ;;  %v1641_v19 = vsel %vm1257_vm1, %v1517_v21, 0.0  ;;  %v6085_v21 = vld [vmem:[%s7414_s4] ss:$0 sm:$0xff] }
 0x312   :  { %v1634_v52 = vadd.f32 %v1633_v20, %v1632_v10  ;;  %v1643_v20 = vsel %vm1257_vm1, %v1518_v18, 0.0 }
 0x314   :  { %v1636_v34 = vadd.f32 %v1635_v39, %v1634_v52  ;;  %v1645_v52 = vsel %vm1257_vm1, %v1519_v57, 0.0 }
 0x316   :  { %v1638_v56 = vadd.f32 %v1637_v3, %v1636_v34 }
 0x318   :  { %v1640_v8 = vadd.f32 %v1639_v58, %v1638_v56 }
 0x31a   :  { %v1642_v10 = vadd.f32 %v1641_v19, %v1640_v8 }
 0x31c   :  { %v1644_v43 = vadd.f32 %v1643_v20, %v1642_v10 }
 0x31e   :  { %v1646_v39 = vadd.f32 %v1645_v52, %v1644_v43 }
 0x320   :  { %v1647_v42 = vrot.slane %v1646_v39, 4 }
 0x322   :  { %v1648_v34 = vadd.f32 %v1647_v42, %v1646_v39 }
 0x324   :  { %v1649_v3 = vrot.slane %v1648_v34, 2 }
 0x326   :  { %v1650_v45 = vadd.f32 %v1649_v3, %v1648_v34  ;;  %v7617_v34 = vld [vmem:[#allocation15_spill] sm:$0xff]  ;;  %v7618_v3 = vld [vmem:[#allocation10_spill] sm:$0xff] }
 0x328   :  { %v1651_v54 = vrot.slane %v1650_v45, 1 }
 0x32a   :  { %v1652_v25 = vadd.f32 %v1651_v54, %v1650_v45  ;;  %v6103_v45 = vld [vmem:[%s7415_s5] ss:$0 sm:$0xff] }
 0x32c   :  { %v1653_v13 = vmul.f32 0.001953125, %v1652_v25 }
 0x32e   :  { %v1654_v56 = vadd.f32 1e-05, %v1653_v13 }
 0x330   :  { %3925 = vrsqrt.f32 %v1654_v56  ;;  %v7619_v56 = vld [vmem:[#allocation14_spill] sm:$0xff] }
 0x33d   :  { %v6080_v58 = vpop.eup %3925 }
 0x33e   :  { %v1717_v18 = vmul.f32 %v6080_v58, %v1453_v23  ;;  %v6090_v8 = vmul.f32 %v6080_v58, %v5662_v2  ;;  %v6094_v57 = vmul.f32 %v6080_v58, %v5666_v11  ;;  %v6098_v25 = vmul.f32 %v6080_v58, %v5670_v46 }
 0x33f   :  { %v6107_v54 = vmul.f32 %v6080_v58, %v5674_v60  ;;  %v6111_v2 = vmul.f32 %v6080_v58, %v5682_v51  ;;  %v6115_v11 = vmul.f32 %v6080_v58, %v5688_v53  ;;  %v6119_v46 = vmul.f32 %v6080_v58, %v5696_v31 }
 0x340   :  { %v1787_v23 = vmul.f32 %v6085_v21, %v1717_v18  ;;  %v6124_v19 = vmul.f32 %v6080_v58, %v5703_v50  ;;  %v6128_v60 = vmul.f32 %v6080_v58, %v5710_v62  ;;  %v6132_v51 = vmul.f32 %v6080_v58, %v5717_v27 }
 0x341   :  { %v1666_v53 = vmul.f32 %v6080_v58, %v5724_v26  ;;  %v1667_v31 = vmul.f32 %v6080_v58, %v5731_v38  ;;  %v6140_v10 = vmul.f32 %v6080_v58, %v5738_v48  ;;  %v6144_v50 = vmul.f32 %v6080_v58, %v5745_v37 }
 0x342   :  { %v1857_v62 = vadd.f32 %v6103_v45, %v1787_v23  ;;  %v1670_v27 = vmul.f32 %v6080_v58, %v5752_v40  ;;  %v1671_v20 = vmul.f32 %v6080_v58, %v5759_v29  ;;  %v6153_v26 = vmul.f32 %v6080_v58, %v5766_v55  ;;  %v7621_v23 = vld [vmem:[#allocation24_spill] sm:$0xff] }
 0x343   :  { %v6157_v38 = vmul.f32 %v6080_v58, %v5773_v15  ;;  %v6161_v48 = vmul.f32 %v6080_v58, %v5780_v12  ;;  %v6165_v37 = vmul.f32 %v6080_v58, %v5787_v44  ;;  %v6169_v40 = vmul.f32 %v6080_v58, %v5794_v28 }
 0x344   :  { %v1921_v29 = vmax.f32 %v1857_v62, 0.0  ;;  %v6173_v55 = vmul.f32 %v6080_v58, %v5801_v33  ;;  %v6177_v15 = vmul.f32 %v6080_v58, %v5808_v63  ;;  %v6181_v12 = vmul.f32 %v6080_v58, %v5815_v49 }
 0x345   :  { %v6185_v44 = vmul.f32 %v6080_v58, %v5822_v59  ;;  %v6189_v28 = vmul.f32 %v6080_v58, %v5829_v7  ;;  %v6193_v33 = vmul.f32 %v6080_v58, %v5836_v41  ;;  %v6197_v63 = vmul.f32 %v6080_v58, %v5843_v5  ;;  %v7613_v59 = vld [vmem:[#allocation21_spill] sm:$0xff]  ;;  %v7615_v41 = vld [vmem:[#allocation22_spill] sm:$0xff]  ;;  %v7616_v5 = vld [vmem:[#allocation11_spill] sm:$0xff] }
 0x346   :  { %1972 = vst.msk [vmem:[#allocation2 + $0x171] sm:$0xff] %vm1257_vm1, %v1921_v29  ;;  %v6202_v49 = vmul.f32 %v6080_v58, %v5850_v30  ;;  %v6206_v43 = vmul.f32 %v6080_v58, %v7613_v59  ;;  %v7614_v7 = vld [vmem:[#allocation29_spill] sm:$0xff]  ;;  %v6214_v39 = vmul.f32 %v6080_v58, %v7615_v41  ;;  %v6218_v42 = vmul.f32 %v6080_v58, %v7616_v5  ;;  %v7623_v29 = vld [vmem:[#allocation19_spill] sm:$0xff]  ;;  %v7627_v5 = vld [vmem:[#allocation18_spill] sm:$0xff] }
 0x347   :  { %v6210_v52 = vmul.f32 %v6080_v58, %v7614_v7  ;;  %v6222_v30 = vmul.f32 %v6080_v58, %v7617_v34  ;;  %v6226_v13 = vmul.f32 %v6080_v58, %v7618_v3  ;;  %v6230_v18 = vmul.f32 %v6080_v58, %v7619_v56  ;;  %v7625_v7 = vld [vmem:[#allocation23_spill] sm:$0xff]  ;;  %v3899_v3 = vld [vmem:[%s7416_s6 + $0x78] sm:$0xff]   ;;  %v7629_v56 = vld [vmem:[#allocation26_spill] sm:$0xff] }
 0x348   :  { %v6234_v62 = vmul.f32 %v6080_v58, %v7621_v23  ;;  %v6238_v59 = vmul.f32 %v6080_v58, %v7623_v29  ;;  %v6242_v41 = vmul.f32 %v6080_v58, %v7625_v7  ;;  %v6246_v34 = vmul.f32 %v6080_v58, %v7627_v5  ;;  %3664 = vmatprep.subr.bf16.mxu0 %v3899_v3 }
 0x349   :  { %7620 = vst [vmem:[#allocation9_spill] sm:$0xff] %v6230_v18  ;;  %v6253_v23 = vmul.f32 %v6080_v58, %v7629_v56  ;;  %v6265_v5 = vmul.f32 %v6080_v58, %v5995_v61  ;;  %v7633_v18 = vld [vmem:[#allocation13_spill] sm:$0xff]  ;;  %v6285_v61 = vmul.f32 %v6080_v58, %v5616_v17  ;;  %3872 = vmatprep.subr.bf16.mxu1 %v3899_v3  ;;  %v7638_v3 = vld [vmem:[#allocation16_spill] sm:$0xff] }
 0x34a   :  { %7622 = vst [vmem:[#allocation8_spill] sm:$0xff] %v6234_v62  ;;  %7624 = vst [vmem:[#allocation12_spill] sm:$0xff] %v6238_v59  ;;  %v7630_v62 = vld [vmem:[#allocation28_spill] sm:$0xff]  ;;  %v7631_v59 = vld [vmem:[#allocation25_spill] sm:$0xff]  ;;  %v6273_v56 = vmul.f32 %v6080_v58, %v7633_v18  ;;  %v6293_v18 = vmul.f32 %v6080_v58, %v5622_v14  ;;  %v6305_v17 = vmul.f32 %v6080_v58, %v5631_v4 }
 0x34b   :  { %7626 = vst [vmem:[#allocation21_spill] sm:$0xff] %v6242_v41  ;;  %7628 = vst [vmem:[#allocation29_spill] sm:$0xff] %v6246_v34  ;;  %v6257_v29 = vmul.f32 %v6080_v58, %v7630_v62  ;;  %v6261_v7 = vmul.f32 %v6080_v58, %v7631_v59  ;;  %v7632_v34 = vld [vmem:[#allocation27_spill] sm:$0xff]  ;;  %v6277_v62 = vmul.f32 %v6080_v58, %v6012_v1 }
 0x34c   :  { %v6269_v41 = vmul.f32 %v6080_v58, %v7632_v34  ;;  %v6281_v59 = vmul.f32 %v6080_v58, %v6019_v35  ;;  %v6289_v34 = vmul.f32 %v6080_v58, %v5619_v16  ;;  %v6297_v1 = vmul.f32 %v6080_v58, %v5625_v9  ;;  %7634 = vst [vmem:[#allocation22_spill] sm:$0xff] %v6305_v17  ;;  %v3900_v9 = vld [vmem:[%s7416_s6 + $0x38] sm:$0xff]   ;;  %v7641_v17 = vld [vmem:[#allocation20_spill] sm:$0xff] }
 0x34d   :  { %v6301_v35 = vmul.f32 %v6080_v58, %v5628_v6  ;;  %v6309_v16 = vmul.f32 %v6080_v58, %v5634_v24  ;;  %v6313_v14 = vmul.f32 %v6080_v58, %v5637_v36  ;;  %v6320_v6 = vmul.f32 %v6080_v58, %v5640_v47  ;;  %3665 = vmatpush3.bf16.msra.mxu0 %v3900_v9 }
 0x34e   :  { %v6324_v4 = vmul.f32 %v6080_v58, %v5643_v22  ;;  %v6328_v24 = vmul.f32 %v6080_v58, %v5646_v32  ;;  %v6332_v36 = vmul.f32 %v6080_v58, %v7638_v3  ;;  %v6340_v47 = vmul.f32 %v6080_v58, %v7641_v17  ;;  %3880 = vmatpush3.bf16.msra.mxu1 %v3900_v9 }
 0x34f   :  { %7635 = vst [vmem:[#allocation11_spill] sm:$0xff] %v6309_v16  ;;  %7636 = vst [vmem:[#allocation15_spill] sm:$0xff] %v6313_v14  ;;  %v7640_v14 = vld [vmem:[#allocation17_spill] sm:$0xff]  ;;  %v6344_v22 = vmul.f32 %v6080_v58, %v5658_v0  ;;  %v1737_v32 = vmul.f32 %v6085_v21, %v1667_v31  ;;  %v1740_v3 = vmul.f32 %v6085_v21, %v1670_v27 }
 0x350   :  { %7637 = vst [vmem:[#allocation10_spill] sm:$0xff] %v6324_v4  ;;  %7639 = vst [vmem:[#allocation14_spill] sm:$0xff] %v6332_v36  ;;  %v6336_v16 = vmul.f32 %v6080_v58, %v7640_v14  ;;  %v1736_v4 = vmul.f32 %v6085_v21, %v1666_v53  ;;  %v1741_v36 = vmul.f32 %v6085_v21, %v1671_v20 }
 0x351   :  { %v6352_v14 = vmul.f32 %v6085_v21, %v6090_v8  ;;  %v6357_v0 = vmul.f32 %v6085_v21, %v6094_v57  ;;  %v6361_v58 = vmul.f32 %v6085_v21, %v6098_v25  ;;  %v6365_v53 = vmul.f32 %v6085_v21, %v6107_v54 }
 0x352   :  { %v1806_v17 = vadd.f32 %v6103_v45, %v1736_v4  ;;  %v1807_v31 = vadd.f32 %v6103_v45, %v1737_v32  ;;  %v1810_v8 = vadd.f32 %v6103_v45, %v1740_v3  ;;  %v1811_v27 = vadd.f32 %v6103_v45, %v1741_v36 }
 0x353   :  { %v6372_v20 = vmul.f32 %v6085_v21, %v6111_v2  ;;  %v6376_v9 = vmul.f32 %v6085_v21, %v6115_v11  ;;  %v6380_v25 = vmul.f32 %v6085_v21, %v6119_v46  ;;  %v6384_v54 = vmul.f32 %v6085_v21, %v6124_v19 }
 0x354   :  { %v1870_v57 = vmax.f32 %v1806_v17, 0.0  ;;  %v1871_v4 = vmax.f32 %v1807_v31, 0.0  ;;  %v1874_v32 = vmax.f32 %v1810_v8, 0.0  ;;  %v1875_v36 = vmax.f32 %v1811_v27, 0.0  ;;  %v7642_v17 = vld [vmem:[#allocation9_spill] sm:$0xff]  ;;  %v7643_v31 = vld [vmem:[#allocation8_spill] sm:$0xff] }
 0x355   :  { %v6388_v2 = vmul.f32 %v6085_v21, %v6128_v60  ;;  %v6393_v11 = vmul.f32 %v6085_v21, %v6132_v51  ;;  %v6397_v46 = vmul.f32 %v6085_v21, %v6140_v10  ;;  %v6401_v19 = vmul.f32 %v6085_v21, %v6144_v50  ;;  %v3902_v8 = vld [vmem:[%s7416_s6 + $0x30] sm:$0xff]  }
 0x356   :  { %2002 = vst.msk [vmem:[#allocation3 + $0x49] sm:$0xff] %vm1257_vm1, %v1870_v57  ;;  %v6405_v3 = vmul.f32 %v6085_v21, %v6153_v26  ;;  %2003 = vst.msk [vmem:[#allocation3 + $0x51] sm:$0xff] %vm1257_vm1, %v1871_v4  ;;  %v6412_v60 = vmul.f32 %v6085_v21, %v6157_v38  ;;  %v6416_v51 = vmul.f32 %v6085_v21, %v6161_v48  ;;  %v7644_v27 = vld [vmem:[#allocation12_spill] sm:$0xff]  ;;  %v7645_v57 = vld [vmem:[#allocation21_spill] sm:$0xff] }
 0x357   :  { %2004 = vst.msk [vmem:[#allocation3 + $0x61] sm:$0xff] %vm1257_vm1, %v1874_v32  ;;  %2005 = vst.msk [vmem:[#allocation3 + $0x69] sm:$0xff] %vm1257_vm1, %v1875_v36  ;;  %v6420_v10 = vmul.f32 %v6085_v21, %v6165_v37  ;;  %v6424_v50 = vmul.f32 %v6085_v21, %v6169_v40  ;;  %v6428_v26 = vmul.f32 %v6085_v21, %v6173_v55  ;;  %v7646_v4 = vld [vmem:[#allocation29_spill] sm:$0xff] }
 0x358   :  { %v6432_v38 = vmul.f32 %v6085_v21, %v6177_v15  ;;  %v6436_v48 = vmul.f32 %v6085_v21, %v6181_v12  ;;  %v6440_v37 = vmul.f32 %v6085_v21, %v6185_v44  ;;  %v6444_v40 = vmul.f32 %v6085_v21, %v6189_v28 }
 0x359   :  { %v6448_v55 = vmul.f32 %v6085_v21, %v6193_v33  ;;  %v6452_v15 = vmul.f32 %v6085_v21, %v6197_v63  ;;  %v6456_v12 = vmul.f32 %v6085_v21, %v6202_v49  ;;  %v6460_v44 = vmul.f32 %v6085_v21, %v6206_v43  ;;  %v3901_v49 = vld [vmem:[%s7416_s6 + $0x70] sm:$0xff]  }
 0x35a   :  { %v6464_v28 = vmul.f32 %v6085_v21, %v6210_v52  ;;  %v6468_v33 = vmul.f32 %v6085_v21, %v6214_v39  ;;  %v6472_v63 = vmul.f32 %v6085_v21, %v6218_v42  ;;  %v6479_v43 = vmul.f32 %v6085_v21, %v6222_v30  ;;  %3666 = vmatprep.subr.bf16.mxu0 %v3901_v49 }
 0x35b   :  { %v6483_v52 = vmul.f32 %v6085_v21, %v6226_v13  ;;  %v6487_v39 = vmul.f32 %v6085_v21, %v7642_v17  ;;  %v6491_v42 = vmul.f32 %v6085_v21, %v7643_v31  ;;  %v6498_v30 = vmul.f32 %v6085_v21, %v7644_v27  ;;  %v3903_v17 = vld [vmem:[%s7416_s6 + $0x68] sm:$0xff]   ;;  %3873 = vmatprep.subr.bf16.mxu1 %v3901_v49 }
 0x35c   :  { %v6502_v13 = vmul.f32 %v6085_v21, %v7645_v57  ;;  %v6506_v32 = vmul.f32 %v6085_v21, %v7646_v4  ;;  %v6510_v36 = vmul.f32 %v6085_v21, %v6253_v23  ;;  %v6517_v31 = vmul.f32 %v6085_v21, %v6257_v29  ;;  %3667 = vmatpush3.bf16.msra.mxu0 %v3902_v8 }
 0x35d   :  { %v6521_v27 = vmul.f32 %v6085_v21, %v6261_v7  ;;  %v6525_v57 = vmul.f32 %v6085_v21, %v6265_v5  ;;  %v6529_v23 = vmul.f32 %v6085_v21, %v6269_v41  ;;  %v2272_v4 = vld [vmem:[#allocation3 + $0x48] ss:$2 sm:$0xff]  ;;  %v6537_v29 = vmul.f32 %v6085_v21, %v6277_v62  ;;  %3881 = vmatpush3.bf16.msra.mxu1 %v3902_v8  ;;  %v3905_v8 = vld [vmem:[%s7416_s6 + $0x60] sm:$0xff]  }
 0x35e   :  { %7647 = vst [vmem:[#allocation24_spill] sm:$0xff] %v6506_v32  ;;  %7648 = vst [vmem:[#allocation19_spill] sm:$0xff] %v6510_v36  ;;  %v2274_v36 = vld [vmem:[#allocation3 + $0x60] ss:$2 sm:$0xff]  ;;  %v6533_v32 = vmul.f32 %v6085_v21, %v6273_v56  ;;  %v6541_v7 = vmul.f32 %v6085_v21, %v6281_v59  ;;  %v6545_v5 = vmul.f32 %v6085_v21, %v6285_v61  ;;  %3874 = vmatprep.subr.bf16.mxu1 %v3903_v17 }
 0x35f   :  { %v2300_v41 = vpack.c.bf16 %v2274_v36, %v2272_v4  ;;  %v6549_v49 = vmul.f32 %v6085_v21, %v6289_v34  ;;  %v6553_v56 = vmul.f32 %v6085_v21, %v6293_v18  ;;  %v6557_v62 = vmul.f32 %v6085_v21, %v6297_v1  ;;  %v3904_v59 = vld [vmem:[%s7416_s6 + $0x28] sm:$0xff]   ;;  %v7650_v36 = vld [vmem:[#allocation22_spill] sm:$0xff]  ;;  %3668 = vmatprep.subr.bf16.mxu0 %v3903_v17 }
 0x360   :  { %v6564_v61 = vmul.f32 %v6085_v21, %v6301_v35  ;;  %v6568_v34 = vmul.f32 %v6085_v21, %v7650_v36  ;;  %v7652_v4 = vld [vmem:[#allocation11_spill] sm:$0xff]  ;;  %v6584_v35 = vmul.f32 %v6085_v21, %v6320_v6  ;;  %v7656_v36 = vld [vmem:[#allocation10_spill] sm:$0xff]  ;;  %v6604_v6 = vmul.f32 %v6085_v21, %v6340_v47  ;;  %3669 = vmatpush3.bf16.msra.mxu0 %v3904_v59 }
 0x361   :  { %7649 = vst [vmem:[#allocation23_spill] sm:$0xff] %v6553_v56  ;;  %v6572_v18 = vmul.f32 %v6085_v21, %v7652_v4  ;;  %v7654_v56 = vld [vmem:[#allocation15_spill] sm:$0xff]  ;;  %2493 = vrot.lane.b32.xlu1 %v2300_v41, %s3952_s30  ;;  %v6588_v4 = vmul.f32 %v6085_v21, %v7656_v36  ;;  %v6608_v41 = vmul.f32 %v6085_v21, %v6344_v22 }
 0x362   :  { %7651 = vst [vmem:[#allocation18_spill] sm:$0xff] %v6568_v34  ;;  %v6576_v1 = vmul.f32 %v6085_v21, %v7654_v56  ;;  %v6592_v56 = vmul.f32 %v6085_v21, %v6328_v24  ;;  %v6600_v34 = vmul.f32 %v6085_v21, %v6336_v16  ;;  %v1804_v24 = vadd.f32 %v6103_v45, %v6388_v2 }
 0x363   :  { %7653 = vst [vmem:[#allocation26_spill] sm:$0xff] %v6572_v18  ;;  %v1808_v36 = vadd.f32 %v6103_v45, %v6397_v46  ;;  %v1809_v16 = vadd.f32 %v6103_v45, %v6401_v19  ;;  %v6620_v47 = vadd.f32 %v6103_v45, %v6352_v14  ;;  %3882 = vmatpush3.bf16.msra.mxu1 %v3904_v59  ;;  %v3907_v14 = vld [vmem:[%s7416_s6 + $0x58] sm:$0xff]  }
 0x364   :  { %7655 = vst [vmem:[#allocation28_spill] sm:$0xff] %v6576_v1  ;;  %v7657_v1 = vld [vmem:[#allocation14_spill] sm:$0xff]  ;;  %v1868_v22 = vmax.f32 %v1804_v24, 0.0  ;;  %v6627_v2 = vadd.f32 %v6103_v45, %v6357_v0  ;;  %v6635_v46 = vadd.f32 %v6103_v45, %v6365_v53  ;;  %3875 = vmatprep.subr.bf16.mxu1 %v3905_v8  ;;  %v6642_v0 = vadd.f32 %v6103_v45, %v6372_v20 }
 0x365   :  { %v6596_v18 = vmul.f32 %v6085_v21, %v7657_v1  ;;  %v1805_v1 = vadd.f32 %v6103_v45, %v6393_v11  ;;  %v3906_v21 = vld [vmem:[%s7416_s6 + $0x20] sm:$0xff]   ;;  %v6631_v11 = vadd.f32 %v6103_v45, %v6361_v58  ;;  %v1872_v17 = vmax.f32 %v1808_v36, 0.0  ;;  %3670 = vmatprep.subr.bf16.mxu0 %v3905_v8  ;;  %v3909_v8 = vld [vmem:[%s7416_s6 + $0x50] sm:$0xff]  }
 0x366   :  { %v1873_v24 = vmax.f32 %v1809_v16, 0.0  ;;  %1945 = vst.msk [vmem:[#allocation2 + $0x31] sm:$0xff] %vm1257_vm1, %v1868_v22  ;;  %v6647_v58 = vadd.f32 %v6103_v45, %v6376_v9  ;;  %v6651_v53 = vadd.f32 %v6103_v45, %v6380_v25  ;;  %v6655_v59 = vadd.f32 %v6103_v45, %v6384_v54  ;;  %3671 = vmatpush3.bf16.msra.mxu0 %v3906_v21  ;;  %v7658_v16 = vld [vmem:[#allocation24_spill] sm:$0xff]  ;;  %v3911_v22 = vld [vmem:[%s7416_s6 + $0x48] sm:$0xff]  }
 0x367   :  { %v1869_v19 = vmax.f32 %v1805_v1, 0.0  ;;  %v6659_v1 = vadd.f32 %v6103_v45, %v6405_v3  ;;  %1947 = vst.msk [vmem:[#allocation2 + $0x49] sm:$0xff] %vm1257_vm1, %v1872_v17  ;;  %v6666_v20 = vadd.f32 %v6103_v45, %v6412_v60  ;;  %v6670_v9 = vadd.f32 %v6103_v45, %v6416_v51  ;;  %3883 = vmatpush3.bf16.msra.mxu1 %v3906_v21  ;;  %v3908_v3 = vld [vmem:[%s7416_s6 + $0x18] sm:$0xff]   ;;  %v7659_v21 = vld [vmem:[#allocation19_spill] sm:$0xff] }
 0x368   :  { %1948 = vst.msk [vmem:[#allocation2 + $0x51] sm:$0xff] %vm1257_vm1, %v1873_v24  ;;  %v6674_v25 = vadd.f32 %v6103_v45, %v6420_v10  ;;  %v6678_v54 = vadd.f32 %v6103_v45, %v6424_v50  ;;  %v6685_v60 = vadd.f32 %v6103_v45, %v6428_v26  ;;  %v6689_v51 = vadd.f32 %v6103_v45, %v6432_v38 }
 0x369   :  { %1946 = vst.msk [vmem:[#allocation2 + $0x39] sm:$0xff] %vm1257_vm1, %v1869_v19  ;;  %v6693_v10 = vadd.f32 %v6103_v45, %v6436_v48  ;;  %v6697_v50 = vadd.f32 %v6103_v45, %v6440_v37  ;;  %3876 = vmatprep.subr.bf16.mxu1 %v3907_v14  ;;  %v6704_v26 = vadd.f32 %v6103_v45, %v6444_v40 }
 0x36a   :  { %v6708_v38 = vadd.f32 %v6103_v45, %v6448_v55  ;;  %v6712_v48 = vadd.f32 %v6103_v45, %v6452_v15  ;;  %v6716_v37 = vadd.f32 %v6103_v45, %v6456_v12  ;;  %v6720_v36 = vadd.f32 %v6103_v45, %v6460_v44  ;;  %3672 = vmatprep.subr.bf16.mxu0 %v3907_v14 }
 0x36b   :  { %v6724_v40 = vadd.f32 %v6103_v45, %v6464_v28  ;;  %v6728_v55 = vadd.f32 %v6103_v45, %v6468_v33  ;;  %v6732_v15 = vadd.f32 %v6103_v45, %v6472_v63  ;;  %v6736_v12 = vadd.f32 %v6103_v45, %v6479_v43  ;;  %3884 = vmatpush3.bf16.msra.mxu1 %v3908_v3  ;;  %v3910_v63 = vld [vmem:[%s7416_s6 + $0x10] sm:$0xff]  }
 0x36c   :  { %v6740_v44 = vadd.f32 %v6103_v45, %v6483_v52  ;;  %v6744_v28 = vadd.f32 %v6103_v45, %v6487_v39  ;;  %v6748_v33 = vadd.f32 %v6103_v45, %v6491_v42  ;;  %v6755_v43 = vadd.f32 %v6103_v45, %v6498_v30  ;;  %3877 = vmatprep.subr.bf16.mxu1 %v3909_v8 }
 0x36d   :  { %v6759_v52 = vadd.f32 %v6103_v45, %v6502_v13  ;;  %v6763_v39 = vadd.f32 %v6103_v45, %v7658_v16  ;;  %v6767_v42 = vadd.f32 %v6103_v45, %v7659_v21  ;;  %v6774_v30 = vadd.f32 %v6103_v45, %v6517_v31  ;;  %3673 = vmatpush3.bf16.msra.mxu0 %v3908_v3 }
 0x36e   :  { %v6778_v13 = vadd.f32 %v6103_v45, %v6521_v27  ;;  %v6782_v14 = vadd.f32 %v6103_v45, %v6525_v57  ;;  %v6786_v19 = vadd.f32 %v6103_v45, %v6529_v23  ;;  %v6790_v16 = vadd.f32 %v6103_v45, %v6533_v32  ;;  %3674 = vmatprep.subr.bf16.mxu0 %v3909_v8  ;;  %v7660_v32 = vld [vmem:[#allocation23_spill] sm:$0xff]  ;;  %v7661_v8 = vld [vmem:[#allocation18_spill] sm:$0xff] }
 0x36f   :  { %v2235_v24 = vld [vmem:[#allocation2 + $0x4a] ss:$2 sm:$0xff]  ;;  %v6794_v31 = vadd.f32 %v6103_v45, %v6537_v29  ;;  %v6798_v27 = vadd.f32 %v6103_v45, %v6541_v7  ;;  %v6802_v57 = vadd.f32 %v6103_v45, %v6545_v5  ;;  %v6806_v3 = vadd.f32 %v6103_v45, %v6549_v49  ;;  %3885 = vmatpush3.bf16.msra.mxu1 %v3910_v63 }
 0x370   :  { %v2233_v17 = vld [vmem:[#allocation2 + $0x32] ss:$2 sm:$0xff]  ;;  %v6810_v21 = vadd.f32 %v6103_v45, %v7660_v32  ;;  %v6814_v29 = vadd.f32 %v6103_v45, %v6557_v62  ;;  %v3912_v7 = vld [vmem:[%s7416_s6 + $0x8] sm:$0xff]   ;;  %v6821_v5 = vadd.f32 %v6103_v45, %v6564_v61  ;;  %v6825_v49 = vadd.f32 %v6103_v45, %v7661_v8  ;;  %3878 = vmatprep.subr.bf16.mxu1 %v3911_v22 }
 0x371   :  { %v2261_v23 = vpack.c.bf16 %v2235_v24, %v2233_v17  ;;  %v7662_v17 = vld [vmem:[#allocation26_spill] sm:$0xff]  ;;  %v7663_v32 = vld [vmem:[#allocation28_spill] sm:$0xff]  ;;  %v6838_v61 = vadd.f32 %v6103_v45, %v6584_v35  ;;  %v6842_v8 = vadd.f32 %v6103_v45, %v6588_v4  ;;  %v6858_v35 = vadd.f32 %v6103_v45, %v6604_v6  ;;  %3675 = vmatpush3.bf16.msra.mxu0 %v3910_v63 }
 0x372   :  { %v6829_v24 = vadd.f32 %v6103_v45, %v7662_v17  ;;  %v6833_v62 = vadd.f32 %v6103_v45, %v7663_v32  ;;  %v6846_v17 = vadd.f32 %v6103_v45, %v6592_v56  ;;  %v6850_v32 = vadd.f32 %v6103_v45, %v6596_v18  ;;  %3676 = vmatprep.subr.bf16.mxu0 %v3911_v22 }
 0x373   :  { %2469 = vrot.lane.b32.xlu0 %v2261_v23, %s3953_s20  ;;  %v6862_v4 = vadd.f32 %v6103_v45, %v6608_v41  ;;  %v1866_v23 = vmax.f32 %v6651_v53, 0.0  ;;  %v1867_v56 = vmax.f32 %v6655_v59, 0.0  ;;  %v1860_v18 = vmax.f32 %v6620_v47, 0.0  ;;  %3886 = vmatpush3.bf16.msra.mxu1 %v3912_v7 }
 0x374   :  { %7664 = vst [vmem:[#allocation25_spill] sm:$0xff] %v6833_v62  ;;  %7665 = vst [vmem:[#allocation27_spill] sm:$0xff] %v6850_v32  ;;  %v6854_v62 = vadd.f32 %v6103_v45, %v6600_v34  ;;  %v1861_v32 = vmax.f32 %v6627_v2, 0.0  ;;  %v1862_v34 = vmax.f32 %v6631_v11, 0.0  ;;  %v1863_v6 = vmax.f32 %v6635_v46, 0.0  ;;  %v3913_v46 = vld [vmem:[%s7416_s6 + $0x40] sm:$0xff]  }
 0x375   :  { %2000 = vst.msk [vmem:[#allocation3 + $0x31] sm:$0xff] %vm1257_vm1, %v1866_v23  ;;  %v1864_v45 = vmax.f32 %v6642_v0, 0.0  ;;  %v1865_v41 = vmax.f32 %v6647_v58, 0.0  ;;  %v1876_v53 = vmax.f32 %v6659_v1, 0.0  ;;  %2001 = vst.msk [vmem:[#allocation3 + $0x39] sm:$0xff] %vm1257_vm1, %v1867_v56  ;;  %v1877_v47 = vmax.f32 %v6666_v20, 0.0  ;;  %3677 = vmatpush3.bf16.msra.mxu0 %v3912_v7  ;;  %3879 = vmatprep.subr.bf16.mxu1 %v3913_v46 }
 0x376   :  { %v1878_v2 = vmax.f32 %v6670_v9, 0.0  ;;  %v1879_v11 = vmax.f32 %v6674_v25, 0.0  ;;  %v1880_v59 = vmax.f32 %v6678_v54, 0.0  ;;  %1941 = vst.msk [vmem:[#allocation2 + $0x1] sm:$0xff] %vm1257_vm1, %v1860_v18  ;;  %1942 = vst.msk [vmem:[#allocation2 + $0x9] sm:$0xff] %vm1257_vm1, %v1861_v32  ;;  %v3914_v0 = vld [vmem:[%s7416_s6] sm:$0xff]   ;;  %3678 = vmatprep.subr.bf16.mxu0 %v3913_v46 }
 0x377   :  { %1998 = vst.msk [vmem:[#allocation3 + $0x19] sm:$0xff] %vm1257_vm1, %v1862_v34  ;;  %v1881_v58 = vmax.f32 %v6685_v60, 0.0  ;;  %v1882_v1 = vmax.f32 %v6689_v51, 0.0  ;;  %v1883_v20 = vmax.f32 %v6693_v10, 0.0  ;;  %v1884_v9 = vmax.f32 %v6697_v50, 0.0  ;;  %1943 = vst.msk [vmem:[#allocation2 + $0x19] sm:$0xff] %vm1257_vm1, %v1864_v45  ;;  %3887 = vmatpush3.bf16.msra.mxu1 %v3914_v0 }
 0x378   :  { %1944 = vst.msk [vmem:[#allocation2 + $0x21] sm:$0xff] %vm1257_vm1, %v1865_v41  ;;  %1949 = vst.msk [vmem:[#allocation2 + $0x61] sm:$0xff] %vm1257_vm1, %v1876_v53  ;;  %v1885_v25 = vmax.f32 %v6704_v26, 0.0  ;;  %v1886_v54 = vmax.f32 %v6708_v38, 0.0  ;;  %v1887_v60 = vmax.f32 %v6712_v48, 0.0  ;;  %v1888_v51 = vmax.f32 %v6716_v37, 0.0 }
 0x379   :  { %1999 = vst.msk [vmem:[#allocation3 + $0x21] sm:$0xff] %vm1257_vm1, %v1863_v6  ;;  %1950 = vst.msk [vmem:[#allocation2 + $0x69] sm:$0xff] %vm1257_vm1, %v1877_v47  ;;  %v1889_v10 = vmax.f32 %v6720_v36, 0.0  ;;  %v1890_v50 = vmax.f32 %v6724_v40, 0.0  ;;  %v1891_v26 = vmax.f32 %v6728_v55, 0.0  ;;  %v1892_v38 = vmax.f32 %v6732_v15, 0.0  ;;  %3679 = vmatpush3.bf16.msra.mxu0 %v3914_v0 }
 0x37a   :  { %1951 = vst.msk [vmem:[#allocation2 + $0x79] sm:$0xff] %vm1257_vm1, %v1880_v59  ;;  %2006 = vst.msk [vmem:[#allocation3 + $0x79] sm:$0xff] %vm1257_vm1, %v1878_v2  ;;  %v1893_v48 = vmax.f32 %v6736_v12, 0.0  ;;  %v1894_v37 = vmax.f32 %v6740_v44, 0.0  ;;  %v1895_v36 = vmax.f32 %v6744_v28, 0.0  ;;  %v1896_v40 = vmax.f32 %v6748_v33, 0.0 }
 0x37b   :  { %2007 = vst.msk [vmem:[#allocation3 + $0x81] sm:$0xff] %vm1257_vm1, %v1879_v11  ;;  %1952 = vst.msk [vmem:[#allocation2 + $0x81] sm:$0xff] %vm1257_vm1, %v1881_v58  ;;  %v2116_v55 = vld [vmem:[#allocation3 + $0x4a] ss:$2 sm:$0xff]  ;;  %v1897_v15 = vmax.f32 %v6755_v43, 0.0  ;;  %v1898_v63 = vmax.f32 %v6759_v52, 0.0 }
 0x37c   :  { %1953 = vst.msk [vmem:[#allocation2 + $0x91] sm:$0xff] %vm1257_vm1, %v1884_v9  ;;  %2008 = vst.msk [vmem:[#allocation3 + $0x91] sm:$0xff] %vm1257_vm1, %v1882_v1  ;;  %v1899_v12 = vmax.f32 %v6763_v39, 0.0  ;;  %v1900_v44 = vmax.f32 %v6767_v42, 0.0  ;;  %v1901_v28 = vmax.f32 %v6774_v30, 0.0  ;;  %v1902_v33 = vmax.f32 %v6778_v13, 0.0 }
 0x37d   :  { %2009 = vst.msk [vmem:[#allocation3 + $0x99] sm:$0xff] %vm1257_vm1, %v1883_v20  ;;  %1954 = vst.msk [vmem:[#allocation2 + $0x99] sm:$0xff] %vm1257_vm1, %v1885_v25  ;;  %v1903_v43 = vmax.f32 %v6782_v14, 0.0  ;;  %v1904_v52 = vmax.f32 %v6786_v19, 0.0  ;;  %v2076_v39 = vld [vmem:[#allocation3 + $0x49] ss:$2 sm:$0xff] }
 0x37e   :  { %1955 = vst.msk [vmem:[#allocation2 + $0xa9] sm:$0xff] %vm1257_vm1, %v1888_v51  ;;  %2010 = vst.msk [vmem:[#allocation3 + $0xa9] sm:$0xff] %vm1257_vm1, %v1886_v54  ;;  %v2114_v42 = vld [vmem:[#allocation3 + $0x32] ss:$2 sm:$0xff]  ;;  %v1905_v22 = vmax.f32 %v6790_v16, 0.0  ;;  %v1906_v30 = vmax.f32 %v6794_v31, 0.0 }
 0x37f   :  { %2011 = vst.msk [vmem:[#allocation3 + $0xb1] sm:$0xff] %vm1257_vm1, %v1887_v60  ;;  %1956 = vst.msk [vmem:[#allocation2 + $0xb1] sm:$0xff] %vm1257_vm1, %v1889_v10  ;;  %v1907_v13 = vmax.f32 %v6798_v27, 0.0  ;;  %v1908_v14 = vmax.f32 %v6802_v57, 0.0  ;;  %v2153_v19 = vld [vmem:[#allocation2 + $0x30] ss:$2 sm:$0xff]  ;;  %v2142_v7 = vpack.c.bf16 %v2116_v55, %v2114_v42 }
 0x380   :  { %1957 = vst.msk [vmem:[#allocation2 + $0xc1] sm:$0xff] %vm1257_vm1, %v1892_v38  ;;  %2012 = vst.msk [vmem:[#allocation3 + $0xc1] sm:$0xff] %vm1257_vm1, %v1890_v50  ;;  %v1909_v32 = vmax.f32 %v6806_v3, 0.0  ;;  %v1910_v16 = vmax.f32 %v6810_v21, 0.0  ;;  %v1911_v31 = vmax.f32 %v6814_v29, 0.0  ;;  %v1912_v27 = vmax.f32 %v6821_v5, 0.0 }
 0x381   :  { %2013 = vst.msk [vmem:[#allocation3 + $0xc9] sm:$0xff] %vm1257_vm1, %v1891_v26  ;;  %1958 = vst.msk [vmem:[#allocation2 + $0xc9] sm:$0xff] %vm1257_vm1, %v1893_v48  ;;  %v2074_v23 = vld [vmem:[#allocation3 + $0x31] ss:$2 sm:$0xff]  ;;  %v1913_v57 = vmax.f32 %v6825_v49, 0.0  ;;  %v1914_v56 = vmax.f32 %v6829_v24, 0.0  ;;  %2421 = vrot.lane.b32.xlu1 %v2142_v7, %s3952_s30 }
 0x382   :  { %1959 = vst.msk [vmem:[#allocation2 + $0xd9] sm:$0xff] %vm1257_vm1, %v1896_v40  ;;  %2014 = vst.msk [vmem:[#allocation3 + $0xf1] sm:$0xff] %vm1257_vm1, %v1894_v37  ;;  %v7666_v3 = vld [vmem:[#allocation25_spill] sm:$0xff]  ;;  %v2155_v21 = vld [vmem:[#allocation2 + $0x48] ss:$2 sm:$0xff]  ;;  %v1916_v29 = vmax.f32 %v6838_v61, 0.0  ;;  %v2102_v53 = vpack.c.bf16 %v2076_v39, %v2074_v23 }
 0x383   :  { %2015 = vst.msk [vmem:[#allocation3 + $0xf9] sm:$0xff] %vm1257_vm1, %v1895_v36  ;;  %1960 = vst.msk [vmem:[#allocation2 + $0xe1] sm:$0xff] %vm1257_vm1, %v1897_v15  ;;  %v1915_v18 = vmax.f32 %v7666_v3, 0.0  ;;  %v1917_v5 = vmax.f32 %v6842_v8, 0.0  ;;  %v1918_v49 = vmax.f32 %v6846_v17, 0.0  ;;  %v7667_v24 = vld [vmem:[#allocation27_spill] sm:$0xff] }
 0x384   :  { %1961 = vst.msk [vmem:[#allocation2 + $0xf1] sm:$0xff] %vm1257_vm1, %v1900_v44  ;;  %2016 = vst.msk [vmem:[#allocation3 + $0x109] sm:$0xff] %vm1257_vm1, %v1898_v63  ;;  %v1919_v34 = vmax.f32 %v7667_v24, 0.0  ;;  %v1920_v6 = vmax.f32 %v6854_v62, 0.0  ;;  %v1922_v45 = vmax.f32 %v6858_v35, 0.0  ;;  %v1923_v41 = vmax.f32 %v6862_v4, 0.0  ;;  %2397 = vrot.lane.b32.xlu0 %v2102_v53, %s3953_s20 }
 0x385   :  { %2017 = vst.msk [vmem:[#allocation3 + $0x111] sm:$0xff] %vm1257_vm1, %v1899_v12  ;;  %1962 = vst.msk [vmem:[#allocation2 + $0xf9] sm:$0xff] %vm1257_vm1, %v1901_v28  ;;  %v2181_v62 = vpack.c.bf16 %v2155_v21, %v2153_v19  ;;  %v2312_v61 = vld [vmem:[#allocation3 + $0x49] ss:$2 sm:$0xff]  ;;  %v2080_v35 = vld [vmem:[#allocation3 + $0x79] ss:$2 sm:$0xff] }
 0x386   :  { %1963 = vst.msk [vmem:[#allocation2 + $0x109] sm:$0xff] %vm1257_vm1, %v1904_v52  ;;  %2018 = vst.msk [vmem:[#allocation3 + $0x121] sm:$0xff] %vm1257_vm1, %v1902_v33  ;;  %v2314_v8 = vld [vmem:[#allocation3 + $0x61] ss:$2 sm:$0xff]  ;;  %v2237_v2 = vld [vmem:[#allocation2 + $0x62] ss:$2 sm:$0xff] }
 0x387   :  { %2019 = vst.msk [vmem:[#allocation3 + $0x129] sm:$0xff] %vm1257_vm1, %v1903_v43  ;;  %1964 = vst.msk [vmem:[#allocation2 + $0x111] sm:$0xff] %vm1257_vm1, %v1905_v22  ;;  %v2078_v17 = vld [vmem:[#allocation3 + $0x61] ss:$2 sm:$0xff]  ;;  %2445 = vrot.lane.b32.xlu1 %v2181_v62, %s3954_s25  ;;  %v2340_v4 = vpack.c.bf16 %v2314_v8, %v2312_v61  ;;  %v2239_v11 = vld [vmem:[#allocation2 + $0x7a] ss:$2 sm:$0xff] }
 0x388   :  { %1965 = vst.msk [vmem:[#allocation2 + $0x121] sm:$0xff] %vm1257_vm1, %v1908_v14  ;;  %2020 = vst.msk [vmem:[#allocation3 + $0x139] sm:$0xff] %vm1257_vm1, %v1906_v30  ;;  %v2103_v47 = vpack.c.bf16 %v2080_v35, %v2078_v17  ;;  %v2118_v59 = vld [vmem:[#allocation3 + $0x62] ss:$2 sm:$0xff]  ;;  %v2262_v0 = vpack.c.bf16 %v2239_v11, %v2237_v2  ;;  %v2316_v51 = vld [vmem:[#allocation3 + $0x79] ss:$2 sm:$0xff] }
 0x389   :  { %2021 = vst.msk [vmem:[#allocation3 + $0x141] sm:$0xff] %vm1257_vm1, %v1907_v13  ;;  %1966 = vst.msk [vmem:[#allocation2 + $0x129] sm:$0xff] %vm1257_vm1, %v1909_v32  ;;  %2517 = vrot.lane.b32.xlu0 %v2340_v4, %s3954_s25  ;;  %v2120_v46 = vld [vmem:[#allocation3 + $0x7a] ss:$2 sm:$0xff]  ;;  %v2318_v10 = vld [vmem:[#allocation3 + $0x91] ss:$2 sm:$0xff] }
 0x38a   :  { %2022 = vst.msk [vmem:[#allocation3 + $0x151] sm:$0xff] %vm1257_vm1, %v1910_v16  ;;  %2023 = vst.msk [vmem:[#allocation3 + $0x159] sm:$0xff] %vm1257_vm1, %v1911_v31  ;;  %v2143_v58 = vpack.c.bf16 %v2120_v46, %v2118_v59  ;;  %v2276_v1 = vld [vmem:[#allocation3 + $0x78] ss:$2 sm:$0xff]  ;;  %v2082_v50 = vld [vmem:[#allocation3 + $0x91] ss:$2 sm:$0xff]  ;;  %v2341_v38 = vpack.c.bf16 %v2318_v10, %v2316_v51 }
 0x38b   :  { %1967 = vst.msk [vmem:[#allocation2 + $0x139] sm:$0xff] %vm1257_vm1, %v1912_v27  ;;  %1968 = vst.msk [vmem:[#allocation2 + $0x141] sm:$0xff] %vm1257_vm1, %v1913_v57  ;;  %2399 = vrot.lane.b32.xlu1 %v2103_v47, %s3953_s20  ;;  %v2278_v20 = vld [vmem:[#allocation3 + $0x90] ss:$2 sm:$0xff]  ;;  %v2157_v9 = vld [vmem:[#allocation2 + $0x60] ss:$2 sm:$0xff] }
 0x38c   :  { %2024 = vst.msk [vmem:[#allocation3 + $0x169] sm:$0xff] %vm1257_vm1, %v1914_v56  ;;  %2025 = vst.msk [vmem:[#allocation3 + $0x171] sm:$0xff] %vm1257_vm1, %v1915_v18  ;;  %v2159_v25 = vld [vmem:[#allocation2 + $0x78] ss:$2 sm:$0xff]  ;;  %v2301_v54 = vpack.c.bf16 %v2278_v20, %v2276_v1  ;;  %v2084_v26 = vld [vmem:[#allocation3 + $0xa9] ss:$2 sm:$0xff] }
 0x38d   :  { %1969 = vst.msk [vmem:[#allocation2 + $0x151] sm:$0xff] %vm1257_vm1, %v1916_v29  ;;  %1970 = vst.msk [vmem:[#allocation2 + $0x159] sm:$0xff] %vm1257_vm1, %v1917_v5  ;;  %2471 = vrot.lane.b32.xlu0 %v2262_v0, %s3953_s20  ;;  %v2182_v60 = vpack.c.bf16 %v2159_v25, %v2157_v9  ;;  %v2104_v48 = vpack.c.bf16 %v2084_v26, %v2082_v50  ;;  %v2241_v37 = vld [vmem:[#allocation2 + $0x92] ss:$2 sm:$0xff]  ;;  %v2320_v39 = vld [vmem:[#allocation3 + $0xa9] ss:$2 sm:$0xff] }
 0x38e   :  { %2026 = vst.msk [vmem:[#allocation3 + $0x181] sm:$0xff] %vm1257_vm1, %v1918_v49  ;;  %2027 = vst.msk [vmem:[#allocation3 + $0x189] sm:$0xff] %vm1257_vm1, %v1919_v34  ;;  %v2243_v36 = vld [vmem:[#allocation2 + $0xaa] ss:$2 sm:$0xff]  ;;  %v2322_v42 = vld [vmem:[#allocation3 + $0xc1] ss:$2 sm:$0xff] }
 0x38f   :  { %1971 = vst.msk [vmem:[#allocation2 + $0x169] sm:$0xff] %vm1257_vm1, %v1920_v6  ;;  %2028 = vst.msk [vmem:[#allocation3 + $0x199] sm:$0xff] %vm1257_vm1, %v1922_v45  ;;  %2423 = vrot.lane.b32.xlu1 %v2143_v58, %s3952_s30  ;;  %v2122_v40 = vld [vmem:[#allocation3 + $0x92] ss:$2 sm:$0xff]  ;;  %v2263_v15 = vpack.c.bf16 %v2243_v36, %v2241_v37  ;;  %v2086_v22 = vld [vmem:[#allocation3 + $0xd9] ss:$2 sm:$0xff]  ;;  %v2342_v14 = vpack.c.bf16 %v2322_v42, %v2320_v39 }
 0x390   :  { %2029 = vst.msk [vmem:[#allocation3 + $0x1a1] sm:$0xff] %vm1257_vm1, %v1923_v41  ;;  %v2124_v55 = vld [vmem:[#allocation3 + $0xaa] ss:$2 sm:$0xff]  ;;  %v2088_v30 = vld [vmem:[#allocation3 + $0xf1] ss:$2 sm:$0xff] }
 0x391   :  { %2495 = vrot.lane.b32.xlu0 %v2301_v54, %s3952_s30  ;;  %v2144_v63 = vpack.c.bf16 %v2124_v55, %v2122_v40  ;;  %v2280_v12 = vld [vmem:[#allocation3 + $0xa8] ss:$2 sm:$0xff]  ;;  %v2105_v19 = vpack.c.bf16 %v2088_v30, %v2086_v22  ;;  %v2167_v18 = vld [vmem:[#allocation2 + $0xd8] ss:$2 sm:$0xff]  ;;  %v2324_v5 = vld [vmem:[#allocation3 + $0xf1] ss:$2 sm:$0xff] }
 0x392   :  { %v2282_v44 = vld [vmem:[#allocation3 + $0xc0] ss:$2 sm:$0xff]  ;;  %v2161_v28 = vld [vmem:[#allocation2 + $0x90] ss:$2 sm:$0xff]  ;;  %v2326_v49 = vld [vmem:[#allocation3 + $0x109] ss:$2 sm:$0xff] }
 0x393   :  { %2447 = vrot.lane.b32.xlu1 %v2182_v60, %s3954_s25  ;;  %v2163_v33 = vld [vmem:[#allocation2 + $0xa8] ss:$2 sm:$0xff]  ;;  %v2302_v43 = vpack.c.bf16 %v2282_v44, %v2280_v12  ;;  %v2090_v24 = vld [vmem:[#allocation3 + $0x109] ss:$2 sm:$0xff]  ;;  %v2343_v6 = vpack.c.bf16 %v2326_v49, %v2324_v5  ;;  %v2290_v4 = vld [vmem:[#allocation3 + $0x138] ss:$2 sm:$0xff] }
 0x394   :  { %v2183_v52 = vpack.c.bf16 %v2163_v33, %v2161_v28  ;;  %v6997_v13 = vld [vmem:[%s7416_s6 + $0x88] sm:$0xff]   ;;  %v2128_v31 = vld [vmem:[#allocation3 + $0xf2] ss:$2 sm:$0xff]  ;;  %v2330_v0 = vld [vmem:[#allocation3 + $0x139] ss:$2 sm:$0xff] }
 0x395   :  { %2519 = vrot.lane.b32.xlu0 %v2341_v38, %s3954_s25  ;;  %3824 = vmatprep.subr.bf16.mxu1 %v6997_v13  ;;  %v2245_v7 = vld [vmem:[#allocation2 + $0xc2] ss:$2 sm:$0xff]  ;;  %v2092_v34 = vld [vmem:[#allocation3 + $0x121] ss:$2 sm:$0xff]  ;;  %v2249_v41 = vld [vmem:[#allocation2 + $0xf2] ss:$2 sm:$0xff] }
 0x396   :  { %v2247_v32 = vld [vmem:[#allocation2 + $0xda] ss:$2 sm:$0xff]  ;;  %v2106_v45 = vpack.c.bf16 %v2092_v34, %v2090_v24  ;;  %v2251_v53 = vld [vmem:[#allocation2 + $0x10a] ss:$2 sm:$0xff]  ;;  %v2328_v46 = vld [vmem:[#allocation3 + $0x121] ss:$2 sm:$0xff] }
 0x397   :  { %2401 = vrot.lane.b32.xlu1 %v2104_v48, %s3953_s20  ;;  %v2126_v16 = vld [vmem:[#allocation3 + $0xda] ss:$2 sm:$0xff]  ;;  %v2264_v23 = vpack.c.bf16 %v2247_v32, %v2245_v7  ;;  %v2130_v62 = vld [vmem:[#allocation3 + $0x10a] ss:$2 sm:$0xff]  ;;  %v2265_v8 = vpack.c.bf16 %v2251_v53, %v2249_v41  ;;  %v2094_v58 = vld [vmem:[#allocation3 + $0x139] ss:$2 sm:$0xff]  ;;  %v2344_v20 = vpack.c.bf16 %v2330_v0, %v2328_v46 }
 0x398   :  { %v2145_v27 = vpack.c.bf16 %v2128_v31, %v2126_v16  ;;  %v2284_v57 = vld [vmem:[#allocation3 + $0xf0] ss:$2 sm:$0xff]  ;;  %v2165_v3 = vld [vmem:[#allocation2 + $0xc0] ss:$2 sm:$0xff]  ;;  %v2096_v1 = vld [vmem:[#allocation3 + $0x151] ss:$2 sm:$0xff] }
 0x399   :  { %2473 = vrot.lane.b32.xlu0 %v2263_v15, %s3953_s20  ;;  %v2286_v56 = vld [vmem:[#allocation3 + $0x108] ss:$2 sm:$0xff]  ;;  %v2184_v29 = vpack.c.bf16 %v2167_v18, %v2165_v3  ;;  %v2107_v9 = vpack.c.bf16 %v2096_v1, %v2094_v58  ;;  %v2175_v37 = vld [vmem:[#allocation2 + $0x138] ss:$2 sm:$0xff]  ;;  %v2332_v55 = vld [vmem:[#allocation3 + $0x151] ss:$2 sm:$0xff] }
 0x39a   :  { %v2303_v21 = vpack.c.bf16 %v2286_v56, %v2284_v57  ;;  %v2132_v61 = vld [vmem:[#allocation3 + $0x122] ss:$2 sm:$0xff]  ;;  %v2136_v51 = vld [vmem:[#allocation3 + $0x152] ss:$2 sm:$0xff]  ;;  %v2334_v15 = vld [vmem:[#allocation3 + $0x169] ss:$2 sm:$0xff] }
 0x39b   :  { %2425 = vrot.lane.b32.xlu1 %v2144_v63, %s3952_s30  ;;  %v2146_v17 = vpack.c.bf16 %v2132_v61, %v2130_v62  ;;  %v2288_v35 = vld [vmem:[#allocation3 + $0x120] ss:$2 sm:$0xff]  ;;  %v2169_v47 = vld [vmem:[#allocation2 + $0xf0] ss:$2 sm:$0xff]  ;;  %v2098_v63 = vld [vmem:[#allocation3 + $0x169] ss:$2 sm:$0xff]  ;;  %v2345_v44 = vpack.c.bf16 %v2334_v15, %v2332_v55 }
 0x39c   :  { %v2171_v2 = vld [vmem:[#allocation2 + $0x108] ss:$2 sm:$0xff]  ;;  %v2304_v11 = vpack.c.bf16 %v2290_v4, %v2288_v35  ;;  %v2100_v12 = vld [vmem:[#allocation3 + $0x181] ss:$2 sm:$0xff]  ;;  %v2268_v34 = vld [vmem:[#allocation3 + $0x18] ss:$2 sm:$0xff] }
 0x39d   :  { %2497 = vrot.lane.b32.xlu0 %v2302_v43, %s3952_s30  ;;  %v2185_v59 = vpack.c.bf16 %v2171_v2, %v2169_v47  ;;  %v2253_v25 = vld [vmem:[#allocation2 + $0x122] ss:$2 sm:$0xff]  ;;  %v2108_v28 = vpack.c.bf16 %v2100_v12, %v2098_v63  ;;  %v2257_v33 = vld [vmem:[#allocation2 + $0x152] ss:$2 sm:$0xff]  ;;  %v2336_v31 = vld [vmem:[#allocation3 + $0x181] ss:$2 sm:$0xff] }
 0x39e   :  { %v2255_v54 = vld [vmem:[#allocation2 + $0x13a] ss:$2 sm:$0xff]  ;;  %v2259_v43 = vld [vmem:[#allocation2 + $0x16a] ss:$2 sm:$0xff]  ;;  %v2072_v57 = vld [vmem:[#allocation3 + $0x19] ss:$2 sm:$0xff] }
 0x39f   :  { %2449 = vrot.lane.b32.xlu1 %v2183_v52, %s3954_s25  ;;  %v2134_v60 = vld [vmem:[#allocation3 + $0x13a] ss:$2 sm:$0xff]  ;;  %v2266_v10 = vpack.c.bf16 %v2255_v54, %v2253_v25  ;;  %v2138_v52 = vld [vmem:[#allocation3 + $0x16a] ss:$2 sm:$0xff]  ;;  %v2267_v42 = vpack.c.bf16 %v2259_v43, %v2257_v33  ;;  %v2308_v62 = vld [vmem:[#allocation3 + $0x19] ss:$2 sm:$0xff] }
 0x3a0   :  { %v2147_v50 = vpack.c.bf16 %v2136_v51, %v2134_v60  ;;  %v2292_v26 = vld [vmem:[#allocation3 + $0x150] ss:$2 sm:$0xff]  ;;  %v2173_v48 = vld [vmem:[#allocation2 + $0x120] ss:$2 sm:$0xff]  ;;  %v2310_v61 = vld [vmem:[#allocation3 + $0x31] ss:$2 sm:$0xff] }
 0x3a1   :  { %2521 = vrot.lane.b32.xlu0 %v2342_v14, %s3954_s25  ;;  %v2294_v38 = vld [vmem:[#allocation3 + $0x168] ss:$2 sm:$0xff]  ;;  %v2186_v40 = vpack.c.bf16 %v2175_v37, %v2173_v48  ;;  %v2298_v14 = vld [vmem:[#allocation3 + $0x198] ss:$2 sm:$0xff]  ;;  %v2195_v2 = vld [vmem:[#allocation2 + $0x49] ss:$2 sm:$0xff] }
 0x3a2   :  { %v2305_v36 = vpack.c.bf16 %v2294_v38, %v2292_v26  ;;  %v2140_v39 = vld [vmem:[#allocation3 + $0x182] ss:$2 sm:$0xff]  ;;  %v2197_v55 = vld [vmem:[#allocation2 + $0x61] ss:$2 sm:$0xff] }
 0x3a3   :  { %2403 = vrot.lane.b32.xlu1 %v2105_v19, %s3953_s20  ;;  %v2148_v22 = vpack.c.bf16 %v2140_v39, %v2138_v52  ;;  %v2296_v30 = vld [vmem:[#allocation3 + $0x180] ss:$2 sm:$0xff]  ;;  %v2177_v19 = vld [vmem:[#allocation2 + $0x150] ss:$2 sm:$0xff]  ;;  %v2199_v15 = vld [vmem:[#allocation2 + $0x79] ss:$2 sm:$0xff] }
 0x3a4   :  { %v2179_v7 = vld [vmem:[#allocation2 + $0x168] ss:$2 sm:$0xff]  ;;  %v2306_v32 = vpack.c.bf16 %v2298_v14, %v2296_v30  ;;  %v2151_v41 = vld [vmem:[#allocation2 + $0x18] ss:$2 sm:$0xff] }
 0x3a5   :  { %2475 = vrot.lane.b32.xlu0 %v2264_v23, %s3953_s20  ;;  %v2187_v16 = vpack.c.bf16 %v2179_v7, %v2177_v19  ;;  %v2338_v23 = vld [vmem:[#allocation3 + $0x199] ss:$2 sm:$0xff]  ;;  %v2229_v18 = vld [vmem:[#allocation2 + $0x2] ss:$2 sm:$0xff] }
 0x3a6   :  { %v2346_v56 = vpack.c.bf16 %v2338_v23, %v2336_v31  ;;  %v2112_v5 = vld [vmem:[#allocation3 + $0x1a] ss:$2 sm:$0xff]  ;;  %v2203_v31 = vld [vmem:[#allocation2 + $0xa9] ss:$2 sm:$0xff] }
 0x3a7   :  { %2427 = vrot.lane.b32.xlu1 %v2145_v27, %s3952_s30  ;;  %v2070_v27 = vld [vmem:[#allocation3 + $0x1] ss:$2 sm:$0xff]  ;;  %v2036_v47 = vld [vmem:[#allocation3 + $0x48] ss:$2 sm:$0xff] }
 0x3a8   :  { %v2101_v3 = vpack.c.bf16 %v2072_v57, %v2070_v27  ;;  %v3916_v38 = vld [vmem:[%s7416_s6 + $0x80] sm:$0xff]   ;;  %v2042_v19 = vld [vmem:[#allocation3 + $0x90] ss:$2 sm:$0xff] }
 0x3a9   :  { %2499 = vrot.lane.b32.xlu0 %v2303_v21, %s3952_s30  ;;  %v2231_v21 = vld [vmem:[#allocation2 + $0x1a] ss:$2 sm:$0xff] }
 0x3aa   :  { %v2260_v49 = vpack.c.bf16 %v2231_v21, %v2229_v18  ;;  %v2038_v37 = vld [vmem:[#allocation3 + $0x60] ss:$2 sm:$0xff] }
 0x3ab   :  { %2451 = vrot.lane.b32.xlu1 %v2184_v29, %s3954_s25  ;;  %v2110_v29 = vld [vmem:[#allocation3 + $0x2] ss:$2 sm:$0xff] }
 0x3ac   :  { %v2141_v24 = vpack.c.bf16 %v2112_v5, %v2110_v29  ;;  %v2044_v7 = vld [vmem:[#allocation3 + $0xa8] ss:$2 sm:$0xff] }
 0x3ad   :  { %2523 = vrot.lane.b32.xlu0 %v2343_v6, %s3954_s25  ;;  %v2270_v6 = vld [vmem:[#allocation3 + $0x30] ss:$2 sm:$0xff]  ;;  %v2064_v23 = vpack.c.bf16 %v2044_v7, %v2042_v19 }
 0x3ae   :  { %v2299_v53 = vpack.c.bf16 %v2270_v6, %v2268_v34 }
 0x3af   :  { %2405 = vrot.lane.b32.xlu1 %v2106_v45, %s3953_s20  ;;  %v2149_v45 = vld [vmem:[#allocation2] ss:$2 sm:$0xff] }
 0x3b1   :  { %2477 = vrot.lane.b32.xlu0 %v2265_v8, %s3953_s20  ;;  %v2180_v8 = vpack.c.bf16 %v2151_v41, %v2149_v45  ;;  %v2046_v45 = vld [vmem:[#allocation3 + $0xd8] ss:$2 sm:$0xff] }
 0x3b2   :  { %v2048_v41 = vld [vmem:[#allocation3 + $0xf0] ss:$2 sm:$0xff] }
 0x3b3   :  { %2429 = vrot.lane.b32.xlu1 %v2146_v17, %s3952_s30  ;;  %v2339_v17 = vpack.c.bf16 %v2310_v61, %v2308_v62  ;;  %v2205_v62 = vld [vmem:[#allocation2 + $0xc1] ss:$2 sm:$0xff] }
 0x3b4   :  { %v2207_v61 = vld [vmem:[#allocation2 + $0xd9] ss:$2 sm:$0xff] }
 0x3b5   :  { %2501 = vrot.lane.b32.xlu0 %v2304_v11, %s3952_s30  ;;  %v2193_v11 = vld [vmem:[#allocation2 + $0x31] ss:$2 sm:$0xff] }
 0x3b6   :  { %v2221_v0 = vpack.c.bf16 %v2195_v2, %v2193_v11 }
 0x3b7   :  { %2453 = vrot.lane.b32.xlu1 %v2185_v59, %s3954_s25  ;;  %v2034_v59 = vld [vmem:[#allocation3 + $0x30] ss:$2 sm:$0xff] }
 0x3b8   :  { %v2062_v58 = vpack.c.bf16 %v2036_v47, %v2034_v59 }
 0x3b9   :  { %2525 = vrot.lane.b32.xlu0 %v2344_v20, %s3954_s25 }
 0x3bb   :  { %2407 = vrot.lane.b32.xlu1 %v2107_v9, %s3953_s20 }
 0x3bd   :  { %2479 = vrot.lane.b32.xlu0 %v2266_v10, %s3953_s20 }
 0x3bf   :  { %2431 = vrot.lane.b32.xlu1 %v2147_v50, %s3952_s30 }
 0x3c1   :  { %2503 = vrot.lane.b32.xlu0 %v2305_v36, %s3952_s30  ;;  %v2040_v36 = vld [vmem:[#allocation3 + $0x78] ss:$2 sm:$0xff] }
 0x3c2   :  { %v2063_v63 = vpack.c.bf16 %v2040_v36, %v2038_v37 }
 0x3c3   :  { %2455 = vrot.lane.b32.xlu1 %v2186_v40, %s3954_s25 }
 0x3c5   :  { %2527 = vrot.lane.b32.xlu0 %v2345_v44, %s3954_s25  ;;  %v2222_v44 = vpack.c.bf16 %v2199_v15, %v2197_v55 }
 0x3c7   :  { %2409 = vrot.lane.b32.xlu1 %v2108_v28, %s3953_s20 }
 0x3c9   :  { %2481 = vrot.lane.b32.xlu0 %v2267_v42, %s3953_s20 }
 0x3cb   :  { %2433 = vrot.lane.b32.xlu1 %v2148_v22, %s3952_s30 }
 0x3cd   :  { %2505 = vrot.lane.b32.xlu0 %v2306_v32, %s3952_s30 }
 0x3cf   :  { %2457 = vrot.lane.b32.xlu1 %v2187_v16, %s3954_s25  ;;  %v2201_v16 = vld [vmem:[#allocation2 + $0x91] ss:$2 sm:$0xff] }
 0x3d0   :  { %v2223_v57 = vpack.c.bf16 %v2203_v31, %v2201_v16 }
 0x3d1   :  { %2529 = vrot.lane.b32.xlu0 %v2346_v56, %s3954_s25 }
 0x3d3   :  { %2395 = vrot.lane.b32.xlu1 %v2101_v3, %s3953_s20  ;;  %v2494_v35 = vpop.permute.xlu1 %2493 }
 0x3d5   :  { %2467 = vrot.lane.b32.xlu0 %v2260_v49, %s3953_s20 }
 0x3d7   :  { %2419 = vrot.lane.b32.xlu1 %v2141_v24, %s3952_s30 }
 0x3d9   :  { %2491 = vrot.lane.b32.xlu0 %v2299_v53, %s3952_s30 }
 0x3db   :  { %2443 = vrot.lane.b32.xlu1 %v2180_v8, %s3954_s25  ;;  %v2065_v8 = vpack.c.bf16 %v2048_v41, %v2046_v45 }
 0x3dd   :  { %2515 = vrot.lane.b32.xlu0 %v2339_v17, %s3954_s25 }
 0x3e5   :  { %v2470_v4 = vpop.permute.xlu0 %2469 }
 0x3e6   :  { %v2601_v20 = vsel %vm1257_vm1, %v2221_v0, %v2470_v4 }
 0x3e7   :  { %v2623_v51 = vsel %vm106_vm0, %v2601_v20, %v2494_v35  ;;  %v2224_v35 = vpack.c.bf16 %v2207_v61, %v2205_v62  ;;  %v2350_v62 = vld [vmem:[#allocation3 + $0x32] ss:$2 sm:$0xff] }
 0x3f3   :  { %v2422_v46 = vpop.permute.xlu1 %2421 }
 0x3f6   :  { %v2398_v1 = vpop.permute.xlu0 %2397 }
 0x3f7   :  { %v2536_v9 = vsel %vm1257_vm1, %v2062_v58, %v2398_v1 }
 0x3f8   :  { %v2558_v54 = vsel %vm106_vm0, %v2536_v9, %v2422_v46  ;;  %v2050_v9 = vld [vmem:[#allocation3 + $0x108] ss:$2 sm:$0xff] }
 0x3f9   :  { %v2446_v25 = vpop.permute.xlu1 %2445 }
 0x3fa   :  { %v2576_v10 = vsel %vm2571_vm3, %v2558_v54, %v2446_v25  ;;  %v2052_v25 = vld [vmem:[#allocation3 + $0x120] ss:$2 sm:$0xff] }
 0x3fb   :  { %v2518_v60 = vpop.permute.xlu0 %2517 }
 0x3fc   :  { %v2640_v50 = vsel %vm2571_vm3, %v2623_v51, %v2518_v60  ;;  %v2209_v60 = vld [vmem:[#allocation2 + $0xf1] ss:$2 sm:$0xff] }
 0x3fd   :  { %v2400_v26 = vpop.permute.xlu1 %2399  ;;  %2868 = vmatprep.mubr.bf16.mxu1 %v2640_v50  ;;  %v2211_v51 = vld [vmem:[#allocation2 + $0x109] ss:$2 sm:$0xff] }
 0x3fe   :  { %2869 = vmatmul.mubr.bf16.vlgmr.msra.gmra.mxu1 %v2576_v10  ;;  %v2539_v33 = vsel %vm1257_vm1, %v2063_v63, %v2400_v26  ;;  %v2066_v10 = vpack.c.bf16 %v2052_v25, %v2050_v9  ;;  %v2225_v26 = vpack.c.bf16 %v2211_v51, %v2209_v60  ;;  %v2356_v9 = vld [vmem:[#allocation3 + $0x7a] ss:$2 sm:$0xff] }
 0x3ff   :  { %v2472_v48 = vpop.permute.xlu0 %2471  ;;  %3825 = vmatpush3.bf16.msra.mxu1 %v6997_v13  ;;  %v2358_v25 = vld [vmem:[#allocation3 + $0x92] ss:$2 sm:$0xff] }
 0x400   :  { %3826 = vmatprep.subr.bf16.mxu1 %v3916_v38  ;;  %v2604_v43 = vsel %vm1257_vm1, %v2222_v44, %v2472_v48 }
 0x401   :  { %v2424_v40 = vpop.permute.xlu1 %2423 }
 0x402   :  { %v2560_v52 = vsel %vm106_vm0, %v2539_v33, %v2424_v40  ;;  %v2056_v33 = vld [vmem:[#allocation3 + $0x150] ss:$2 sm:$0xff] }
 0x403   :  { %v2496_v12 = vpop.permute.xlu0 %2495  ;;  %3827 = vmatpush3.bf16.msra.mxu1 %v3916_v38 }
 0x404   :  { %v2625_v39 = vsel %vm106_vm0, %v2604_v43, %v2496_v12 }
 0x405   :  { %v2448_v28 = vpop.permute.xlu1 %2447 }
 0x406   :  { %v2579_v42 = vsel %vm2571_vm3, %v2560_v52, %v2448_v28  ;;  %v2054_v28 = vld [vmem:[#allocation3 + $0x138] ss:$2 sm:$0xff]  ;;  %v2213_v52 = vld [vmem:[#allocation2 + $0x121] ss:$2 sm:$0xff] }
 0x407   :  { %v2520_v13 = vpop.permute.xlu0 %2519 }
 0x408   :  { %v2643_v22 = vsel %vm2571_vm3, %v2625_v39, %v2520_v13  ;;  %v2215_v39 = vld [vmem:[#allocation2 + $0x139] ss:$2 sm:$0xff]  ;;  %v2067_v13 = vpack.c.bf16 %v2056_v33, %v2054_v28  ;;  %v2366_v28 = vld [vmem:[#allocation3 + $0x10a] ss:$2 sm:$0xff] }
 0x409   :  { %v2402_v30 = vpop.permute.xlu1 %2401  ;;  %2876 = vmatprep.mubr.bf16.mxu1 %v2643_v22  ;;  %v2226_v22 = vpack.c.bf16 %v2215_v39, %v2213_v52  ;;  %v2368_v52 = vld [vmem:[#allocation3 + $0x122] ss:$2 sm:$0xff] }
 0x40a   :  { %2877 = vmatmul.mubr.bf16.gmra.mxu1 %v2579_v42  ;;  %v2542_v3 = vsel %vm1257_vm1, %v2064_v23, %v2402_v30  ;;  %v2370_v39 = vld [vmem:[#allocation3 + $0x13a] ss:$2 sm:$0xff] }
 0x40b   :  { %v2474_v14 = vpop.permute.xlu0 %2473 }
 0x40c   :  { %v2607_v18 = vsel %vm1257_vm1, %v2223_v57, %v2474_v14 }
 0x40d   :  { %v2426_v32 = vpop.permute.xlu1 %2425 }
 0x40e   :  { %v2562_v21 = vsel %vm106_vm0, %v2542_v3, %v2426_v32  ;;  %v2060_v3 = vld [vmem:[#allocation3 + $0x180] ss:$2 sm:$0xff] }
 0x40f   :  { %v2498_v27 = vpop.permute.xlu0 %2497 }
 0x410   :  { %v2627_v29 = vsel %vm106_vm0, %v2607_v18, %v2498_v27 }
 0x411   :  { %v2450_v56 = vpop.permute.xlu1 %2449 }
 0x412   :  { %v2582_v49 = vsel %vm2571_vm3, %v2562_v21, %v2450_v56  ;;  %v2058_v56 = vld [vmem:[#allocation3 + $0x168] ss:$2 sm:$0xff]  ;;  %v2217_v21 = vld [vmem:[#allocation2 + $0x151] ss:$2 sm:$0xff] }
 0x413   :  { %v2522_v5 = vpop.permute.xlu0 %2521 }
 0x414   :  { %v2646_v24 = vsel %vm2571_vm3, %v2627_v29, %v2522_v5  ;;  %v2219_v29 = vld [vmem:[#allocation2 + $0x169] ss:$2 sm:$0xff]  ;;  %v2068_v5 = vpack.c.bf16 %v2060_v3, %v2058_v56  ;;  %v3227_v56 = vld [vmem:[#allocation4 + $0x40] ss:$2 sm:$0xff]  ;;  %v3229_v3 = vld [vmem:[#allocation4 + $0x50] ss:$2 sm:$0xff] }
 0x415   :  { %v2404_v34 = vpop.permute.xlu1 %2403  ;;  %2884 = vmatprep.mubr.bf16.mxu1 %v2646_v24  ;;  %v2227_v24 = vpack.c.bf16 %v2219_v29, %v2217_v21  ;;  %v3252_v21 = vpack.c.bf16 %v3229_v3, %v3227_v56  ;;  %v3233_v29 = vld [vmem:[#allocation4 + $0x70] ss:$2 sm:$0xff] }
 0x416   :  { %2885 = vmatmul.mubr.bf16.gmra.mxu1 %v2582_v49  ;;  %v2545_v47 = vsel %vm1257_vm1, %v2065_v8, %v2404_v34 }
 0x417   :  { %v2476_v6 = vpop.permute.xlu0 %2475 }
 0x418   :  { %v2610_v2 = vsel %vm1257_vm1, %v2224_v35, %v2476_v6 }
 0x419   :  { %v2428_v53 = vpop.permute.xlu1 %2427 }
 0x41a   :  { %v2564_v11 = vsel %vm106_vm0, %v2545_v47, %v2428_v53  ;;  %v2348_v53 = vld [vmem:[#allocation3 + $0x1a] ss:$2 sm:$0xff] }
 0x41b   :  { %v2500_v17 = vpop.permute.xlu0 %2499  ;;  %v2379_v47 = vpack.c.bf16 %v2350_v62, %v2348_v53  ;;  %v3243_v53 = vld [vmem:[#allocation4 + $0xc0] ss:$2 sm:$0xff]  ;;  %v3245_v62 = vld [vmem:[#allocation4 + $0xd0] ss:$2 sm:$0xff] }
 0x41c   :  { %v2629_v59 = vsel %vm106_vm0, %v2610_v2, %v2500_v17 }
 0x41d   :  { %v2452_v4 = vpop.permute.xlu1 %2451 }
 0x41e   :  { %v2585_v0 = vsel %vm2571_vm3, %v2564_v11, %v2452_v4  ;;  %v2030_v11 = vld [vmem:[#allocation3] ss:$2 sm:$0xff] }
 0x41f   :  { %v2524_v46 = vpop.permute.xlu0 %2523 }
 0x420   :  { %v2649_v58 = vsel %vm2571_vm3, %v2629_v59, %v2524_v46  ;;  %v2032_v59 = vld [vmem:[#allocation3 + $0x18] ss:$2 sm:$0xff] }
 0x421   :  { %v2406_v1 = vpop.permute.xlu1 %2405  ;;  %2892 = vmatprep.mubr.bf16.mxu1 %v2649_v58  ;;  %v2191_v58 = vld [vmem:[#allocation2 + $0x19] ss:$2 sm:$0xff] }
 0x422   :  { %2893 = vmatmul.mubr.bf16.gmra.mxu1 %v2585_v0  ;;  %v2548_v48 = vsel %vm1257_vm1, %v2066_v10, %v2406_v1  ;;  %v2352_v0 = vld [vmem:[#allocation3 + $0x4a] ss:$2 sm:$0xff]  ;;  %v2189_v1 = vld [vmem:[#allocation2 + $0x1] ss:$2 sm:$0xff] }
 0x423   :  { %v2478_v20 = vpop.permute.xlu0 %2477  ;;  %v2220_v51 = vpack.c.bf16 %v2191_v58, %v2189_v1 }
 0x424   :  { %v2613_v37 = vsel %vm1257_vm1, %v2225_v26, %v2478_v20  ;;  %v2354_v20 = vld [vmem:[#allocation3 + $0x62] ss:$2 sm:$0xff] }
 0x425   :  { %v2430_v54 = vpop.permute.xlu1 %2429  ;;  %v2380_v10 = vpack.c.bf16 %v2354_v20, %v2352_v0 }
 0x426   :  { %v2566_v36 = vsel %vm106_vm0, %v2548_v48, %v2430_v54  ;;  %v2061_v54 = vpack.c.bf16 %v2032_v59, %v2030_v11 }
 0x427   :  { %v2502_v50 = vpop.permute.xlu0 %2501 }
 0x428   :  { %v2631_v40 = vsel %vm106_vm0, %v2613_v37, %v2502_v50 }
 0x429   :  { %v2454_v38 = vpop.permute.xlu1 %2453 }
 0x42a   :  { %v2588_v15 = vsel %vm2571_vm3, %v2566_v36, %v2454_v38  ;;  %v2381_v38 = vpack.c.bf16 %v2358_v25, %v2356_v9 }
 0x42b   :  { %v2526_v55 = vpop.permute.xlu0 %2525 }
 0x42c   :  { %v2652_v63 = vsel %vm2571_vm3, %v2631_v40, %v2526_v55 }
 0x42d   :  { %v2408_v12 = vpop.permute.xlu1 %2407  ;;  %2900 = vmatprep.mubr.bf16.mxu1 %v2652_v63  ;;  %v2360_v63 = vld [vmem:[#allocation3 + $0xaa] ss:$2 sm:$0xff] }
 0x42e   :  { %2901 = vmatmul.mubr.bf16.gmra.mxu1 %v2588_v15  ;;  %v2551_v14 = vsel %vm1257_vm1, %v2067_v13, %v2408_v12  ;;  %v2362_v12 = vld [vmem:[#allocation3 + $0xc2] ss:$2 sm:$0xff]  ;;  %v2372_v13 = vld [vmem:[#allocation3 + $0x152] ss:$2 sm:$0xff] }
 0x42f   :  { %v2480_v44 = vpop.permute.xlu0 %2479  ;;  %v2382_v33 = vpack.c.bf16 %v2362_v12, %v2360_v63 }
 0x430   :  { %v2616_v19 = vsel %vm1257_vm1, %v2226_v22, %v2480_v44  ;;  %v2364_v44 = vld [vmem:[#allocation3 + $0xf2] ss:$2 sm:$0xff]  ;;  %v2384_v22 = vpack.c.bf16 %v2370_v39, %v2368_v52 }
 0x431   :  { %v2432_v43 = vpop.permute.xlu1 %2431  ;;  %v3917_v39 = vld [vmem:[%s7420_s10 + $0x18] sm:$0xff]  }
 0x432   :  { %v2568_v7 = vsel %vm106_vm0, %v2551_v14, %v2432_v43  ;;  %v2383_v43 = vpack.c.bf16 %v2366_v28, %v2364_v44  ;;  %v2376_v14 = vld [vmem:[#allocation3 + $0x182] ss:$2 sm:$0xff]  ;;  %3844 = vmatprep.subr.bf16.mxu1 %v3917_v39 }
 0x433   :  { %v2504_v42 = vpop.permute.xlu0 %2503 }
 0x434   :  { %v2633_v32 = vsel %vm106_vm0, %v2616_v19, %v2504_v42  ;;  %v2374_v42 = vld [vmem:[#allocation3 + $0x16a] ss:$2 sm:$0xff]  ;;  %v2378_v19 = vld [vmem:[#allocation3 + $0x19a] ss:$2 sm:$0xff] }
 0x435   :  { %v2456_v30 = vpop.permute.xlu1 %2455 }
 0x436   :  { %v2591_v31 = vsel %vm2571_vm3, %v2568_v7, %v2456_v30  ;;  %v2385_v30 = vpack.c.bf16 %v2374_v42, %v2372_v13  ;;  %v2386_v7 = vpack.c.bf16 %v2378_v19, %v2376_v14  ;;  %v3918_v13 = vld [vmem:[%s7420_s10 + $0x10] sm:$0xff]  }
 0x437   :  { %v2528_v16 = vpop.permute.xlu0 %2527 }
 0x438   :  { %v2655_v23 = vsel %vm2571_vm3, %v2633_v32, %v2528_v16  ;;  %v3219_v32 = vld [vmem:[#allocation4] ss:$2 sm:$0xff]  ;;  %v3221_v16 = vld [vmem:[#allocation4 + $0x10] ss:$2 sm:$0xff] }
 0x439   :  { %v2410_v27 = vpop.permute.xlu1 %2409  ;;  %2908 = vmatprep.mubr.bf16.mxu1 %v2655_v23  ;;  %v3250_v23 = vpack.c.bf16 %v3221_v16, %v3219_v32 }
 0x43a   :  { %2909 = vmatmul.mubr.bf16.gmra.mxu1 %v2591_v31  ;;  %v2554_v6 = vsel %vm1257_vm1, %v2068_v5, %v2410_v27  ;;  %v3223_v31 = vld [vmem:[#allocation4 + $0x20] ss:$2 sm:$0xff]  ;;  %v3225_v27 = vld [vmem:[#allocation4 + $0x30] ss:$2 sm:$0xff] }
 0x43b   :  { %v2482_v57 = vpop.permute.xlu0 %2481  ;;  %3266 = vrot.lane.b32.xlu0 %v3250_v23, %s3953_s20 }
 0x43c   :  { %v2619_v45 = vsel %vm1257_vm1, %v2227_v24, %v2482_v57  ;;  %v3251_v57 = vpack.c.bf16 %v3225_v27, %v3223_v31  ;;  %v3237_v24 = vld [vmem:[#allocation4 + $0x90] ss:$2 sm:$0xff] }
 0x43d   :  { %v2434_v18 = vpop.permute.xlu1 %2433 }
 0x43e   :  { %v2570_v41 = vsel %vm106_vm0, %v2554_v6, %v2434_v18  ;;  %3268 = vrot.lane.b32.xlu1 %v3251_v57, %s3953_s20  ;;  %v3231_v18 = vld [vmem:[#allocation4 + $0x60] ss:$2 sm:$0xff] }
 0x43f   :  { %v2506_v49 = vpop.permute.xlu0 %2505  ;;  %v3253_v5 = vpack.c.bf16 %v3233_v29, %v3231_v18  ;;  %3270 = vrot.lane.b32.xlu0 %v3252_v21, %s3953_s20  ;;  %v3920_v21 = vld [vmem:[%s7420_s10] sm:$0xff]  }
 0x440   :  { %v2635_v61 = vsel %vm106_vm0, %v2619_v45, %v2506_v49  ;;  %v3235_v49 = vld [vmem:[#allocation4 + $0x80] ss:$2 sm:$0xff]  ;;  %v3241_v45 = vld [vmem:[#allocation4 + $0xb0] ss:$2 sm:$0xff] }
 0x441   :  { %v2458_v34 = vpop.permute.xlu1 %2457  ;;  %v3254_v6 = vpack.c.bf16 %v3237_v24, %v3235_v49 }
 0x442   :  { %v2594_v17 = vsel %vm2571_vm3, %v2570_v41, %v2458_v34  ;;  %3272 = vrot.lane.b32.xlu1 %v3253_v5, %s3953_s20  ;;  %v3239_v34 = vld [vmem:[#allocation4 + $0xa0] ss:$2 sm:$0xff] }
 0x443   :  { %v2530_v8 = vpop.permute.xlu0 %2529  ;;  %v3255_v41 = vpack.c.bf16 %v3241_v45, %v3239_v34  ;;  %3274 = vrot.lane.b32.xlu0 %v3254_v6, %s3953_s20 }
 0x444   :  { %v2658_v35 = vsel %vm2571_vm3, %v2635_v61, %v2530_v8  ;;  %v3247_v61 = vld [vmem:[#allocation4 + $0xe0] ss:$2 sm:$0xff]  ;;  %v3256_v8 = vpack.c.bf16 %v3245_v62, %v3243_v53 }
 0x445   :  { %v2396_v4 = vpop.permute.xlu1 %2395  ;;  %2916 = vmatprep.mubr.bf16.mxu1 %v2658_v35 }
 0x446   :  { %2917 = vmatmul.mubr.bf16.gmra.mxu1 %v2594_v17  ;;  %v2533_v26 = vsel %vm1257_vm1, %v2061_v54, %v2396_v4  ;;  %3276 = vrot.lane.b32.xlu1 %v3255_v41, %s3953_s20  ;;  %v3249_v17 = vld [vmem:[#allocation4 + $0xf0] ss:$2 sm:$0xff] }
 0x447   :  { %3828 = vmatprep.mubr.msk.bf16.mxu1 %vm1257_vm1, %v2379_v47  ;;  %v2468_v2 = vpop.permute.xlu0 %2467  ;;  %v3257_v35 = vpack.c.bf16 %v3249_v17, %v3247_v61  ;;  %3278 = vrot.lane.b32.xlu0 %v3256_v8, %s3953_s20  ;;  %v3921_v61 = vld [vmem:[%s7419_s9 + $0x8] sm:$0xff]  }
 0x448   :  { %v2598_v48 = vsel %vm1257_vm1, %v2220_v51, %v2468_v2 }
 0x449   :  { %v2420_v46 = vpop.permute.xlu1 %2419 }
 0x44a   :  { %v2556_v37 = vsel %vm106_vm0, %v2533_v26, %v2420_v46  ;;  %3280 = vrot.lane.b32.xlu1 %v3257_v35, %s3953_s20 }
 0x44b   :  { %v2492_v60 = vpop.permute.xlu0 %2491 }
 0x44c   :  { %v2621_v36 = vsel %vm106_vm0, %v2598_v48, %v2492_v60 }
 0x44d   :  { %v2444_v50 = vpop.permute.xlu1 %2443 }
 0x44e   :  { %3829 = vmatmul.mubr.msk.bf16.vlgmr.msra.gmra.mxu1 %vm1257_vm1, %v2380_v10  ;;  %v2573_v55 = vsel %vm2571_vm3, %v2556_v37, %v2444_v50 }
 0x44f   :  { %3832 = vmatprep.mubr.msk.bf16.mxu1 %vm1257_vm1, %v2381_v38  ;;  %v2516_v40 = vpop.permute.xlu0 %2515  ;;  %3845 = vmatpush3.bf16.msra.mxu1 %v3917_v39 }
 0x450   :  { %v2637_v15 = vsel %vm2571_vm3, %v2621_v36, %v2516_v40  ;;  %3846 = vmatprep.subr.bf16.mxu1 %v3918_v13 }
 0x451   :  { %2860 = vmatprep.mubr.bf16.mxu0 %v2637_v15 }
 0x452   :  { %2861 = vmatmul.mubr.bf16.vlgmr.msra.gmra.mxu0 %v2573_v55 }
 0x453   :  { %3847 = vmatpush3.bf16.msra.mxu1 %v3918_v13 }
 0x456   :  { %3833 = vmatmul.mubr.msk.bf16.gmra.mxu1 %vm1257_vm1, %v2382_v33 }
 0x457   :  { %3836 = vmatprep.mubr.msk.bf16.mxu1 %vm1257_vm1, %v2383_v43 }
 0x45e   :  { %3837 = vmatmul.mubr.msk.bf16.gmra.mxu1 %vm1257_vm1, %v2384_v22 }
 0x45f   :  { %3840 = vmatprep.mubr.msk.bf16.mxu1 %vm1257_vm1, %v2385_v30 }
 0x466   :  { %3841 = vmatmul.mubr.msk.bf16.gmra.mxu1 %vm1257_vm1, %v2386_v7  ;;  %v3919_v7 = vld [vmem:[%s7420_s10 + $0x8] sm:$0xff]  }
 0x467   :  { %3848 = vmatprep.subr.bf16.mxu1 %v3919_v7 }
 0x468   :  { %3849 = vmatpush3.bf16.msra.mxu1 %v3919_v7 }
 0x469   :  { %3850 = vmatprep.subr.bf16.mxu1 %v3920_v21 }
 0x46c   :  { %3851 = vmatpush3.bf16.msra.mxu1 %v3920_v21 }
 0x46d   :  { %3852 = vmatprep.subr.bf16.mxu1 %v3921_v61 }
 0x470   :  { %3853 = vmatpush3.bf16.msra.mxu1 %v3921_v61 }
 0x4be   :  { %v3686_v4 = vpop.f32.mrf.mxu1 }
 0x4c0   :  { %v3687_v47 = vpop.f32.mrf.mxu1 }
 0x4c1   :  { %v3688_v31 = vadd.f32 %v3687_v47, %v3686_v4 }
 0x4c2   :  { %v3689_v2 = vpop.f32.mrf.mxu1 }
 0x4c4   :  { %v3690_v11 = vpop.f32.mrf.mxu1 }
 0x4c5   :  { %v3691_v56 = vadd.f32 %v3690_v11, %v3689_v2 }
 0x4ca   :  { %v3692_v59 = vpop.f32.mrf.mxu1 }
 0x4cc   :  { %v3693_v46 = vpop.f32.mrf.mxu1 }
 0x4cd   :  { %v3694_v5 = vadd.f32 %v3693_v46, %v3692_v59 }
 0x4ce   :  { %v3695_v0 = vpop.f32.mrf.mxu1 }
 0x4d0   :  { %v3696_v58 = vpop.f32.mrf.mxu1 }
 0x4d1   :  { %v3697_v41 = vadd.f32 %v3696_v58, %v3695_v0 }
 0x4d6   :  { %v3698_v1 = vpop.f32.mrf.mxu1 }
 0x4d8   :  { %v3699_v20 = vpop.f32.mrf.mxu1 }
 0x4d9   :  { %v3700_v35 = vadd.f32 %v3699_v20, %v3698_v1  ;;  %v3922_v1 = vld [vmem:[%s7419_s9] sm:$0xff]  }
 0x4da   :  { %v7100_v9 = vpop.f32.mrf.mxu1  ;;  %3854 = vmatprep.subr.bf16.mxu1 %v3922_v1 }
 0x4db   :  { %3855 = vmatpush3.bf16.msra.mxu1 %v3922_v1 }
 0x4dc   :  { %v7102_v25 = vpop.f32.mrf.mxu1 }
 0x4dd   :  { %v3703_v59 = vadd.f32 %v7102_v25, %v7100_v9 }
 0x4e2   :  { %v7104_v54 = vpop.f32.mrf.mxu1 }
 0x4e4   :  { %v7106_v60 = vpop.f32.mrf.mxu1 }
 0x4e5   :  { %v3706_v20 = vadd.f32 %v7106_v60, %v7104_v54 }
 0x4e6   :  { %v7108_v51 = vpop.f32.mrf.mxu1 }
 0x4e8   :  { %v7110_v10 = vpop.f32.mrf.mxu1 }
 0x4ee   :  { %v7112_v50 = vpop.f32.mrf.mxu1 }
 0x4f0   :  { %v7114_v26 = vpop.f32.mrf.mxu1 }
 0x4f1   :  { %v3712_v54 = vadd.f32 %v7114_v26, %v7112_v50 }
 0x4f2   :  { %v7116_v38 = vpop.f32.mrf.mxu1 }
 0x4f4   :  { %v7118_v48 = vpop.f32.mrf.mxu1 }
 0x4fa   :  { %v7120_v37 = vpop.f32.mrf.mxu1 }
 0x4fc   :  { %v7122_v36 = vpop.f32.mrf.mxu1 }
 0x4fd   :  { %v3718_v50 = vadd.f32 %v7122_v36, %v7120_v37 }
 0x4fe   :  { %v7124_v40 = vpop.f32.mrf.mxu1 }
 0x500   :  { %v7126_v55 = vpop.f32.mrf.mxu1 }
 0x506   :  { %v7128_v15 = vpop.f32.mrf.mxu1 }
 0x508   :  { %v7130_v63 = vpop.f32.mrf.mxu1 }
 0x509   :  { %v3724_v21 = vadd.f32 %v7130_v63, %v7128_v15 }
 0x50a   :  { %v7132_v12 = vpop.f32.mrf.mxu1 }
 0x50c   :  { %v7134_v44 = vpop.f32.mrf.mxu1 }
 0x50e   :  { %v3830_v28 = vpop.f32.mrf.mxu1 }
 0x50f   :  { %v7147_v3 = vadd.f32 %v3830_v28, %v3688_v31 }
 0x510   :  { %v2959_v33 = vpop.f32.mrf.mxu1 }
 0x511   :  { %v3027_v53 = vsel %vm1257_vm1, %v7147_v3, 0.0 }
 0x512   :  { %v3680_v43 = vpop.f32.mrf.mxu0  ;;  %v3831_v52 = vpop.f32.mrf.mxu1 }
 0x513   :  { %v7154_v49 = vadd.f32 %v3831_v52, %v3691_v56  ;;  %v3709_v52 = vadd.f32 %v7110_v10, %v7108_v51  ;;  %v3715_v51 = vadd.f32 %v7118_v48, %v7116_v38 }
 0x514   :  { %v3681_v42 = vpop.f32.mrf.mxu0  ;;  %v2962_v22 = vpop.f32.mrf.mxu1 }
 0x515   :  { %v3682_v30 = vadd.f32 %v3681_v42, %v3680_v43  ;;  %v3029_v4 = vsel %vm1257_vm1, %v7154_v49, 0.0 }
 0x516   :  { %v3834_v14 = vpop.f32.mrf.mxu1  ;;  %v3683_v19 = vpop.f32.mrf.mxu0 }
 0x517   :  { %v7145_v23 = vadd.f32 %v3682_v30, %v2959_v33  ;;  %v7173_v46 = vadd.f32 %v3834_v14, %v3700_v35 }
 0x518   :  { %v3684_v32 = vpop.f32.mrf.mxu0  ;;  %v2975_v16 = vpop.f32.mrf.mxu1 }
 0x519   :  { %v3685_v27 = vadd.f32 %v3684_v32, %v3683_v19  ;;  %v3024_v24 = vsel %vm1257_vm1, %v7145_v23, 0.0  ;;  %v7162_v62 = vadd.f32 %v3694_v5, %v2975_v16  ;;  %v3035_v39 = vsel %vm1257_vm1, %v7173_v46, 0.0 }
 0x51a   :  { %v3835_v57 = vpop.f32.mrf.mxu1  ;;  %v3727_v5 = vadd.f32 %v7134_v44, %v7132_v12 }
 0x51b   :  { %v7149_v18 = vadd.f32 %v3685_v27, %v2962_v22  ;;  %v3031_v0 = vsel %vm1257_vm1, %v7162_v62, 0.0  ;;  %v7182_v33 = vadd.f32 %v3835_v57, %v3703_v59  ;;  %v3721_v57 = vadd.f32 %v7126_v55, %v7124_v40 }
 0x51c   :  { %v2978_v29 = vpop.f32.mrf.mxu1 }
 0x51d   :  { %v3025_v34 = vsel %vm1257_vm1, %v7149_v18, 0.0  ;;  %v7169_v47 = vadd.f32 %v3697_v41, %v2978_v29  ;;  %v3037_v60 = vsel %vm1257_vm1, %v7182_v33, 0.0 }
 0x51e   :  { %v3026_v6 = vadd.f32 %v3025_v34, %v3024_v24  ;;  %v3838_v45 = vpop.f32.mrf.mxu1 }
 0x51f   :  { %v3033_v9 = vsel %vm1257_vm1, %v7169_v47, 0.0  ;;  %v7200_v10 = vadd.f32 %v3838_v45, %v3712_v54 }
 0x520   :  { %v3028_v8 = vadd.f32 %v3027_v53, %v3026_v6  ;;  %v2991_v17 = vpop.f32.mrf.mxu1 }
 0x521   :  { %v7190_v13 = vadd.f32 %v3706_v20, %v2991_v17  ;;  %v3043_v38 = vsel %vm1257_vm1, %v7200_v10, 0.0 }
 0x522   :  { %v3030_v2 = vadd.f32 %v3029_v4, %v3028_v8  ;;  %v3839_v11 = vpop.f32.mrf.mxu1 }
 0x523   :  { %v3039_v7 = vsel %vm1257_vm1, %v7190_v13, 0.0  ;;  %v7206_v26 = vadd.f32 %v3839_v11, %v3715_v51 }
 0x524   :  { %v3032_v58 = vadd.f32 %v3031_v0, %v3030_v2  ;;  %v2994_v28 = vpop.f32.mrf.mxu1 }
 0x525   :  { %v7196_v30 = vadd.f32 %v3709_v52, %v2994_v28  ;;  %v3045_v37 = vsel %vm1257_vm1, %v7206_v26, 0.0 }
 0x526   :  { %v3034_v25 = vadd.f32 %v3033_v9, %v3032_v58  ;;  %v3842_v43 = vpop.f32.mrf.mxu1 }
 0x527   :  { %v3041_v16 = vsel %vm1257_vm1, %v7196_v30, 0.0  ;;  %v3016_v24 = vadd.f32 %v3842_v43, %v3724_v21 }
 0x528   :  { %v3036_v42 = vadd.f32 %v3035_v39, %v3034_v25  ;;  %v3007_v22 = vpop.f32.mrf.mxu1 }
 0x529   :  { %v3008_v48 = vadd.f32 %v3718_v50, %v3007_v22  ;;  %v3051_v41 = vsel %vm1257_vm1, %v3016_v24, 0.0 }
 0x52a   :  { %v3038_v14 = vadd.f32 %v3037_v60, %v3036_v42  ;;  %v3843_v19 = vpop.f32.mrf.mxu1 }
 0x52b   :  { %v3047_v34 = vsel %vm1257_vm1, %v3008_v48, 0.0  ;;  %v7221_v55 = vadd.f32 %v3843_v19, %v3727_v5 }
 0x52c   :  { %v3040_v32 = vadd.f32 %v3039_v7, %v3038_v14  ;;  %v3010_v27 = vpop.f32.mrf.mxu1 }
 0x52d   :  { %v3011_v36 = vadd.f32 %v3721_v57, %v3010_v27  ;;  %v3053_v63 = vsel %vm1257_vm1, %v7221_v55, 0.0 }
 0x52e   :  { %v3042_v31 = vadd.f32 %v3041_v16, %v3040_v32 }
 0x52f   :  { %v3049_v6 = vsel %vm1257_vm1, %v3011_v36, 0.0 }
 0x530   :  { %v3044_v56 = vadd.f32 %v3043_v38, %v3042_v31 }
 0x532   :  { %v3046_v29 = vadd.f32 %v3045_v37, %v3044_v56 }
 0x534   :  { %v3048_v40 = vadd.f32 %v3047_v34, %v3046_v29 }
 0x536   :  { %v3050_v45 = vadd.f32 %v3049_v6, %v3048_v40 }
 0x538   :  { %v3052_v15 = vadd.f32 %v3051_v41, %v3050_v45 }
 0x53a   :  { %v3054_v53 = vadd.f32 %v3053_v63, %v3052_v15 }
 0x53c   :  { %v3055_v61 = vrot.slane %v3054_v53, 4 }
 0x53e   :  { %v3056_v8 = vadd.f32 %v3055_v61, %v3054_v53 }
 0x540   :  { %v3057_v17 = vrot.slane %v3056_v8, 2 }
 0x542   :  { %v3058_v12 = vadd.f32 %v3057_v17, %v3056_v8 }
 0x544   :  { %v3059_v44 = vrot.slane %v3058_v12, 1 }
 0x546   :  { %v3060_v35 = vadd.f32 %v3059_v44, %v3058_v12 }
 0x548   :  { %v3062_v4 = vmul.f32 0.0078125, %v3060_v35 }
 0x54a   :  { %v7228_v2 = vsub.f32 %v7145_v23, %v3062_v4  ;;  %v7231_v11 = vsub.f32 %v7149_v18, %v3062_v4  ;;  %v7234_v59 = vsub.f32 %v7147_v3, %v3062_v4  ;;  %v7237_v0 = vsub.f32 %v7154_v49, %v3062_v4 }
 0x54b   :  { %v7244_v1 = vsub.f32 %v7162_v62, %v3062_v4  ;;  %v7249_v18 = vsub.f32 %v7169_v47, %v3062_v4  ;;  %v7256_v25 = vsub.f32 %v7173_v46, %v3062_v4  ;;  %v7262_v47 = vsub.f32 %v7182_v33, %v3062_v4 }
 0x54c   :  { %v3079_v58 = vmul.f32 %v7228_v2, %v7228_v2  ;;  %v3080_v28 = vmul.f32 %v7231_v11, %v7231_v11  ;;  %v3081_v23 = vmul.f32 %v7234_v59, %v7234_v59  ;;  %v3082_v3 = vmul.f32 %v7237_v0, %v7237_v0 }
 0x54d   :  { %v3083_v62 = vmul.f32 %v7244_v1, %v7244_v1  ;;  %v3084_v39 = vmul.f32 %v7249_v18, %v7249_v18  ;;  %v7268_v54 = vsub.f32 %v7190_v13, %v3062_v4  ;;  %v3085_v46 = vmul.f32 %v7256_v25, %v7256_v25 }
 0x54e   :  { %v3095_v49 = vsel %vm1257_vm1, %v3079_v58, 0.0  ;;  %v3096_v20 = vsel %vm1257_vm1, %v3080_v28, 0.0  ;;  %v3098_v43 = vsel %vm1257_vm1, %v3081_v23, 0.0  ;;  %v3100_v42 = vsel %vm1257_vm1, %v3082_v3, 0.0 }
 0x54f   :  { %v3097_v9 = vadd.f32 %v3096_v20, %v3095_v49  ;;  %v3102_v60 = vsel %vm1257_vm1, %v3083_v62, 0.0  ;;  %v7274_v19 = vsub.f32 %v7196_v30, %v3062_v4  ;;  %v3086_v33 = vmul.f32 %v7262_v47, %v7262_v47 }
 0x550   :  { %v3104_v51 = vsel %vm1257_vm1, %v3084_v39, 0.0  ;;  %v7280_v32 = vsub.f32 %v7200_v10, %v3062_v4  ;;  %v3087_v13 = vmul.f32 %v7268_v54, %v7268_v54  ;;  %v3106_v50 = vsel %vm1257_vm1, %v3085_v46, 0.0 }
 0x551   :  { %v3099_v52 = vadd.f32 %v3098_v43, %v3097_v9  ;;  %v7286_v31 = vsub.f32 %v7206_v26, %v3062_v4  ;;  %v3088_v30 = vmul.f32 %v7274_v19, %v7274_v19  ;;  %v3108_v27 = vsel %vm1257_vm1, %v3086_v33, 0.0  ;;  %v7321_v43 = vld [vmem:[%s7417_s7] ss:$0 sm:$0xff]  ;;  %s3955_s7 = smov [#allocation5]  }
 0x552   :  { %v7291_v38 = vsub.f32 %v3008_v48, %v3062_v4  ;;  %v3089_v10 = vmul.f32 %v7280_v32, %v7280_v32  ;;  %v3110_v56 = vsel %vm1257_vm1, %v3087_v13, 0.0  ;;  %v3076_v37 = vsub.f32 %v3011_v36, %v3062_v4 }
 0x553   :  { %v3101_v22 = vadd.f32 %v3100_v42, %v3099_v52  ;;  %v3090_v29 = vmul.f32 %v7286_v31, %v7286_v31  ;;  %v3112_v26 = vsel %vm1257_vm1, %v3088_v30, 0.0  ;;  %v7299_v34 = vsub.f32 %v3016_v24, %v3062_v4 }
 0x554   :  { %v3091_v40 = vmul.f32 %v7291_v38, %v7291_v38  ;;  %v3114_v48 = vsel %vm1257_vm1, %v3089_v10, 0.0  ;;  %v7305_v45 = vsub.f32 %v7221_v55, %v3062_v4  ;;  %v3092_v41 = vmul.f32 %v3076_v37, %v3076_v37 }
 0x555   :  { %v3103_v14 = vadd.f32 %v3102_v60, %v3101_v22  ;;  %v3116_v36 = vsel %vm1257_vm1, %v3090_v29, 0.0  ;;  %v3093_v63 = vmul.f32 %v7299_v34, %v7299_v34  ;;  %v7332_v22 = vld [vmem:[%s7418_s8] ss:$0 sm:$0xff]  ;;  %s3488_s8 = sshll.u32 %s3955_s7, 4  ;;  %s3489_s8 = int_to_ptr.vmem [resolvable:$true] %s3488_s8 }
 0x556   :  { %v3118_v53 = vsel %vm1257_vm1, %v3091_v40, 0.0  ;;  %v3094_v61 = vmul.f32 %v7305_v45, %v7305_v45  ;;  %v3120_v8 = vsel %vm1257_vm1, %v3092_v41, 0.0  ;;  %s3929_s19 = scalar_lea.vmem %s3489_s8, 2048  ;;  %p3934_p1 = scmp.lt.s32.totalorder %s3489_s8, %s3489_s8 }
 0x557   :  { %v3105_v7 = vadd.f32 %v3104_v51, %v3103_v14  ;;  %v3122_v12 = vsel %vm1257_vm1, %v3093_v63, 0.0  ;;  %p3930_p0 = scmp.ne.s32.totalorder %s3489_s8, %s3929_s19  ;;  %p3935_p2 = scmp.lt.s32.totalorder %s3929_s19, %s3929_s19 }
 0x558   :  { %v3124_v44 = vsel %vm1257_vm1, %v3094_v61, 0.0 }
 0x559   :  { %v3107_v16 = vadd.f32 %v3106_v50, %v3105_v7  ;;  %p3936_p3 = por %p3935_p2, %p3934_p1 }
 0x55b   :  { %v3109_v57 = vadd.f32 %v3108_v27, %v3107_v16  ;;  %v3267_v16 = vpop.permute.xlu0 %3266  ;;  %p3937_p4 = pnand %p3936_p3, %p3930_p0 }
 0x55d   :  { %v3111_v21 = vadd.f32 %v3110_v56, %v3109_v57 }
 0x55f   :  { %v3113_v5 = vadd.f32 %v3112_v26, %v3111_v21 }
 0x561   :  { %v3115_v6 = vadd.f32 %v3114_v48, %v3113_v5 }
 0x563   :  { %v3117_v15 = vadd.f32 %v3116_v36, %v3115_v6 }
 0x565   :  { %v3119_v24 = vadd.f32 %v3118_v53, %v3117_v15 }
 0x567   :  { %v3121_v17 = vadd.f32 %v3120_v8, %v3119_v24  ;;  %v3269_v8 = vpop.permute.xlu1 %3268 }
 0x569   :  { %v3123_v55 = vadd.f32 %v3122_v12, %v3121_v17 }
 0x56b   :  { %v3125_v35 = vadd.f32 %v3124_v44, %v3123_v55 }
 0x56d   :  { %v3126_v4 = vrot.slane %v3125_v35, 4 }
 0x56f   :  { %v3127_v58 = vadd.f32 %v3126_v4, %v3125_v35  ;;  %v3271_v35 = vpop.permute.xlu0 %3270 }
 0x571   :  { %v3128_v28 = vrot.slane %v3127_v58, 2 }
 0x573   :  { %v3129_v23 = vadd.f32 %v3128_v28, %v3127_v58 }
 0x575   :  { %v3130_v3 = vrot.slane %v3129_v23, 1 }
 0x577   :  { %v3131_v49 = vadd.f32 %v3130_v3, %v3129_v23 }
 0x579   :  { %v3132_v20 = vmul.f32 0.0078125, %v3131_v49 }
 0x57b   :  { %v3133_v9 = vadd.f32 1e-05, %v3132_v20 }
 0x57d   :  { %3927 = vrsqrt.f32 %v3133_v9 }
 0x58a   :  { %v7316_v62 = vpop.eup %3927 }
 0x58b   :  { %v3135_v52 = vmul.f32 %v7316_v62, %v7228_v2  ;;  %v3136_v39 = vmul.f32 %v7316_v62, %v7231_v11  ;;  %v3137_v42 = vmul.f32 %v7316_v62, %v7234_v59  ;;  %v3138_v46 = vmul.f32 %v7316_v62, %v7237_v0 }
 0x58c   :  { %v3139_v60 = vmul.f32 %v7316_v62, %v7244_v1  ;;  %v3140_v2 = vmul.f32 %v7316_v62, %v7249_v18  ;;  %v3141_v11 = vmul.f32 %v7316_v62, %v7256_v25  ;;  %v3142_v1 = vmul.f32 %v7316_v62, %v7262_v47 }
 0x58d   :  { %v3157_v14 = vmul.f32 %v7321_v43, %v3135_v52  ;;  %v3158_v59 = vmul.f32 %v7321_v43, %v3136_v39  ;;  %v3159_v33 = vmul.f32 %v7321_v43, %v3137_v42  ;;  %v3160_v51 = vmul.f32 %v7321_v43, %v3138_v46 }
 0x58e   :  { %v3161_v7 = vmul.f32 %v7321_v43, %v3139_v60  ;;  %v3162_v0 = vmul.f32 %v7321_v43, %v3140_v2  ;;  %v3148_v18 = vmul.f32 %v7316_v62, %v3076_v37  ;;  %v3163_v10 = vmul.f32 %v7321_v43, %v3141_v11  ;;  %v3273_v11 = vpop.permute.xlu1 %3272 }
 0x58f   :  { %v3179_v13 = vadd.f32 %v7332_v22, %v3157_v14  ;;  %v3180_v25 = vadd.f32 %v7332_v22, %v3158_v59  ;;  %v3181_v50 = vadd.f32 %v7332_v22, %v3159_v33  ;;  %v3182_v30 = vadd.f32 %v7332_v22, %v3160_v51  ;;  %v3275_v59 = vpop.permute.xlu0 %3274 }
 0x590   :  { %v3183_v27 = vadd.f32 %v7332_v22, %v3161_v7  ;;  %v3184_v57 = vadd.f32 %v7332_v22, %v3162_v0  ;;  %v3164_v37 = vmul.f32 %v7321_v43, %v3142_v1  ;;  %v3185_v40 = vadd.f32 %v7332_v22, %v3163_v10 }
 0x591   :  { %v3195_v56 = vmax.f32 %v3179_v13, 0.0  ;;  %v3196_v21 = vmax.f32 %v3180_v25, 0.0  ;;  %v3197_v47 = vmax.f32 %v3181_v50, 0.0  ;;  %v3198_v29 = vmax.f32 %v3182_v30, 0.0 }
 0x592   :  { %v3199_v26 = vmax.f32 %v3183_v27, 0.0  ;;  %v3200_v5 = vmax.f32 %v3184_v57, 0.0  ;;  %v3186_v6 = vadd.f32 %v7332_v22, %v3164_v37  ;;  %v3143_v41 = vmul.f32 %v7316_v62, %v7268_v54 }
 0x593   :  { %v3211_v48 = vpack.c.bf16 %v3196_v21, %v3195_v56  ;;  %v3144_v36 = vmul.f32 %v7316_v62, %v7274_v19  ;;  %v3212_v15 = vpack.c.bf16 %v3198_v29, %v3197_v47  ;;  %v3201_v53 = vmax.f32 %v3185_v40, 0.0  ;;  %v3279_v50 = vpop.permute.xlu0 %3278 }
 0x594   :  { %v3213_v63 = vpack.c.bf16 %v3200_v5, %v3199_v26  ;;  %v3145_v24 = vmul.f32 %v7316_v62, %v7280_v32  ;;  %v3202_v17 = vmax.f32 %v3186_v6, 0.0  ;;  %v3165_v12 = vmul.f32 %v7321_v43, %v3143_v41 }
 0x595   :  { %v3284_v61 = vsel %vm1257_vm1, %v3211_v48, %v3267_v16  ;;  %v3166_v55 = vmul.f32 %v7321_v43, %v3144_v36  ;;  %v3170_v44 = vmul.f32 %v7321_v43, %v3148_v18  ;;  %v3287_v54 = vsel %vm1257_vm1, %v3212_v15, %v3269_v8  ;;  %v3277_v16 = vpop.permute.xlu1 %3276 }
 0x596   :  { %v3146_v19 = vmul.f32 %v7316_v62, %v7286_v31  ;;  %v3167_v4 = vmul.f32 %v7321_v43, %v3145_v24  ;;  %3856 = vmatprep.mubr.msk.bf16.mxu1 %vm2571_vm3, %v3284_v61  ;;  %v3290_v32 = vsel %vm1257_vm1, %v3213_v63, %v3271_v35  ;;  %v3187_v58 = vadd.f32 %v7332_v22, %v3165_v12 }
 0x597   :  { %v3188_v28 = vadd.f32 %v7332_v22, %v3166_v55  ;;  %v3147_v23 = vmul.f32 %v7316_v62, %v7291_v38  ;;  %3857 = vmatmul.mubr.msk.bf16.vlgmr.msra.gmra.mxu1 %vm2571_vm3, %v3287_v54  ;;  %v3214_v31 = vpack.c.bf16 %v3202_v17, %v3201_v53  ;;  %v3149_v42 = vmul.f32 %v7316_v62, %v7299_v34 }
 0x598   :  { %v3168_v3 = vmul.f32 %v7321_v43, %v3146_v19  ;;  %3860 = vmatprep.mubr.msk.bf16.mxu1 %vm2571_vm3, %v3290_v32  ;;  %v3203_v49 = vmax.f32 %v3187_v58, 0.0  ;;  %v3189_v52 = vadd.f32 %v7332_v22, %v3167_v4  ;;  %v3150_v38 = vmul.f32 %v7316_v62, %v7305_v45 }
 0x599   :  { %v3204_v20 = vmax.f32 %v3188_v28, 0.0  ;;  %v3169_v9 = vmul.f32 %v7321_v43, %v3147_v23  ;;  %v3192_v46 = vadd.f32 %v7332_v22, %v3170_v44  ;;  %v3293_v14 = vsel %vm1257_vm1, %v3214_v31, %v3273_v11  ;;  %v3281_v56 = vpop.permute.xlu1 %3280 }
 0x59a   :  { %v3190_v39 = vadd.f32 %v7332_v22, %v3168_v3  ;;  %v3205_v33 = vmax.f32 %v3189_v52, 0.0  ;;  %v3171_v7 = vmul.f32 %v7321_v43, %v3149_v42  ;;  %v3172_v0 = vmul.f32 %v7321_v43, %v3150_v38 }
 0x59b   :  { %v3215_v60 = vpack.c.bf16 %v3204_v20, %v3203_v49  ;;  %v3191_v2 = vadd.f32 %v7332_v22, %v3169_v9  ;;  %v3208_v18 = vmax.f32 %v3192_v46, 0.0 }
 0x59c   :  { %v3206_v51 = vmax.f32 %v3190_v39, 0.0  ;;  %v3193_v62 = vadd.f32 %v7332_v22, %v3171_v7  ;;  %v3194_v13 = vadd.f32 %v7332_v22, %v3172_v0 }
 0x59d   :  { %v3296_v34 = vsel %vm1257_vm1, %v3215_v60, %v3275_v59  ;;  %v3207_v1 = vmax.f32 %v3191_v2, 0.0 }
 0x59e   :  { %v3216_v45 = vpack.c.bf16 %v3206_v51, %v3205_v33  ;;  %v3209_v27 = vmax.f32 %v3193_v62, 0.0  ;;  %v3210_v43 = vmax.f32 %v3194_v13, 0.0 }
 0x59f   :  { %3861 = vmatmul.mubr.msk.bf16.gmra.mxu1 %vm2571_vm3, %v3293_v14  ;;  %v3217_v25 = vpack.c.bf16 %v3208_v18, %v3207_v1 }
 0x5a0   :  { %3864 = vmatprep.mubr.msk.bf16.mxu1 %vm2571_vm3, %v3296_v34  ;;  %v3299_v30 = vsel %vm1257_vm1, %v3216_v45, %v3277_v16  ;;  %v3218_v10 = vpack.c.bf16 %v3210_v43, %v3209_v27 }
 0x5a1   :  { %v3302_v57 = vsel %vm1257_vm1, %v3217_v25, %v3279_v50 }
 0x5a2   :  { %v3305_v21 = vsel %vm1257_vm1, %v3218_v10, %v3281_v56 }
 0x5a7   :  { %3865 = vmatmul.mubr.msk.bf16.gmra.mxu1 %vm2571_vm3, %v3299_v30 }
 0x5a8   :  { %3868 = vmatprep.mubr.msk.bf16.mxu1 %vm2571_vm3, %v3302_v57 }
 0x5af   :  { %3869 = vmatmul.mubr.msk.bf16.gmra.mxu1 %vm2571_vm3, %v3305_v21 }
 0x657   :  { %v3858_v22 = vpop.f32.mrf.mxu1 }
 0x658   :  { %3469 = vst [vmem:[#allocation5 + $0x10] sm:$0xff] %v3858_v22 }
 0x659   :  { %v3404_v47 = vpop.f32.mrf.mxu1 }
 0x65a   :  { %3467 = vst [vmem:[#allocation5] sm:$0xff] %v3404_v47 }
 0x65b   :  { %v3859_v37 = vpop.f32.mrf.mxu1 }
 0x65c   :  { %3470 = vst [vmem:[#allocation5 + $0x18] sm:$0xff] %v3859_v37 }
 0x65d   :  { %v3407_v29 = vpop.f32.mrf.mxu1 }
 0x65e   :  { %3468 = vst [vmem:[#allocation5 + $0x8] sm:$0xff] %v3407_v29 }
 0x65f   :  { %v3862_v26 = vpop.f32.mrf.mxu1 }
 0x660   :  { %3473 = vst [vmem:[#allocation5 + $0x30] sm:$0xff] %v3862_v26 }
 0x661   :  { %v3420_v5 = vpop.f32.mrf.mxu1 }
 0x662   :  { %3471 = vst [vmem:[#allocation5 + $0x20] sm:$0xff] %v3420_v5 }
 0x663   :  { %v3863_v40 = vpop.f32.mrf.mxu1 }
 0x664   :  { %3474 = vst [vmem:[#allocation5 + $0x38] sm:$0xff] %v3863_v40 }
 0x665   :  { %v3423_v48 = vpop.f32.mrf.mxu1 }
 0x666   :  { %3472 = vst [vmem:[#allocation5 + $0x28] sm:$0xff] %v3423_v48 }
 0x667   :  { %v3866_v6 = vpop.f32.mrf.mxu1 }
 0x668   :  { %3477 = vst [vmem:[#allocation5 + $0x50] sm:$0xff] %v3866_v6 }
 0x669   :  { %v3436_v41 = vpop.f32.mrf.mxu1 }
 0x66a   :  { %3475 = vst [vmem:[#allocation5 + $0x40] sm:$0xff] %v3436_v41 }
 0x66b   :  { %v3867_v36 = vpop.f32.mrf.mxu1 }
 0x66c   :  { %3478 = vst [vmem:[#allocation5 + $0x58] sm:$0xff] %v3867_v36 }
 0x66d   :  { %v3439_v15 = vpop.f32.mrf.mxu1 }
 0x66e   :  { %3476 = vst [vmem:[#allocation5 + $0x48] sm:$0xff] %v3439_v15 }
 0x66f   :  { %v3870_v63 = vpop.f32.mrf.mxu1 }
 0x670   :  { %3481 = vst [vmem:[#allocation5 + $0x70] sm:$0xff] %v3870_v63 }
 0x671   :  { %v3452_v53 = vpop.f32.mrf.mxu1 }
 0x672   :  { %3479 = vst [vmem:[#allocation5 + $0x60] sm:$0xff] %v3452_v53 }
 0x673   :  { %v3871_v24 = vpop.f32.mrf.mxu1 }
 0x674   :  { %3482 = vst [vmem:[#allocation5 + $0x78] sm:$0xff] %v3871_v24 }
 0x675   :  { %v3455_v61 = vpop.f32.mrf.mxu1 }
 0x676   :  { %3480 = vst [vmem:[#allocation5 + $0x68] sm:$0xff] %v3455_v61 }
 0x677   :  { %3940 = shalt.err (!%p3937_p4)
}
 0x678   :  { %s3956_s3 = smov 128   ;;  %s3957_s20 = smov 8  }
 0x679   :  { %3494 = dma.vmem_to_hbm [thread:$0]  %s3489_s8, 2048, %s7421_s11, [#allocation6], %s3956_s3, %s3956_s3, %s3957_s20  }
 0x67a   :  { %3949 = dma.done.wait [#allocation6], 2048  }
 0x67b   :  { %3950 = vsyncadd [#allocation6], 4294965248 }
 0x67c   :  { %3498 = vsyncpa [#allocation6], 1 }

</bundles_post_ra>
